<compile_context>
chip_gen: v6e
topology: v6e:2x2x1
jax: 0.10.0
libtpu: 0.0.40
codegen_flags: <defaults>
</compile_context>

<pallas_src>
import functools

import jax
import jax.numpy as jnp
from jax import lax
from jax.experimental import pallas as pl
from jax.experimental.pallas import tpu as pltpu
import numpy as np


# ---------------------------------------------------------------------------
# Kernel
# ---------------------------------------------------------------------------
def _lego_kernel(x_ref, w_ref, out_ref, xpad_ref, xcol_ref, *,
                 H, W, K, C, oc, nb, pad):
    """One grid step processes `nb` images with a single im2col matmul.

    x_ref   : (nb, H, W, C)        bf16  NHWC input tile
    w_ref   : (oc, K*K*C)          bf16  fused (lego conv o 1x1 mix) weights
    out_ref : (nb, oc, H*W)        lane-dense NCHW-flat output tile
    xpad_ref: (nb, H+2p, W+2p, C)  bf16  VMEM scratch: zero-padded input
    xcol_ref: (nb*H*W, K*K*C)      bf16  VMEM scratch: im2col patch matrix
    """
    HW = H * W
    Wp = W + 2 * pad

    # ---- Padding: zero only the halo rows/cols (the interior is fully
    # overwritten below).  Zeroed every step so results stay correct when the
    # batch grid axis is sharded across TensorCores (scratch is per-core).
    if pad:
        zrow = jnp.zeros((nb, pad, Wp, C), dtype=xpad_ref.dtype)
        zcol = jnp.zeros((nb, H, pad, C), dtype=xpad_ref.dtype)
        xpad_ref[:, :pad, :, :] = zrow                 # top halo rows
        xpad_ref[:, pad + H:, :, :] = zrow             # bottom halo rows
        xpad_ref[:, pad:pad + H, :pad, :] = zcol       # left halo cols
        xpad_ref[:, pad:pad + H, pad + W:, :] = zcol   # right halo cols
    xpad_ref[:, pad:pad + H, pad:pad + W, :] = x_ref[...]

    # ---- im2col: one lane-column block of width C per conv tap.
    # The kw (width == sublane) shift is materialized once per kw, giving K
    # realignment copies per step instead of K*K; the kh slice hits an untiled
    # axis and is free.  W % 8 == 0 keeps the reshape a pure tile-stacking
    # (other W still lowers correctly, just with relayout copies).
    for kw in range(K):
        slab = xpad_ref[:, :, kw:kw + W, :]            # (nb, Hp, W, C)
        for kh in range(K):
            t = kh * K + kw
            patch = slab[:, kh:kh + H, :, :].reshape(nb * HW, C)
            xcol_ref[:, t * C:(t + 1) * C] = patch

    # ---- Single fused matmul, contraction depth K*K*C.  Accumulation stays
    # inside the MXU (no f32 accumulator read-modify-write), and the result is
    # already transposed (oc on sublanes, nb*HW lane-dense) so no epilogue
    # transpose is needed.
    res = lax.dot_general(
        w_ref[...], xcol_ref[...],
        dimension_numbers=(((1,), (1,)), ((), ())),    # W @ patches^T
        preferred_element_type=jnp.float32)            # (oc, nb*HW) f32

    # Lane-aligned slice stores (HW is a multiple of 128 for these shapes).
    for b in range(nb):
        out_ref[b] = res[:, b * HW:(b + 1) * HW].astype(out_ref.dtype)


# ---------------------------------------------------------------------------
# Wrapper helpers
# ---------------------------------------------------------------------------
def _round_up(x, m):
    return (x + m - 1) // m * m


def _tile_bytes(shape, dtype):
    """Approximate VMEM footprint including (sublane, lane) padding."""
    itemsize = jnp.dtype(dtype).itemsize
    sub = max(1, 32 // itemsize)               # 8 rows f32, 16 rows bf16
    s = list(shape)
    s[-1] = _round_up(s[-1], 128)
    if len(s) >= 2:
        s[-2] = _round_up(s[-2], sub)
    return int(np.prod(s)) * itemsize


def _vmem_capacity_bytes():
    """Generation-aware VMEM capacity (64 MiB/TC on v7x, 128 MiB on v5e/v6e)."""
    try:
        return int(pltpu.get_tpu_info().vmem_capacity_bytes)
    except Exception:
        return 128 << 20


def _pick_batch_block(N, H, W, C, K, oc, out_dtype, vmem_cap):
    """Largest nb whose per-step footprint fits ~40% of VMEM, keeping >= 2 grid
    steps when N > 1 (so both v7x TensorCores get work)."""
    p = K // 2
    Hp, Wp = H + 2 * p, W + 2 * p
    HW, KKC = H * W, K * K * C
    budget = int(vmem_cap * 0.40)

    def footprint(nb):
        return (2 * _tile_bytes((nb, H, W, C), jnp.bfloat16)     # input (dbl-buffered)
                + 2 * _tile_bytes((nb, oc, HW), out_dtype)       # output (dbl-buffered)
                + _tile_bytes((nb, Hp, Wp, C), jnp.bfloat16)     # padded scratch
                + _tile_bytes((nb * HW, KKC), jnp.bfloat16)      # im2col scratch
                + _tile_bytes((oc, nb * HW), jnp.float32))       # matmul result

    nb_cap = max(1, (N + 1) // 2) if N > 1 else 1
    nb = 1
    for cand in range(2, nb_cap + 1):                            # footprint monotone
        if footprint(cand) <= budget:
            nb = cand
    # TODO(synk): if footprint(1) > budget (huge H*W*C), fall back to an H-tile
    # grid axis with halo-row DMA (memory_space=pl.ANY) instead of relying on
    # vmem_limit_bytes headroom.
    return nb


# ---------------------------------------------------------------------------
# Wrapper
# ---------------------------------------------------------------------------
def lego_conv2d(x_nchw, lego, aux_coefficients, aux_combination, kernel_size,
                n_split, out_dtype=None):
    N, C, H, W = x_nchw.shape
    n_lego, bc, K, _ = lego.shape
    oc = aux_coefficients.shape[1]
    assert K == kernel_size and kernel_size % 2 == 1, "odd kernel_size expected ('same' conv)"
    assert C == n_split * bc
    p = K // 2
    Hp, Wp = H + 2 * p, W + 2 * p
    HW = H * W
    KKC = K * K * C
    # Pass out_dtype=jnp.bfloat16 to halve writeback if downstream allows.
    out_dtype = x_nchw.dtype if out_dtype is None else out_dtype

    # --- parameter glue (f32, parameter-sized): proxy one-hot + fold the 1x1
    # mix into the conv taps.  Column order matches the im2col patch layout:
    # column = (kh*K + kw)*C + (split*bc + cb).
    comb = aux_combination[..., 0, 0]                            # (n_split, oc, n_lego)
    proxy = jax.nn.one_hot(jnp.argmax(comb, axis=2), n_lego, dtype=comb.dtype)
    mix = aux_coefficients[..., 0, 0] * proxy                    # (n_split, oc, n_lego)
    fused = jnp.einsum('lcab,iol->oabic', lego, mix)             # (oc, K, K, n_split, bc)
    # TODO(synk): keep fused weights in f32 at large K*K*C if bf16 rounding
    # exceeds downstream tolerance (the tiny weight tile costs no bandwidth).
    w2 = fused.reshape(oc, KKC).astype(jnp.bfloat16)

    # --- input plumbing: NCHW -> NHWC fused with the bf16 cast (one XLA pass,
    # half the HBM bytes into the kernel).  Padding happens inside the kernel.
    x = jnp.transpose(x_nchw, (0, 2, 3, 1)).astype(jnp.bfloat16)  # (N, H, W, C)

    vmem_cap = _vmem_capacity_bytes()
    nb = _pick_batch_block(N, H, W, C, K, oc, out_dtype, vmem_cap)
    grid = pl.cdiv(N, nb)
    Npad = grid * nb
    if Npad != N:   # non-divisible batch: pad in the wrapper, slice afterwards
        x = jnp.pad(x, ((0, Npad - N), (0, 0), (0, 0), (0, 0)))

    kernel = functools.partial(_lego_kernel, H=H, W=W, K=K, C=C, oc=oc, nb=nb,
                               pad=p)

    out_flat = pl.pallas_call(
        kernel,
        out_shape=jax.ShapeDtypeStruct((Npad, oc, HW), out_dtype),
        grid_spec=pltpu.PrefetchScalarGridSpec(
            num_scalar_prefetch=0,
            grid=(grid,),
            in_specs=[
                pl.BlockSpec((nb, H, W, C), lambda n: (n, 0, 0, 0)),
                pl.BlockSpec((oc, KKC), lambda n: (0, 0)),
            ],
            out_specs=pl.BlockSpec((nb, oc, HW), lambda n: (n, 0, 0)),
            scratch_shapes=[
                pltpu.VMEM((nb, Hp, Wp, C), jnp.bfloat16),   # padded input
                pltpu.VMEM((nb * HW, KKC), jnp.bfloat16),    # im2col patches
            ],
        ),
        compiler_params=pltpu.CompilerParams(
            dimension_semantics=("parallel",),
            vmem_limit_bytes=int(vmem_cap * 0.5),
        ),
    )(x, w2)

    # NCHW output via a metadata reshape (no HBM transpose pass).
    return out_flat[:N].reshape(N, oc, H, W)


# ---------------------------------------------------------------------------
# Plain-JAX reference mirroring the PyTorch forward (f32, NCHW convs)
# ---------------------------------------------------------------------------
def lego_conv2d_reference(x, lego, aux_coef, aux_comb, kernel_size, n_split):
    n_lego, bc = lego.shape[0], lego.shape[1]
    p = kernel_size // 2
    comb = aux_comb[..., 0, 0]
    proxy = jax.nn.one_hot(jnp.argmax(comb, axis=2), n_lego,
                           dtype=comb.dtype)[..., None, None]
    out = 0
    for i in range(n_split):
        xi = x[:, i * bc:(i + 1) * bc]
        feat = lax.conv_general_dilated(
            xi, lego, (1, 1), [(p, p), (p, p)],
            dimension_numbers=('NCHW', 'OIHW', 'NCHW'))
        kern = aux_coef[i] * proxy[i]
        out = out + lax.conv_general_dilated(
            feat, kern, (1, 1), 'VALID',
            dimension_numbers=('NCHW', 'OIHW', 'NCHW'))
    return out


if __name__ == "__main__":
    # module hyperparameters (small, consistent with the PyTorch __init__)
    in_channels, out_channels, kernel_size = 4, 8, 3
    n_split, n_lego_frac = 2, 0.5
    basic_channels = in_channels // n_split          # 2
    n_lego = int(out_channels * n_lego_frac)         # 4

    key = jax.random.PRNGKey(0)
    kx, k1, k2, k3 = jax.random.split(key, 4)

    # deterministic, kaiming-normal-style parameter init (fan_in scaling)
    lego = jax.random.normal(
        k1, (n_lego, basic_channels, kernel_size, kernel_size),
        jnp.float32) * np.sqrt(2.0 / (basic_channels * kernel_size * kernel_size))
    aux_coefficients = jax.random.normal(
        k2, (n_split, out_channels, n_lego, 1, 1),
        jnp.float32) * np.sqrt(2.0 / (out_channels * n_lego))
    aux_combination = jax.random.normal(
        k3, (n_split, out_channels, n_lego, 1, 1),
        jnp.float32) * np.sqrt(2.0 / (out_channels * n_lego))

    x = jax.random.normal(kx, (2, in_channels, 16, 16), jnp.float32)  # NCHW

    fn = jax.jit(functools.partial(lego_conv2d, kernel_size=kernel_size,
                                   n_split=n_split))
    out = jax.block_until_ready(fn(x, lego, aux_coefficients, aux_combination))

    ref = jax.block_until_ready(
        lego_conv2d_reference(x, lego, aux_coefficients, aux_combination,
                              kernel_size, n_split))

    # bf16 matmul operands with f32 MXU accumulation -> relaxed tolerance.
    np.testing.assert_allclose(np.asarray(out), np.asarray(ref),
                               rtol=3e-2, atol=3e-2)
    print("KERNEL_OK")
</pallas_src>

<mosaic_0001>
module attributes {stable_mosaic.version = 11 : i64} {
  func.func @_lego_kernel(%arg0: i32, %arg1: memref<1x16x16x4xbf16, #tpu.memory_space<vmem>>, %arg2: memref<8x36xbf16, #tpu.memory_space<vmem>>, %arg3: memref<1x8x256xf32, #tpu.memory_space<vmem>>, %arg4: memref<1x18x18x4xbf16, #tpu.memory_space<vmem>>, %arg5: memref<256x36xbf16, #tpu.memory_space<vmem>>) attributes {dimension_semantics = [#tpu.dimension_semantics<parallel>], iteration_bounds = array<i64: 2>, scalar_prefetch = 0 : i64, scratch_operands = 2 : i64, tpu.core_type = #tpu.core_type<tc>, window_params = [{transform_indices = @transform_0, window_bounds = array<i64: 1, 16, 16, 4>}, {pipeline_mode = #tpu.pipeline_mode<synchronous>, transform_indices = @transform_1, window_bounds = array<i64: 8, 36>}, {transform_indices = @transform_2, window_bounds = array<i64: 1, 8, 256>}]} {
    %cst = arith.constant 0.000000e+00 : bf16
    %0 = vector.broadcast %cst : bf16 to vector<1x1x18x4xbf16>
    %cst_0 = arith.constant 0.000000e+00 : bf16
    %1 = vector.broadcast %cst_0 : bf16 to vector<1x16x1x4xbf16>
    %c0 = arith.constant 0 : index
    %c0_1 = arith.constant 0 : index
    %c0_2 = arith.constant 0 : index
    %c0_3 = arith.constant 0 : index
    %2 = vector.load %arg4[%c0, %c0_1, %c0_2, %c0_3] : memref<1x18x18x4xbf16, #tpu.memory_space<vmem>>, vector<1x1x18x4xbf16>
    tpu.vector_store %arg4[%c0, %c0_1, %c0_2, %c0_3], %0 {strides = array<i32>} : memref<1x18x18x4xbf16, #tpu.memory_space<vmem>>, vector<1x1x18x4xbf16>,
    %c0_4 = arith.constant 0 : index
    %c17 = arith.constant 17 : index
    %c0_5 = arith.constant 0 : index
    %c0_6 = arith.constant 0 : index
    %3 = vector.load %arg4[%c0_4, %c17, %c0_5, %c0_6] : memref<1x18x18x4xbf16, #tpu.memory_space<vmem>>, vector<1x1x18x4xbf16>
    tpu.vector_store %arg4[%c0_4, %c17, %c0_5, %c0_6], %0 {strides = array<i32>} : memref<1x18x18x4xbf16, #tpu.memory_space<vmem>>, vector<1x1x18x4xbf16>,
    %c0_7 = arith.constant 0 : index
    %c1 = arith.constant 1 : index
    %c0_8 = arith.constant 0 : index
    %c0_9 = arith.constant 0 : index
    %4 = vector.load %arg4[%c0_7, %c1, %c0_8, %c0_9] : memref<1x18x18x4xbf16, #tpu.memory_space<vmem>>, vector<1x16x1x4xbf16>
    tpu.vector_store %arg4[%c0_7, %c1, %c0_8, %c0_9], %1 {strides = array<i32>} : memref<1x18x18x4xbf16, #tpu.memory_space<vmem>>, vector<1x16x1x4xbf16>,
    %c0_10 = arith.constant 0 : index
    %c1_11 = arith.constant 1 : index
    %c17_12 = arith.constant 17 : index
    %c0_13 = arith.constant 0 : index
    %5 = vector.load %arg4[%c0_10, %c1_11, %c17_12, %c0_13] : memref<1x18x18x4xbf16, #tpu.memory_space<vmem>>, vector<1x16x1x4xbf16>
    tpu.vector_store %arg4[%c0_10, %c1_11, %c17_12, %c0_13], %1 {strides = array<i32>} : memref<1x18x18x4xbf16, #tpu.memory_space<vmem>>, vector<1x16x1x4xbf16>,
    %c0_14 = arith.constant 0 : index
    %c0_15 = arith.constant 0 : index
    %c0_16 = arith.constant 0 : index
    %c0_17 = arith.constant 0 : index
    %6 = vector.load %arg1[%c0_14, %c0_15, %c0_16, %c0_17] : memref<1x16x16x4xbf16, #tpu.memory_space<vmem>>, vector<1x16x16x4xbf16>
    %c0_18 = arith.constant 0 : index
    %c1_19 = arith.constant 1 : index
    %c1_20 = arith.constant 1 : index
    %c0_21 = arith.constant 0 : index
    %7 = vector.load %arg4[%c0_18, %c1_19, %c1_20, %c0_21] : memref<1x18x18x4xbf16, #tpu.memory_space<vmem>>, vector<1x16x16x4xbf16>
    tpu.vector_store %arg4[%c0_18, %c1_19, %c1_20, %c0_21], %6 {strides = array<i32>} : memref<1x18x18x4xbf16, #tpu.memory_space<vmem>>, vector<1x16x16x4xbf16>,
    %c0_22 = arith.constant 0 : index
    %c0_23 = arith.constant 0 : index
    %c0_24 = arith.constant 0 : index
    %c0_25 = arith.constant 0 : index
    %8 = vector.load %arg4[%c0_22, %c0_23, %c0_24, %c0_25] : memref<1x18x18x4xbf16, #tpu.memory_space<vmem>>, vector<1x18x16x4xbf16>
    %9 = vector.extract_strided_slice %8 {offsets = [0, 0, 0, 0], sizes = [1, 16, 16, 4], strides = [1, 1, 1, 1]} : vector<1x18x16x4xbf16> to vector<1x16x16x4xbf16>
    %10 = vector.shape_cast %9 : vector<1x16x16x4xbf16> to vector<256x4xbf16>
    %c0_26 = arith.constant 0 : index
    %c0_27 = arith.constant 0 : index
    %11 = vector.load %arg5[%c0_26, %c0_27] : memref<256x36xbf16, #tpu.memory_space<vmem>>, vector<256x4xbf16>
    tpu.vector_store %arg5[%c0_26, %c0_27], %10 {strides = array<i32>} : memref<256x36xbf16, #tpu.memory_space<vmem>>, vector<256x4xbf16>,
    %12 = vector.extract_strided_slice %8 {offsets = [0, 1, 0, 0], sizes = [1, 16, 16, 4], strides = [1, 1, 1, 1]} : vector<1x18x16x4xbf16> to vector<1x16x16x4xbf16>
    %13 = vector.shape_cast %12 : vector<1x16x16x4xbf16> to vector<256x4xbf16>
    %c0_28 = arith.constant 0 : index
    %c12 = arith.constant 12 : index
    %14 = vector.load %arg5[%c0_28, %c12] : memref<256x36xbf16, #tpu.memory_space<vmem>>, vector<256x4xbf16>
    tpu.vector_store %arg5[%c0_28, %c12], %13 {strides = array<i32>} : memref<256x36xbf16, #tpu.memory_space<vmem>>, vector<256x4xbf16>,
    %15 = vector.extract_strided_slice %8 {offsets = [0, 2, 0, 0], sizes = [1, 16, 16, 4], strides = [1, 1, 1, 1]} : vector<1x18x16x4xbf16> to vector<1x16x16x4xbf16>
    %16 = vector.shape_cast %15 : vector<1x16x16x4xbf16> to vector<256x4xbf16>
    %c0_29 = arith.constant 0 : index
    %c24 = arith.constant 24 : index
    %17 = vector.load %arg5[%c0_29, %c24] : memref<256x36xbf16, #tpu.memory_space<vmem>>, vector<256x4xbf16>
    tpu.vector_store %arg5[%c0_29, %c24], %16 {strides = array<i32>} : memref<256x36xbf16, #tpu.memory_space<vmem>>, vector<256x4xbf16>,
    %c0_30 = arith.constant 0 : index
    %c0_31 = arith.constant 0 : index
    %c1_32 = arith.constant 1 : index
    %c0_33 = arith.constant 0 : index
    %18 = vector.load %arg4[%c0_30, %c0_31, %c1_32, %c0_33] : memref<1x18x18x4xbf16, #tpu.memory_space<vmem>>, vector<1x18x16x4xbf16>
    %19 = vector.extract_strided_slice %18 {offsets = [0, 0, 0, 0], sizes = [1, 16, 16, 4], strides = [1, 1, 1, 1]} : vector<1x18x16x4xbf16> to vector<1x16x16x4xbf16>
    %20 = vector.shape_cast %19 : vector<1x16x16x4xbf16> to vector<256x4xbf16>
    %c0_34 = arith.constant 0 : index
    %c4 = arith.constant 4 : index
    %21 = vector.load %arg5[%c0_34, %c4] : memref<256x36xbf16, #tpu.memory_space<vmem>>, vector<256x4xbf16>
    tpu.vector_store %arg5[%c0_34, %c4], %20 {strides = array<i32>} : memref<256x36xbf16, #tpu.memory_space<vmem>>, vector<256x4xbf16>,
    %22 = vector.extract_strided_slice %18 {offsets = [0, 1, 0, 0], sizes = [1, 16, 16, 4], strides = [1, 1, 1, 1]} : vector<1x18x16x4xbf16> to vector<1x16x16x4xbf16>
    %23 = vector.shape_cast %22 : vector<1x16x16x4xbf16> to vector<256x4xbf16>
    %c0_35 = arith.constant 0 : index
    %c16 = arith.constant 16 : index
    %24 = vector.load %arg5[%c0_35, %c16] : memref<256x36xbf16, #tpu.memory_space<vmem>>, vector<256x4xbf16>
    tpu.vector_store %arg5[%c0_35, %c16], %23 {strides = array<i32>} : memref<256x36xbf16, #tpu.memory_space<vmem>>, vector<256x4xbf16>,
    %25 = vector.extract_strided_slice %18 {offsets = [0, 2, 0, 0], sizes = [1, 16, 16, 4], strides = [1, 1, 1, 1]} : vector<1x18x16x4xbf16> to vector<1x16x16x4xbf16>
    %26 = vector.shape_cast %25 : vector<1x16x16x4xbf16> to vector<256x4xbf16>
    %c0_36 = arith.constant 0 : index
    %c28 = arith.constant 28 : index
    %27 = vector.load %arg5[%c0_36, %c28] : memref<256x36xbf16, #tpu.memory_space<vmem>>, vector<256x4xbf16>
    tpu.vector_store %arg5[%c0_36, %c28], %26 {strides = array<i32>} : memref<256x36xbf16, #tpu.memory_space<vmem>>, vector<256x4xbf16>,
    %c0_37 = arith.constant 0 : index
    %c0_38 = arith.constant 0 : index
    %c2 = arith.constant 2 : index
    %c0_39 = arith.constant 0 : index
    %28 = vector.load %arg4[%c0_37, %c0_38, %c2, %c0_39] : memref<1x18x18x4xbf16, #tpu.memory_space<vmem>>, vector<1x18x16x4xbf16>
    %29 = vector.extract_strided_slice %28 {offsets = [0, 0, 0, 0], sizes = [1, 16, 16, 4], strides = [1, 1, 1, 1]} : vector<1x18x16x4xbf16> to vector<1x16x16x4xbf16>
    %30 = vector.shape_cast %29 : vector<1x16x16x4xbf16> to vector<256x4xbf16>
    %c0_40 = arith.constant 0 : index
    %c8 = arith.constant 8 : index
    %31 = vector.load %arg5[%c0_40, %c8] : memref<256x36xbf16, #tpu.memory_space<vmem>>, vector<256x4xbf16>
    tpu.vector_store %arg5[%c0_40, %c8], %30 {strides = array<i32>} : memref<256x36xbf16, #tpu.memory_space<vmem>>, vector<256x4xbf16>,
    %32 = vector.extract_strided_slice %28 {offsets = [0, 1, 0, 0], sizes = [1, 16, 16, 4], strides = [1, 1, 1, 1]} : vector<1x18x16x4xbf16> to vector<1x16x16x4xbf16>
    %33 = vector.shape_cast %32 : vector<1x16x16x4xbf16> to vector<256x4xbf16>
    %c0_41 = arith.constant 0 : index
    %c20 = arith.constant 20 : index
    %34 = vector.load %arg5[%c0_41, %c20] : memref<256x36xbf16, #tpu.memory_space<vmem>>, vector<256x4xbf16>
    tpu.vector_store %arg5[%c0_41, %c20], %33 {strides = array<i32>} : memref<256x36xbf16, #tpu.memory_space<vmem>>, vector<256x4xbf16>,
    %35 = vector.extract_strided_slice %28 {offsets = [0, 2, 0, 0], sizes = [1, 16, 16, 4], strides = [1, 1, 1, 1]} : vector<1x18x16x4xbf16> to vector<1x16x16x4xbf16>
    %36 = vector.shape_cast %35 : vector<1x16x16x4xbf16> to vector<256x4xbf16>
    %c0_42 = arith.constant 0 : index
    %c32 = arith.constant 32 : index
    %37 = vector.load %arg5[%c0_42, %c32] : memref<256x36xbf16, #tpu.memory_space<vmem>>, vector<256x4xbf16>
    tpu.vector_store %arg5[%c0_42, %c32], %36 {strides = array<i32>} : memref<256x36xbf16, #tpu.memory_space<vmem>>, vector<256x4xbf16>,
    %c0_43 = arith.constant 0 : index
    %c0_44 = arith.constant 0 : index
    %38 = vector.load %arg2[%c0_43, %c0_44] : memref<8x36xbf16, #tpu.memory_space<vmem>>, vector<8x36xbf16>
    %c0_45 = arith.constant 0 : index
    %c0_46 = arith.constant 0 : index
    %39 = vector.load %arg5[%c0_45, %c0_46] : memref<256x36xbf16, #tpu.memory_space<vmem>>, vector<256x36xbf16>
    %cst_47 = arith.constant dense<0.000000e+00> : vector<8x256xf32>
    %40 = tpu.matmul %38, %39, %cst_47 {dimension_numbers = #tpu.dot_dimension_numbers<[1], [1], [0], [0], [0, 0, 1, 0], [], []>} : vector<8x36xbf16>, vector<256x36xbf16>, vector<8x256xf32> -> vector<8x256xf32>
    %c0_48 = arith.constant 0 : index
    %c0_49 = arith.constant 0 : index
    %c0_50 = arith.constant 0 : index
    %41 = vector.load %arg3[%c0_48, %c0_49, %c0_50] : memref<1x8x256xf32, #tpu.memory_space<vmem>>, vector<1x8x256xf32>
    %42 = vector.shape_cast %41 : vector<1x8x256xf32> to vector<8x256xf32>
    %43 = vector.shape_cast %40 : vector<8x256xf32> to vector<1x8x256xf32>
    tpu.vector_store %arg3[%c0_48, %c0_49, %c0_50], %43 {strides = array<i32>} : memref<1x8x256xf32, #tpu.memory_space<vmem>>, vector<1x8x256xf32>,
    return
  }
  func.func @transform_0(%arg0: i32) -> (i32, i32, i32, i32) {
    %c0_i32 = arith.constant 0 : i32
    %c0_i32_0 = arith.constant 0 : i32
    %c0_i32_1 = arith.constant 0 : i32
    %c0_i32_2 = arith.constant 0 : i32
    return %arg0, %c0_i32, %c0_i32_0, %c0_i32_1 : i32, i32, i32, i32
  }
  func.func @transform_1(%arg0: i32) -> (i32, i32) {
    %c0_i32 = arith.constant 0 : i32
    %c0_i32_0 = arith.constant 0 : i32
    %c0_i32_1 = arith.constant 0 : i32
    return %c0_i32, %c0_i32_0 : i32, i32
  }
  func.func @transform_2(%arg0: i32) -> (i32, i32, i32) {
    %c0_i32 = arith.constant 0 : i32
    %c0_i32_0 = arith.constant 0 : i32
    %c0_i32_1 = arith.constant 0 : i32
    return %arg0, %c0_i32, %c0_i32_0 : i32, i32, i32
  }
}

</mosaic_0001>

<bundles_post_ra>
// kernel: lego_conv2d.1
= control target key start
LH: loop header
LB: loop body
LE: loop exit
PB: predicated region body
PF: predicated region fallthrough
CT: control target
= control target key end

     0   :  { %s2986_s9 = smov 0   ;;  %s4616_s0 = inlined_call_operand.vmem [shape: bf16[2,16,16,4], index: 0, kind: input, shape index: {}]   ;;  %s4617_s1 = inlined_call_operand.vmem [shape: bf16[8,36], index: 1, kind: input, shape index: {}]   ;;  %s4618_s2 = inlined_call_operand.vmem [shape: f32[2,8,256], index: 2, kind: output, shape index: {}]  }
   0x1 LB: > { %s2847_s10 = sadd.s32 4294967295, %s2960_s9   ;;  %p2851_p0 = scmp.ge.s32.totalorder %s2960_s9, 1  ;;  %s2960_s9 = sphi %s2986_s9, %s12_s9  }
   0x2   : > { %p112_p1 = scmp.lt.s32.totalorder %s2960_s9, 3 }
   0x4   : > { %p113_p2 = pnand %p2851_p0, %p112_p1 }
   0x5   : > { %p134_p3 = scmp.lt.s32.totalorder (!%p113_p2), %s2847_s10, 1  ;;  %s2963_s15 = smov (!%p113_p2), 12  }
   0x6   : > { %116 = sbr.rel (%p113_p2) target bundleno = 885 (0x375), region = 28  ;;  %s2964_s16 = smov (!%p113_p2), 24  }
   0x7   : > { %s2965_s17 = smov (!%p113_p2), 4   ;;  %s2966_s18 = smov (!%p113_p2), 16  }
   0x8   : > { %s2967_s19 = smov (!%p113_p2), 28   ;;  %s2968_s20 = smov (!%p113_p2), 8  }
   0x9   : > { %s2969_s21 = smov (!%p113_p2), 20   ;;  %s2970_s22 = smov (!%p113_p2), 32  }
   0xb   : > { %vm148_vm0 = vcmask 24576   ;;  %vm156_vm1 = vsmask.f32 256  ;;  %v161_v1 = vld [vmem:[#allocation2 + $0x18] sm:$0x1]  ;;  %s4632_s10 = smov (!%p134_p3, %s2847_s10), 1 }
   0xc   : > { %vm2996_vm2 = vmand %vm148_vm0, %vm156_vm1  ;;  %v158_v2 = vld [vmem:[#allocation2 + $0xc] sm:$0x1]  ;;  %vm145_vm3 = vcmask 27648   ;;  %v164_v5 = vld [vmem:[#allocation2 + $0x24] sm:$0x1]  ;;  %v2962_v7 = vmov 0  }
   0xd   : > { %v162_v3 = vsel %vm2996_vm2, 0, %v161_v1  ;;  %v159_v4 = vsel %vm2996_vm2, 0, %v158_v2  ;;  %v167_v6 = vld [vmem:[#allocation2 + $0x30] sm:$0x1]  ;;  %146 = vst.msk [vmem:[#allocation2] sm:$0xf] %vm145_vm3, %v2962_v7 }
   0xe   : > { %163 = vst [vmem:[#allocation2 + $0x18] sm:$0x1] %v162_v3  ;;  %160 = vst [vmem:[#allocation2 + $0xc] sm:$0x1] %v159_v4  ;;  %s2893_s11 = sshll.u32 %s4632_s10, 7  ;;  %v165_v8 = vsel %vm2996_vm2, 0, %v164_v5 }
   0xf   : > { %147 = vst.msk [vmem:[#allocation2 + $0x4] sm:$0xf] %vm145_vm3, %v2962_v7  ;;  %151 = vst.msk [vmem:[#allocation2 + $0xcc] sm:$0xf] %vm145_vm3, %v2962_v7  ;;  %v168_v9 = vsel %vm2996_vm2, 0, %v167_v6  ;;  %s3020_s14 = scalar_lea.vmem %s4616_s0, %s2893_s11  ;;  %vm920_vm9 = vcmask 126048  }
  0x10   : > { %149 = vst.msk [vmem:[#allocation2 + $0x8] sm:$0x1] %vm148_vm0, %v2962_v7  ;;  %153 = vst.msk [vmem:[#allocation2 + $0xd4] sm:$0x1] %vm148_vm0, %v2962_v7  ;;  %v170_v10 = vld [vmem:[#allocation2 + $0x3c] sm:$0x1] }
  0x11   : > { %152 = vst.msk [vmem:[#allocation2 + $0xd0] sm:$0xf] %vm145_vm3, %v2962_v7  ;;  %vm206_vm4 = vsmask.f32 7938  ;;  %vm288_vm5 = vsmask.f32 4368 }
  0x12   : > { %166 = vst [vmem:[#allocation2 + $0x24] sm:$0x1] %v165_v8  ;;  %169 = vst [vmem:[#allocation2 + $0x30] sm:$0x1] %v168_v9  ;;  %v171_v11 = vsel %vm2996_vm2, 0, %v170_v10  ;;  %vm1051_vm13 = vcmask 224448  }
  0x13   : > { %v258_v12 = vld [vmem:[%s3020_s14 + $0x8] sm:$0xf]  ;;  %v256_v13 = vld [vmem:[%s3020_s14] sm:$0xf]  ;;  %v259_v14 = vld [vmem:[%s3020_s14 + $0xc] sm:$0xf] }
  0x14   : > { %172 = vst [vmem:[#allocation2 + $0x3c] sm:$0x1] %v171_v11  ;;  %v308_v15 = vshrl.u32 %v258_v12, 16  ;;  %v311_v16 = vshll.u32 %v258_v12, 16  ;;  %v291_v17 = vshrl.u32 %v256_v13, 16  ;;  %v294_v18 = vshll.u32 %v256_v13, 16  ;;  %vm3032_vm6 = vmand %vm145_vm3, %vm206_vm4 }
  0x15   : > { %v257_v19 = vld [vmem:[%s3020_s14 + $0x4] sm:$0xf]  ;;  %v316_v20 = vshrl.u32 %v259_v14, 16  ;;  %v319_v21 = vshll.u32 %v259_v14, 16  ;;  %v260_v24 = vld [vmem:[%s3020_s14 + $0x10] sm:$0xf]  ;;  %vm3042_vm7 = vmor %vm156_vm1, %vm288_vm5 }
  0x16   : > { %v299_v22 = vshrl.u32 %v257_v19, 16  ;;  %v302_v23 = vshll.u32 %v257_v19, 16  ;;  %v310_v25 = vrot.slane %v308_v15, 7  ;;  %v293_v26 = vrot.slane %v291_v17, 7  ;;  %v261_v27 = vld [vmem:[%s3020_s14 + $0x14] sm:$0xf]  ;;  %vm3397_vm8 = vmand %vm148_vm0, %vm206_vm4 }
  0x17   : > { %v325_v28 = vshrl.u32 %v260_v24, 16  ;;  %v328_v29 = vshll.u32 %v260_v24, 16  ;;  %v619_v31 = vld [vmem:[#allocation2 + $0x18] sm:$0xf]  ;;  %v612_v32 = vld [vmem:[#allocation2 + $0xc] sm:$0xf] }
  0x18   : > { %v3036_v33 = vrot.slane %v316_v20, 7  ;;  %v3038_v34 = vrot.slane %v299_v22, 7  ;;  %v313_v35 = vor.u32 %v311_v16, %v310_v25  ;;  %v296_v36 = vor.u32 %v294_v18, %v293_v26  ;;  %v262_v40 = vld [vmem:[%s3020_s14 + $0x18] sm:$0xf]  ;;  %v263_v47 = vld [vmem:[%s3020_s14 + $0x1c] sm:$0xf] }
  0x19   : > { %v314_v38 = vrot.slane %v310_v25, 4  ;;  %v297_v39 = vrot.slane %v293_v26, 4  ;;  %v327_v45 = vrot.slane %v325_v28, 7  ;;  %v333_v46 = vshrl.u32 %v261_v27, 16  ;;  %v264_v48 = vld [vmem:[%s3020_s14 + $0x20] sm:$0xf] }
  0x1a   : > { %v321_v41 = vor.u32 %v319_v21, %v3036_v33  ;;  %v304_v42 = vor.u32 %v302_v23, %v3038_v34  ;;  %v620_v43 = vsel %vm3032_vm6, %v313_v35, %v619_v31  ;;  %v613_v44 = vsel %vm3032_vm6, %v296_v36, %v612_v32  ;;  %v626_v52 = vld [vmem:[#allocation2 + $0x24] sm:$0xf]  ;;  %v3065_v63 = vld [vmem:[%s3020_s14 + $0x28] sm:$0xf]  ;;  %v633_v3 = vld [vmem:[#allocation2 + $0x30] sm:$0xf] }
  0x1b   : > { %621 = vst [vmem:[#allocation2 + $0x18] sm:$0xf] %v620_v43  ;;  %614 = vst [vmem:[#allocation2 + $0xc] sm:$0xf] %v613_v44  ;;  %v336_v51 = vshll.u32 %v261_v27, 16  ;;  %v342_v53 = vshrl.u32 %v262_v40, 16  ;;  %v330_v56 = vor.u32 %v328_v29, %v327_v45 }
  0x1c   : > { %v322_v49 = vsel %vm3042_vm7, %v314_v38, %v321_v41  ;;  %v305_v50 = vsel %vm3042_vm7, %v297_v39, %v304_v42  ;;  %v331_v54 = vrot.slane %v327_v45, 4  ;;  %v3061_v55 = vrot.slane %v333_v46, 7  ;;  %v265_v58 = vld [vmem:[%s3020_s14 + $0x24] sm:$0xf]  ;;  %v640_v9 = vld [vmem:[#allocation2 + $0x3c] sm:$0xf] }
  0x1d   : > { %622 = vst.msk [vmem:[#allocation2 + $0x1c] sm:$0xf] %vm145_vm3, %v322_v49  ;;  %615 = vst.msk [vmem:[#allocation2 + $0x10] sm:$0xf] %vm145_vm3, %v305_v50  ;;  %v345_v57 = vshll.u32 %v262_v40, 16  ;;  %v344_v59 = vrot.slane %v342_v53, 7  ;;  %v627_v2 = vsel %vm3032_vm6, %v330_v56, %v626_v52 }
  0x1e   : > { %v350_v60 = vshrl.u32 %v263_v47, 16  ;;  %v353_v61 = vshll.u32 %v263_v47, 16  ;;  %v359_v62 = vshrl.u32 %v264_v48, 16  ;;  %v338_v1 = vor.u32 %v336_v51, %v3061_v55  ;;  %628 = vst [vmem:[#allocation2 + $0x24] sm:$0xf] %v627_v2  ;;  %s2894_s25 = sshll.u32 %s4632_s10, 4 }
  0x1f   : > { %v362_v4 = vshll.u32 %v264_v48, 16  ;;  %v348_v5 = vrot.slane %v344_v59, 4  ;;  %v347_v7 = vor.u32 %v345_v57, %v344_v59  ;;  %v367_v11 = vshrl.u32 %v265_v58, 16  ;;  %v267_v13 = vld [vmem:[%s3020_s14 + $0x2c] sm:$0xf]  ;;  %s143_s28 = scalar_lea.vmem %s4618_s2, %s2894_s25 }
  0x20   : > { %v3070_v6 = vrot.slane %v350_v60, 7  ;;  %v361_v8 = vrot.slane %v359_v62, 7  ;;  %v339_v10 = vsel %vm3042_vm7, %v331_v54, %v338_v1  ;;  %v370_v12 = vshll.u32 %v265_v58, 16  ;;  %v173_v15 = vld [vmem:[#allocation2 + $0x48] sm:$0x1] }
  0x21   : > { %v376_v14 = vshrl.u32 %v3065_v63, 16  ;;  %629 = vst.msk [vmem:[#allocation2 + $0x28] sm:$0xf] %vm145_vm3, %v339_v10  ;;  %v634_v17 = vsel %vm3032_vm6, %v347_v7, %v633_v3  ;;  %v3081_v19 = vld [vmem:[%s3020_s14 + $0x30] sm:$0xf]  ;;  %v3088_v23 = vrot.slane %v367_v11, 7 }
  0x22   : > { %v355_v16 = vor.u32 %v353_v61, %v3070_v6  ;;  %v365_v18 = vrot.slane %v361_v8, 4  ;;  %v3084_v20 = vld [vmem:[%s3020_s14 + $0x34] sm:$0xf]  ;;  %v3086_v21 = vld [vmem:[#allocation2 + $0x18] sm:$0xf]  ;;  %v364_v24 = vor.u32 %v362_v4, %v361_v8  ;;  %v384_v29 = vshrl.u32 %v267_v13, 16 }
  0x23   : > { %v726_v22 = vld [vmem:[#allocation2 + $0xc] sm:$0xf]  ;;  %635 = vst [vmem:[#allocation2 + $0x30] sm:$0xf] %v634_v17  ;;  %v378_v25 = vrot.slane %v376_v14, 7  ;;  %828 = vrot.lane.b32.xlu1 %v3086_v21, %s2963_s15  ;;  %v372_v31 = vor.u32 %v370_v12, %v3088_v23  ;;  %v387_v41 = vshll.u32 %v267_v13, 16 }
  0x24   : > { %764 = vst.msk [vmem:[#allocation3 + $0x10] sm:$0xf] %vm145_vm3, %v3086_v21  ;;  %824 = vrot.lane.b32.xlu0 %v726_v22, %s2963_s15  ;;  %762 = vst.msk [vmem:[#allocation3 + $0x8] sm:$0xf] %vm145_vm3, %v726_v22  ;;  %v3096_v26 = vld [vmem:[#allocation2 + $0x1c] sm:$0xf]  ;;  %v356_v28 = vsel %vm3042_vm7, %v348_v5, %v355_v16  ;;  %v641_v32 = vsel %vm3032_vm6, %v364_v24, %v640_v9 }
  0x25   : > { %v727_v27 = vld [vmem:[#allocation2 + $0x10] sm:$0xf]  ;;  %765 = vst.msk [vmem:[#allocation3 + $0x14] sm:$0xf] %vm145_vm3, %v3096_v26  ;;  %636 = vst.msk [vmem:[#allocation2 + $0x34] sm:$0xf] %vm145_vm3, %v356_v28  ;;  %v373_v45 = vsel %vm3042_vm7, %v365_v18, %v372_v31 }
  0x26   : > { %763 = vst.msk [vmem:[#allocation3 + $0xc] sm:$0xf] %vm145_vm3, %v727_v27  ;;  %v176_v35 = vld [vmem:[#allocation2 + $0x54] sm:$0x1]  ;;  %v3108_v36 = vld [vmem:[%s3020_s14 + $0x38] sm:$0xf] }
  0x27   : > { %v271_v38 = vld [vmem:[%s3020_s14 + $0x3c] sm:$0xf]  ;;  %642 = vst [vmem:[#allocation2 + $0x3c] sm:$0xf] %v641_v32  ;;  %v382_v39 = vrot.slane %v378_v25, 4  ;;  %v3111_v40 = vrot.slane %v384_v29, 7  ;;  %830 = vrot.lane.b32.xlu1 %v3096_v26, %s2963_s15 }
  0x28   : > { %v174_v42 = vsel %vm2996_vm2, 0, %v173_v15  ;;  %v179_v43 = vld [vmem:[#allocation2 + $0x60] sm:$0x1]  ;;  %v3115_v44 = vld [vmem:[#allocation2 + $0x24] sm:$0xf]  ;;  %v379_v46 = vshll.u32 %v3065_v63, 16  ;;  %826 = vrot.lane.b32.xlu0 %v727_v27, %s2963_s15 }
  0x29   : > { %175 = vst [vmem:[#allocation2 + $0x48] sm:$0x1] %v174_v42  ;;  %v393_v47 = vshrl.u32 %v3081_v19, 16  ;;  %v401_v48 = vshrl.u32 %v3084_v20, 16  ;;  %v3123_v49 = vld [vmem:[%s3020_s14 + $0x40] sm:$0xf]  ;;  %v389_v50 = vor.u32 %v387_v41, %v3111_v40 }
  0x2a   : > { %766 = vst.msk [vmem:[#allocation3 + $0x18] sm:$0xf] %vm145_vm3, %v3115_v44  ;;  %643 = vst.msk [vmem:[#allocation2 + $0x40] sm:$0xf] %vm145_vm3, %v373_v45  ;;  %v396_v51 = vshll.u32 %v3081_v19, 16  ;;  %v404_v52 = vshll.u32 %v3084_v20, 16  ;;  %v381_v4 = vor.u32 %v379_v46, %v378_v25 }
  0x2b   : > { %v177_v53 = vsel %vm2996_vm2, 0, %v176_v35  ;;  %v273_v54 = vld [vmem:[%s3020_s14 + $0x44] sm:$0xf]  ;;  %v182_v56 = vld [vmem:[#allocation2 + $0x6c] sm:$0x1]  ;;  %v395_v58 = vrot.slane %v393_v47, 7  ;;  %v390_v63 = vsel %vm3042_vm7, %v382_v39, %v389_v50 }
  0x2c   : > { %v3137_v57 = vld [vmem:[#allocation2 + $0x28] sm:$0xf]  ;;  %v3139_v59 = vrot.slane %v401_v48, 7  ;;  %178 = vst [vmem:[#allocation2 + $0x54] sm:$0x1] %v177_v53  ;;  %v410_v60 = vshrl.u32 %v3108_v36, 16  ;;  %832 = vrot.lane.b32.xlu0 %v3115_v44, %s2963_s15 }
  0x2d   : > { %v413_v61 = vshll.u32 %v3108_v36, 16  ;;  %767 = vst.msk [vmem:[#allocation3 + $0x1c] sm:$0xf] %vm145_vm3, %v3137_v57  ;;  %v3145_v62 = vld [vmem:[#allocation2 + $0x30] sm:$0xf]  ;;  %v418_v1 = vshrl.u32 %v271_v38, 16  ;;  %834 = vrot.lane.b32.xlu1 %v3137_v57, %s2963_s15  ;;  %v398_v11 = vor.u32 %v396_v51, %v395_v58 }
  0x2e   : > { %v421_v2 = vshll.u32 %v271_v38, 16  ;;  %v180_v3 = vsel %vm2996_vm2, 0, %v179_v43  ;;  %768 = vst.msk [vmem:[#allocation3 + $0x20] sm:$0xf] %vm145_vm3, %v3145_v62  ;;  %650 = vst.msk [vmem:[#allocation2 + $0x4c] sm:$0xf] %vm145_vm3, %v390_v63  ;;  %v406_v7 = vor.u32 %v404_v52, %v3139_v59 }
  0x2f   : > { %v399_v5 = vrot.slane %v395_v58, 4  ;;  %181 = vst [vmem:[#allocation2 + $0x60] sm:$0x1] %v180_v3  ;;  %v3156_v8 = vld [vmem:[%s3020_s14 + $0x48] sm:$0xf]  ;;  %v412_v12 = vrot.slane %v410_v60, 7 }
  0x30   : > { %v275_v9 = vld [vmem:[%s3020_s14 + $0x4c] sm:$0xf]  ;;  %v3163_v10 = vld [vmem:[#allocation2 + $0x34] sm:$0xf]  ;;  %v3165_v13 = vrot.slane %v418_v1, 7  ;;  %v427_v14 = vshrl.u32 %v3123_v49, 16  ;;  %836 = vrot.lane.b32.xlu0 %v3145_v62, %s2963_s15 }
  0x31   : > { %769 = vst.msk [vmem:[#allocation3 + $0x24] sm:$0xf] %vm145_vm3, %v3163_v10  ;;  %v3170_v15 = vld [vmem:[#allocation2 + $0x3c] sm:$0xf]  ;;  %v407_v16 = vsel %vm3042_vm7, %v399_v5, %v406_v7  ;;  %v435_v17 = vshrl.u32 %v273_v54, 16  ;;  %v438_v18 = vshll.u32 %v273_v54, 16  ;;  %v415_v25 = vor.u32 %v413_v61, %v412_v12  ;;  %838 = vrot.lane.b32.xlu1 %v3163_v10, %s2963_s15 }
  0x32   : > { %v183_v19 = vsel %vm2996_vm2, 0, %v182_v56  ;;  %770 = vst.msk [vmem:[#allocation3 + $0x28] sm:$0xf] %vm145_vm3, %v3170_v15  ;;  %v647_v20 = vld [vmem:[#allocation2 + $0x48] sm:$0xf]  ;;  %v416_v22 = vrot.slane %v412_v12, 4  ;;  %v423_v24 = vor.u32 %v421_v2, %v3165_v13 }
  0x33   : > { %657 = vst.msk [vmem:[#allocation2 + $0x58] sm:$0xf] %vm145_vm3, %v407_v16  ;;  %v430_v27 = vshll.u32 %v3123_v49, 16  ;;  %184 = vst [vmem:[#allocation2 + $0x6c] sm:$0x1] %v183_v19  ;;  %v648_v31 = vsel %vm3032_vm6, %v381_v4, %v647_v20  ;;  %v429_v32 = vrot.slane %v427_v14, 7 }
  0x34   : > { %v185_v28 = vld [vmem:[#allocation2 + $0x78] sm:$0x1]  ;;  %v3181_v29 = vld [vmem:[#allocation2 + $0x40] sm:$0xf]  ;;  %v3185_v35 = vrot.slane %v435_v17, 7  ;;  %v444_v36 = vshrl.u32 %v3156_v8, 16  ;;  %v424_v39 = vsel %vm3042_vm7, %v416_v22, %v423_v24  ;;  %840 = vrot.lane.b32.xlu0 %v3170_v15, %s2963_s15 }
  0x35   : > { %771 = vst.msk [vmem:[#allocation3 + $0x2c] sm:$0xf] %vm145_vm3, %v3181_v29  ;;  %649 = vst [vmem:[#allocation2 + $0x48] sm:$0xf] %v648_v31  ;;  %v654_v38 = vld [vmem:[#allocation2 + $0x54] sm:$0xf]  ;;  %v432_v52 = vor.u32 %v430_v27, %v429_v32  ;;  %842 = vrot.lane.b32.xlu1 %v3181_v29, %s2963_s15 }
  0x36   : > { %v452_v41 = vshrl.u32 %v275_v9, 16  ;;  %v455_v42 = vshll.u32 %v275_v9, 16  ;;  %v3197_v43 = vld [vmem:[%s3020_s14 + $0x50] sm:$0xf]  ;;  %v655_v45 = vsel %vm3032_vm6, %v398_v11, %v654_v38  ;;  %664 = vst.msk [vmem:[#allocation2 + $0x64] sm:$0xf] %vm145_vm3, %v424_v39  ;;  %v440_v47 = vor.u32 %v438_v18, %v3185_v35 }
  0x37   : > { %v433_v46 = vrot.slane %v429_v32, 4  ;;  %v447_v48 = vshll.u32 %v3156_v8, 16  ;;  %v277_v49 = vld [vmem:[%s3020_s14 + $0x54] sm:$0xf]  ;;  %v3205_v50 = vld [vmem:[#allocation2 + $0x4c] sm:$0xf] }
  0x38   : > { %656 = vst [vmem:[#allocation2 + $0x54] sm:$0xf] %v655_v45  ;;  %v661_v51 = vld [vmem:[#allocation2 + $0x60] sm:$0xf]  ;;  %v446_v53 = vrot.slane %v444_v36, 7  ;;  %v3207_v54 = vrot.slane %v452_v41, 7 }
  0x39   : > { %773 = vst.msk [vmem:[#allocation3 + $0x34] sm:$0xf] %vm145_vm3, %v3205_v50  ;;  %v662_v56 = vsel %vm3032_vm6, %v415_v25, %v661_v51  ;;  %v441_v58 = vsel %vm3042_vm7, %v433_v46, %v440_v47  ;;  %v186_v60 = vsel %vm2996_vm2, 0, %v185_v28  ;;  %v461_v61 = vshrl.u32 %v3197_v43, 16  ;;  %v188_v63 = vld [vmem:[#allocation2 + $0x84] sm:$0x1]  ;;  %846 = vrot.lane.b32.xlu1 %v3205_v50, %s2963_s15 }
  0x3a   : > { %v3219_v1 = vld [vmem:[%s3020_s14 + $0x58] sm:$0xf]  ;;  %663 = vst [vmem:[#allocation2 + $0x60] sm:$0xf] %v662_v56  ;;  %671 = vst.msk [vmem:[#allocation2 + $0x70] sm:$0xf] %vm145_vm3, %v441_v58  ;;  %v457_v3 = vor.u32 %v455_v42, %v3207_v54  ;;  %v449_v20 = vor.u32 %v447_v48, %v446_v53 }
  0x3b   : > { %v450_v2 = vrot.slane %v446_v53, 4  ;;  %187 = vst [vmem:[#allocation2 + $0x78] sm:$0x1] %v186_v60  ;;  %v279_v4 = vld [vmem:[%s3020_s14 + $0x5c] sm:$0xf]  ;;  %v463_v9 = vrot.slane %v461_v61, 7 }
  0x3c   : > { %v191_v5 = vld [vmem:[#allocation2 + $0x90] sm:$0x1]  ;;  %v3228_v7 = vld [vmem:[#allocation2 + $0x58] sm:$0xf]  ;;  %v668_v8 = vld [vmem:[#allocation2 + $0x6c] sm:$0xf] }
  0x3d   : > { %775 = vst.msk [vmem:[#allocation3 + $0x3c] sm:$0xf] %vm145_vm3, %v3228_v7  ;;  %v669_v11 = vsel %vm3032_vm6, %v432_v52, %v668_v8  ;;  %v458_v12 = vsel %vm3042_vm7, %v450_v2, %v457_v3  ;;  %v469_v14 = vshrl.u32 %v277_v49, 16  ;;  %v472_v16 = vshll.u32 %v277_v49, 16  ;;  %v3237_v17 = vld [vmem:[%s3020_s14 + $0x60] sm:$0xf]  ;;  %850 = vrot.lane.b32.xlu1 %v3228_v7, %s2963_s15 }
  0x3e   : > { %v3240_v18 = vld [vmem:[%s3020_s14 + $0x64] sm:$0xf]  ;;  %v3242_v19 = vld [vmem:[#allocation2 + $0x48] sm:$0xf]  ;;  %670 = vst [vmem:[#allocation2 + $0x6c] sm:$0xf] %v669_v11 }
  0x3f   : > { %678 = vst.msk [vmem:[#allocation2 + $0x7c] sm:$0xf] %vm145_vm3, %v458_v12  ;;  %v464_v22 = vshll.u32 %v3197_v43, 16  ;;  %v189_v24 = vsel %vm2996_vm2, 0, %v188_v63  ;;  %v478_v25 = vshrl.u32 %v3219_v1, 16  ;;  %844 = vrot.lane.b32.xlu0 %v3242_v19, %s2963_s15  ;;  %v467_v28 = vrot.slane %v463_v9, 4 }
  0x40   : > { %772 = vst.msk [vmem:[#allocation3 + $0x30] sm:$0xf] %vm145_vm3, %v3242_v19  ;;  %v3255_v27 = vld [vmem:[#allocation2 + $0x64] sm:$0xf]  ;;  %v3257_v31 = vrot.slane %v469_v14, 7  ;;  %v486_v32 = vshrl.u32 %v279_v4, 16 }
  0x41   : > { %190 = vst [vmem:[#allocation2 + $0x84] sm:$0x1] %v189_v24  ;;  %v489_v36 = vshll.u32 %v279_v4, 16  ;;  %v3259_v38 = vld [vmem:[#allocation2 + $0x54] sm:$0xf]  ;;  %v480_v39 = vrot.slane %v478_v25, 7  ;;  %v466_v56 = vor.u32 %v464_v22, %v463_v9  ;;  %854 = vrot.lane.b32.xlu1 %v3255_v27, %s2963_s15 }
  0x42   : > { %777 = vst.msk [vmem:[#allocation3 + $0x44] sm:$0xf] %vm145_vm3, %v3255_v27  ;;  %v192_v41 = vsel %vm2996_vm2, 0, %v191_v5  ;;  %v495_v42 = vshrl.u32 %v3237_v17, 16  ;;  %v194_v43 = vld [vmem:[#allocation2 + $0x9c] sm:$0x1]  ;;  %v474_v45 = vor.u32 %v472_v16, %v3257_v31 }
  0x43   : > { %774 = vst.msk [vmem:[#allocation3 + $0x38] sm:$0xf] %vm145_vm3, %v3259_v38  ;;  %v481_v46 = vshll.u32 %v3219_v1, 16  ;;  %v3270_v47 = vrot.slane %v486_v32, 7  ;;  %193 = vst [vmem:[#allocation2 + $0x90] sm:$0x1] %v192_v41  ;;  %848 = vrot.lane.b32.xlu0 %v3259_v38, %s2963_s15 }
  0x44   : > { %v503_v48 = vshrl.u32 %v3240_v18, 16  ;;  %v3274_v49 = vld [vmem:[%s3020_s14 + $0x68] sm:$0xf]  ;;  %v3276_v51 = vld [vmem:[#allocation2 + $0x60] sm:$0xf]  ;;  %v475_v60 = vsel %vm3042_vm7, %v467_v28, %v474_v45  ;;  %v484_v61 = vrot.slane %v480_v39, 4 }
  0x45   : > { %v3278_v52 = vld [vmem:[#allocation2 + $0x70] sm:$0xf]  ;;  %v675_v53 = vld [vmem:[#allocation2 + $0x78] sm:$0xf]  ;;  %776 = vst.msk [vmem:[#allocation3 + $0x40] sm:$0xf] %vm145_vm3, %v3276_v51  ;;  %v491_v63 = vor.u32 %v489_v36, %v3270_v47  ;;  %v483_v14 = vor.u32 %v481_v46, %v480_v39 }
  0x46   : > { %779 = vst.msk [vmem:[#allocation3 + $0x4c] sm:$0xf] %vm145_vm3, %v3278_v52  ;;  %v676_v58 = vsel %vm3032_vm6, %v449_v20, %v675_v53  ;;  %v283_v1 = vld [vmem:[%s3020_s14 + $0x6c] sm:$0xf]  ;;  %v197_v2 = vld [vmem:[#allocation2 + $0xa8] sm:$0x1]  ;;  %858 = vrot.lane.b32.xlu1 %v3278_v52, %s2963_s15 }
  0x47   : > { %677 = vst [vmem:[#allocation2 + $0x78] sm:$0xf] %v676_v58  ;;  %685 = vst.msk [vmem:[#allocation2 + $0x88] sm:$0xf] %vm145_vm3, %v475_v60  ;;  %v497_v3 = vrot.slane %v495_v42, 7  ;;  %v3295_v4 = vrot.slane %v503_v48, 7  ;;  %v492_v12 = vsel %vm3042_vm7, %v484_v61, %v491_v63  ;;  %852 = vrot.lane.b32.xlu0 %v3276_v51, %s2963_s15 }
  0x48   : > { %v506_v5 = vshll.u32 %v3240_v18, 16  ;;  %v3299_v8 = vld [vmem:[%s3020_s14 + $0x70] sm:$0xf]  ;;  %v3301_v9 = vld [vmem:[#allocation2 + $0x6c] sm:$0xf]  ;;  %v195_v16 = vsel %vm2996_vm2, 0, %v194_v43 }
  0x49   : > { %v3303_v11 = vld [vmem:[#allocation2 + $0x7c] sm:$0xf]  ;;  %v512_v20 = vshrl.u32 %v3274_v49, 16  ;;  %v285_v22 = vld [vmem:[%s3020_s14 + $0x74] sm:$0xf]  ;;  %v498_v24 = vshll.u32 %v3237_v17, 16 }
  0x4a   : > { %778 = vst.msk [vmem:[#allocation3 + $0x48] sm:$0xf] %vm145_vm3, %v3301_v9  ;;  %781 = vst.msk [vmem:[#allocation3 + $0x54] sm:$0xf] %vm145_vm3, %v3303_v11  ;;  %v682_v18 = vld [vmem:[#allocation2 + $0x84] sm:$0xf]  ;;  %v508_v28 = vor.u32 %v506_v5, %v3295_v4  ;;  %862 = vrot.lane.b32.xlu1 %v3303_v11, %s2963_s15 }
  0x4b   : > { %692 = vst.msk [vmem:[#allocation2 + $0x94] sm:$0xf] %vm145_vm3, %v492_v12  ;;  %v501_v25 = vrot.slane %v497_v3, 4  ;;  %196 = vst [vmem:[#allocation2 + $0x9c] sm:$0x1] %v195_v16  ;;  %v683_v36 = vsel %vm3032_vm6, %v466_v56, %v682_v18  ;;  %v514_v39 = vrot.slane %v512_v20, 7  ;;  %v500_v63 = vor.u32 %v498_v24, %v497_v3  ;;  %856 = vrot.lane.b32.xlu0 %v3301_v9, %s2963_s15 }
  0x4c   : > { %v200_v32 = vld [vmem:[#allocation2 + $0xb4] sm:$0x1]  ;;  %v515_v41 = vshll.u32 %v3274_v49, 16  ;;  %v520_v42 = vshrl.u32 %v283_v1, 16  ;;  %v3326_v17 = vld [vmem:[%s3020_s14 + $0x78] sm:$0xf] }
  0x4d   : > { %684 = vst [vmem:[#allocation2 + $0x84] sm:$0xf] %v683_v36  ;;  %v689_v43 = vld [vmem:[#allocation2 + $0x90] sm:$0xf]  ;;  %v509_v45 = vsel %vm3042_vm7, %v501_v25, %v508_v28  ;;  %v523_v46 = vshll.u32 %v283_v1, 16  ;;  %v198_v48 = vsel %vm2996_vm2, 0, %v197_v2 }
  0x4e   : > { %v529_v53 = vshrl.u32 %v3299_v8, 16  ;;  %v690_v56 = vsel %vm3032_vm6, %v483_v14, %v689_v43  ;;  %699 = vst.msk [vmem:[#allocation2 + $0xa0] sm:$0xf] %vm145_vm3, %v509_v45  ;;  %v518_v49 = vrot.slane %v514_v39, 4  ;;  %v3336_v58 = vrot.slane %v520_v42, 7 }
  0x4f   : > { %199 = vst [vmem:[#allocation2 + $0xa8] sm:$0x1] %v198_v48  ;;  %v287_v60 = vld [vmem:[%s3020_s14 + $0x7c] sm:$0xf]  ;;  %v724_v61 = vld [vmem:[#allocation2] sm:$0xf]  ;;  %v517_v43 = vor.u32 %v515_v41, %v514_v39 }
  0x50   : > { %691 = vst [vmem:[#allocation2 + $0x90] sm:$0xf] %v690_v56  ;;  %v531_v5 = vrot.slane %v529_v53, 7  ;;  %v537_v1 = vshrl.u32 %v285_v22, 16  ;;  %v540_v12 = vshll.u32 %v285_v22, 16  ;;  %v525_v20 = vor.u32 %v523_v46, %v3336_v58 }
  0x51   : > { %760 = vst.msk [vmem:[#allocation3] sm:$0xf] %vm145_vm3, %v724_v61  ;;  %v725_v2 = vld [vmem:[#allocation2 + $0x4] sm:$0xf]  ;;  %v3344_v14 = vld [vmem:[#allocation2 + $0x78] sm:$0xf] }
  0x52   : > { %v3346_v16 = vld [vmem:[#allocation2 + $0x88] sm:$0xf]  ;;  %v201_v3 = vsel %vm2996_vm2, 0, %v200_v32  ;;  %761 = vst.msk [vmem:[#allocation3 + $0x4] sm:$0xf] %vm145_vm3, %v725_v2  ;;  %v532_v22 = vshll.u32 %v3299_v8, 16  ;;  %v526_v42 = vsel %vm3042_vm7, %v518_v49, %v525_v20  ;;  %860 = vrot.lane.b32.xlu0 %v3344_v14, %s2963_s15 }
  0x53   : > { %780 = vst.msk [vmem:[#allocation3 + $0x50] sm:$0xf] %vm145_vm3, %v3344_v14  ;;  %783 = vst.msk [vmem:[#allocation3 + $0x5c] sm:$0xf] %vm145_vm3, %v3346_v16  ;;  %v535_v18 = vrot.slane %v531_v5, 4  ;;  %v3357_v24 = vrot.slane %v537_v1, 7  ;;  %866 = vrot.lane.b32.xlu1 %v3346_v16, %s2963_s15 }
  0x54   : > { %202 = vst [vmem:[#allocation2 + $0xb4] sm:$0x1] %v201_v3  ;;  %v546_v25 = vshrl.u32 %v3326_v17, 16  ;;  %v203_v28 = vld [vmem:[#allocation2 + $0xc0] sm:$0x1]  ;;  %v554_v45 = vshrl.u32 %v287_v60, 16  ;;  %v534_v1 = vor.u32 %v532_v22, %v531_v5 }
  0x55   : > { %v3360_v36 = vld [vmem:[#allocation2 + $0x94] sm:$0xf]  ;;  %v696_v32 = vld [vmem:[#allocation2 + $0x9c] sm:$0xf]  ;;  %706 = vst.msk [vmem:[#allocation2 + $0xac] sm:$0xf] %vm145_vm3, %v526_v42  ;;  %v542_v46 = vor.u32 %v540_v12, %v3357_v24 }
  0x56   : > { %785 = vst.msk [vmem:[#allocation3 + $0x64] sm:$0xf] %vm145_vm3, %v3360_v36  ;;  %v697_v8 = vsel %vm3032_vm6, %v500_v63, %v696_v32  ;;  %v548_v48 = vrot.slane %v546_v25, 7  ;;  %v3374_v53 = vld [vmem:[#allocation2 + $0x84] sm:$0xf]  ;;  %v3376_v39 = vrot.slane %v554_v45, 7 }
  0x57   : > { %698 = vst [vmem:[#allocation2 + $0x9c] sm:$0xf] %v697_v8  ;;  %v557_v41 = vshll.u32 %v287_v60, 16  ;;  %v204_v56 = vsel %vm2996_vm2, 0, %v203_v28  ;;  %782 = vst.msk [vmem:[#allocation3 + $0x58] sm:$0xf] %vm145_vm3, %v3374_v53  ;;  %v543_v63 = vsel %vm3042_vm7, %v535_v18, %v542_v46  ;;  %864 = vrot.lane.b32.xlu0 %v3374_v53, %s2963_s15  ;;  %870 = vrot.lane.b32.xlu1 %v3360_v36, %s2963_s15 }
  0x58   : > { %v3382_v49 = vld [vmem:[#allocation2 + $0xa0] sm:$0xf]  ;;  %v703_v61 = vld [vmem:[#allocation2 + $0xa8] sm:$0xf]  ;;  %v549_v12 = vshll.u32 %v3326_v17, 16  ;;  %v552_v2 = vrot.slane %v548_v48, 4 }
  0x59   : > { %205 = vst [vmem:[#allocation2 + $0xc0] sm:$0x1] %v204_v56  ;;  %v3387_v20 = vld [vmem:[#allocation2 + $0x90] sm:$0xf]  ;;  %787 = vst.msk [vmem:[#allocation3 + $0x6c] sm:$0xf] %vm145_vm3, %v3382_v49  ;;  %v704_v60 = vsel %vm3032_vm6, %v517_v43, %v703_v61  ;;  %v559_v3 = vor.u32 %v557_v41, %v3376_v39 }
  0x5a   : > { %713 = vst.msk [vmem:[#allocation2 + $0xb8] sm:$0xf] %vm145_vm3, %v543_v63  ;;  %784 = vst.msk [vmem:[#allocation3 + $0x60] sm:$0xf] %vm145_vm3, %v3387_v20  ;;  %v551_v25 = vor.u32 %v549_v12, %v548_v48  ;;  %v208_v28 = vld [vmem:[#allocation2 + $0x14] sm:$0x1] }
  0x5b   : > { %705 = vst [vmem:[#allocation2 + $0xa8] sm:$0xf] %v704_v60  ;;  %v710_v17 = vld [vmem:[#allocation2 + $0xb4] sm:$0xf]  ;;  %v560_v22 = vsel %vm3042_vm7, %v552_v2, %v559_v3  ;;  %v209_v42 = vsel %vm3397_vm8, 0, %v208_v28  ;;  %868 = vrot.lane.b32.xlu0 %v3387_v20, %s2963_s15  ;;  %v306_v56 = vrot.slane %v3038_v34, 4  ;;  %874 = vrot.lane.b32.xlu1 %v3382_v49, %s2963_s15 }
  0x5c   : > { %v711_v18 = vsel %vm3032_vm6, %v534_v1, %v710_v17  ;;  %720 = vst.msk [vmem:[#allocation2 + $0xc4] sm:$0xf] %vm145_vm3, %v560_v22  ;;  %v3412_v32 = vld [vmem:[#allocation2 + $0xac] sm:$0xf]  ;;  %210 = vst [vmem:[#allocation2 + $0x14] sm:$0x1] %v209_v42 }
  0x5d   : > { %712 = vst [vmem:[#allocation2 + $0xb4] sm:$0xf] %v711_v18  ;;  %789 = vst.msk [vmem:[#allocation3 + $0x74] sm:$0xf] %vm145_vm3, %v3412_v32  ;;  %v211_v46 = vld [vmem:[#allocation2 + $0x20] sm:$0x1] }
  0x5e   : > { %v3416_v43 = vld [vmem:[#allocation2 + $0x9c] sm:$0xf]  ;;  %v212_v41 = vsel %vm3397_vm8, 0, %v211_v46  ;;  %v214_v63 = vld [vmem:[#allocation2 + $0x2c] sm:$0x1]  ;;  %v323_v1 = vrot.slane %v3036_v33, 4 }
  0x5f   : > { %786 = vst.msk [vmem:[#allocation3 + $0x68] sm:$0xf] %vm145_vm3, %v3416_v43  ;;  %213 = vst [vmem:[#allocation2 + $0x20] sm:$0x1] %v212_v41  ;;  %872 = vrot.lane.b32.xlu0 %v3416_v43, %s2963_s15  ;;  %v215_v12 = vsel %vm3397_vm8, 0, %v214_v63  ;;  %878 = vrot.lane.b32.xlu1 %v3412_v32, %s2963_s15  ;;  %v340_v33 = vrot.slane %v3061_v55, 4 }
  0x60   : > { %v717_v37 = vld [vmem:[#allocation2 + $0xc0] sm:$0xf]  ;;  %216 = vst [vmem:[#allocation2 + $0x2c] sm:$0x1] %v215_v12  ;;  %v217_v2 = vld [vmem:[#allocation2 + $0x38] sm:$0x1] }
  0x61   : > { %v3426_v45 = vld [vmem:[#allocation2 + $0xb8] sm:$0xf]  ;;  %v718_v8 = vsel %vm3032_vm6, %v551_v25, %v717_v37  ;;  %v218_v17 = vsel %vm3397_vm8, 0, %v217_v2  ;;  %v220_v25 = vld [vmem:[#allocation2 + $0x44] sm:$0x1]  ;;  %v374_v46 = vrot.slane %v3088_v23, 4 }
  0x62   : > { %v3430_v48 = vld [vmem:[#allocation2 + $0xa8] sm:$0xf]  ;;  %791 = vst.msk [vmem:[#allocation3 + $0x7c] sm:$0xf] %vm145_vm3, %v3426_v45  ;;  %719 = vst [vmem:[#allocation2 + $0xc0] sm:$0xf] %v718_v8 }
  0x63   : > { %788 = vst.msk [vmem:[#allocation3 + $0x70] sm:$0xf] %vm145_vm3, %v3430_v48  ;;  %v616_v61 = vld [vmem:[#allocation2 + $0x14] sm:$0x1]  ;;  %876 = vrot.lane.b32.xlu0 %v3430_v48, %s2963_s15  ;;  %882 = vrot.lane.b32.xlu1 %v3426_v45, %s2963_s15  ;;  %v3465_v22 = vld [vmem:[#allocation2 + $0xc4] sm:$0xf] }
  0x64   : > { %v3443_v30 = vld [vmem:[#allocation2 + $0xb4] sm:$0xf]  ;;  %v617_v34 = vsel %vm2996_vm2, %v306_v56, %v616_v61  ;;  %219 = vst [vmem:[#allocation2 + $0x38] sm:$0x1] %v218_v17  ;;  %v221_v28 = vsel %vm3397_vm8, 0, %v220_v25  ;;  %v357_v8 = vrot.slane %v3070_v6, 4 }
  0x65   : > { %790 = vst.msk [vmem:[#allocation3 + $0x78] sm:$0xf] %vm145_vm3, %v3443_v30  ;;  %618 = vst [vmem:[#allocation2 + $0x14] sm:$0x1] %v617_v34  ;;  %v223_v37 = vld [vmem:[#allocation2 + $0x50] sm:$0x1] }
  0x66   : > { %v623_v60 = vld [vmem:[#allocation2 + $0x20] sm:$0x1]  ;;  %222 = vst [vmem:[#allocation2 + $0x44] sm:$0x1] %v221_v28  ;;  %v224_v41 = vsel %vm3397_vm8, 0, %v223_v37  ;;  %vm2062_vm14 = vcmask 1042432  }
  0x67   : > { %v624_v3 = vsel %vm2996_vm2, %v323_v1, %v623_v60  ;;  %880 = vrot.lane.b32.xlu0 %v3443_v30, %s2963_s15  ;;  %v630_v55 = vld [vmem:[#allocation2 + $0x2c] sm:$0x1]  ;;  %886 = vrot.lane.b32.xlu1 %v3465_v22, %s2963_s15  ;;  %225 = vst [vmem:[#allocation2 + $0x50] sm:$0x1] %v224_v41  ;;  %v226_v63 = vld [vmem:[#allocation2 + $0x5c] sm:$0x1] }
  0x68   : > { %625 = vst [vmem:[#allocation2 + $0x20] sm:$0x1] %v624_v3  ;;  %v631_v42 = vsel %vm2996_vm2, %v340_v33, %v630_v55  ;;  %v391_v1 = vrot.slane %v3111_v40, 4  ;;  %v232_v12 = vld [vmem:[#allocation2 + $0x74] sm:$0x1]  ;;  %v442_v3 = vrot.slane %v3185_v35, 4 }
  0x69   : > { %v3467_v18 = vld [vmem:[#allocation2 + $0xc0] sm:$0xf]  ;;  %632 = vst [vmem:[#allocation2 + $0x2c] sm:$0x1] %v631_v42  ;;  %v233_v60 = vsel %vm3397_vm8, 0, %v232_v12  ;;  %v459_v35 = vrot.slane %v3207_v54, 4 }
  0x6a   : > { %234 = vst [vmem:[#allocation2 + $0x74] sm:$0x1] %v233_v60  ;;  %v1121_v28 = vld [vmem:[#allocation2 + $0x94] sm:$0xf]  ;;  %v253_v37 = vld [vmem:[#allocation2 + $0xc8] sm:$0x1] }
  0x6b   : > { %884 = vrot.lane.b32.xlu0 %v3467_v18, %s2963_s15  ;;  %957 = vrot.lane.b32.xlu1 %v3096_v26, %s2964_s16  ;;  %v637_v56 = vld [vmem:[#allocation2 + $0x38] sm:$0x1]  ;;  %v229_v26 = vld [vmem:[#allocation2 + $0x68] sm:$0x1]  ;;  %vm1138_vm10 = vsmask.f32 3328 }
  0x6c   : > { %v638_v61 = vsel %vm2996_vm2, %v357_v8, %v637_v56  ;;  %v1084_v8 = vld [vmem:[#allocation2] sm:$0xf]  ;;  %v1087_v56 = vld [vmem:[#allocation2 + $0xc] sm:$0xf]  ;;  %v1090_v12 = vld [vmem:[#allocation2 + $0x18] sm:$0xf] }
  0x6d   : > { %639 = vst [vmem:[#allocation2 + $0x38] sm:$0x1] %v638_v61  ;;  %v644_v6 = vld [vmem:[#allocation2 + $0x44] sm:$0x1]  ;;  %v1142_v61 = vshrl.u32 %v1084_v8, 16  ;;  %vm2063_vm15 = vcmask 1046532  }
  0x6e   : > { %v645_v23 = vsel %vm2996_vm2, %v374_v46, %v644_v6  ;;  %v651_v34 = vld [vmem:[#allocation2 + $0x50] sm:$0x1]  ;;  %v544_v46 = vrot.slane %v3357_v24, 4  ;;  %v1145_v6 = vshll.u32 %v1084_v8, 16  ;;  %vm1139_vm11 = vsmask.f32 7440  ;;  %vm3887_vm0 = vmor %vm2062_vm14, %vm2063_vm15 }
  0x6f   : > { %955 = vrot.lane.b32.xlu0 %v3086_v21, %s2964_s16  ;;  %961 = vrot.lane.b32.xlu1 %v3137_v57, %s2964_s16  ;;  %646 = vst [vmem:[#allocation2 + $0x44] sm:$0x1] %v645_v23  ;;  %v227_v21 = vsel %vm3397_vm8, 0, %v226_v63  ;;  %v652_v40 = vsel %vm2996_vm2, %v391_v1, %v651_v34  ;;  %v408_v57 = vrot.slane %v3139_v59, 4  ;;  %v235_v59 = vld [vmem:[#allocation2 + $0x80] sm:$0x1]  ;;  %vm3598_vm12 = vmor %vm1138_vm10, %vm1139_vm11 }
  0x70   : > { %228 = vst [vmem:[#allocation2 + $0x5c] sm:$0x1] %v227_v21  ;;  %653 = vst [vmem:[#allocation2 + $0x50] sm:$0x1] %v652_v40  ;;  %v236_v33 = vsel %vm3397_vm8, 0, %v235_v59  ;;  %v1166_v23 = vshrl.u32 %v1087_v56, 16 }
  0x71   : > { %237 = vst [vmem:[#allocation2 + $0x80] sm:$0x1] %v236_v33  ;;  %v1086_v63 = vld [vmem:[#allocation2 + $0x8] sm:$0x1]  ;;  %v1169_v21 = vshll.u32 %v1087_v56, 16  ;;  %v561_v34 = vrot.slane %v3376_v39, 4 }
  0x72   : > { %v1091_v40 = vld [vmem:[#allocation2 + $0x1c] sm:$0xf]  ;;  %v1093_v59 = vld [vmem:[#allocation2 + $0x24] sm:$0xf]  ;;  %v1089_v8 = vld [vmem:[#allocation2 + $0x14] sm:$0x1] }
  0x73   : > { %959 = vrot.lane.b32.xlu0 %v3115_v44, %s2964_s16  ;;  %965 = vrot.lane.b32.xlu1 %v3163_v10, %s2964_s16  ;;  %v230_v44 = vsel %vm3397_vm8, 0, %v229_v26  ;;  %v1171_v60 = vrot.slane %v1169_v21, 5  ;;  %v1199_v39 = vshll.u32 %v1091_v40, 16  ;;  %vm1621_vm1 = vcmask 60448  }
  0x74   : > { %231 = vst [vmem:[#allocation2 + $0x68] sm:$0x1] %v230_v44  ;;  %v1144_v44 = vrot.slane %v1142_v61, 4  ;;  %vm1927_vm3 = vcmask 257248   ;;  %vm2273_vm4 = vcmask 93248   ;;  %vm2412_vm5 = vcmask 191648  }
  0x75   : > { %vm2551_vm6 = vcmask 290048   ;;  %vm2697_vm7 = vcmask 293888  }
  0x77   : > { %963 = vrot.lane.b32.xlu0 %v3145_v62, %s2964_s16  ;;  %969 = vrot.lane.b32.xlu1 %v3181_v29, %s2964_s16  ;;  %v658_v10 = vld [vmem:[#allocation2 + $0x5c] sm:$0x1]  ;;  %v425_v62 = vrot.slane %v3165_v13, 4  ;;  %v238_v13 = vld [vmem:[#allocation2 + $0x8c] sm:$0x1] }
  0x78   : > { %v659_v2 = vsel %vm2996_vm2, %v408_v57, %v658_v10  ;;  %v1147_v57 = vrot.slane %v1145_v6, 5 }
  0x79   : > { %660 = vst [vmem:[#allocation2 + $0x5c] sm:$0x1] %v659_v2 }
  0x7b   : > { %967 = vrot.lane.b32.xlu0 %v3170_v15, %s2964_s16  ;;  %973 = vrot.lane.b32.xlu1 %v3205_v50, %s2964_s16  ;;  %v665_v29 = vld [vmem:[#allocation2 + $0x68] sm:$0x1]  ;;  %v239_v50 = vsel %vm3397_vm8, 0, %v238_v13  ;;  %v1190_v13 = vshrl.u32 %v1090_v12, 16 }
  0x7c   : > { %v666_v15 = vsel %vm2996_vm2, %v425_v62, %v665_v29  ;;  %240 = vst [vmem:[#allocation2 + $0x8c] sm:$0x1] %v239_v50 }
  0x7d   : > { %667 = vst [vmem:[#allocation2 + $0x68] sm:$0x1] %v666_v15  ;;  %v1203_v15 = vshrl.u32 %v1091_v40, 16 }
  0x7f   : > { %971 = vrot.lane.b32.xlu0 %v3242_v19, %s2964_s16  ;;  %977 = vrot.lane.b32.xlu1 %v3228_v7, %s2964_s16  ;;  %v672_v19 = vld [vmem:[#allocation2 + $0x74] sm:$0x1]  ;;  %v476_v7 = vrot.slane %v3257_v31, 4  ;;  %v250_v31 = vld [vmem:[#allocation2 + $0xbc] sm:$0x1] }
  0x80   : > { %v673_v17 = vsel %vm2996_vm2, %v442_v3, %v672_v19  ;;  %v251_v42 = vsel %vm3397_vm8, 0, %v250_v31  ;;  %v1193_v3 = vshll.u32 %v1090_v12, 16  ;;  %v247_v12 = vld [vmem:[#allocation2 + $0xb0] sm:$0x1]  ;;  %v1973_v31 = vld [vmem:[#allocation2 + $0x34] sm:$0xf] }
  0x81   : > { %674 = vst [vmem:[#allocation2 + $0x74] sm:$0x1] %v673_v17  ;;  %252 = vst [vmem:[#allocation2 + $0xbc] sm:$0x1] %v251_v42  ;;  %v1094_v17 = vld [vmem:[#allocation2 + $0x28] sm:$0xf] }
  0x82   : > { %v1195_v42 = vrot.slane %v1193_v3, 5 }
  0x83   : > { %975 = vrot.lane.b32.xlu0 %v3259_v38, %s2964_s16  ;;  %981 = vrot.lane.b32.xlu1 %v3255_v27, %s2964_s16  ;;  %v679_v38 = vld [vmem:[#allocation2 + $0x80] sm:$0x1]  ;;  %v686_v54 = vld [vmem:[#allocation2 + $0x8c] sm:$0x1] }
  0x84   : > { %v680_v25 = vsel %vm2996_vm2, %v459_v35, %v679_v38  ;;  %v687_v27 = vsel %vm2996_vm2, %v476_v7, %v686_v54  ;;  %v1214_v35 = vshrl.u32 %v1093_v59, 16  ;;  %v1217_v7 = vshll.u32 %v1093_v59, 16 }
  0x85   : > { %681 = vst [vmem:[#allocation2 + $0x80] sm:$0x1] %v680_v25  ;;  %688 = vst [vmem:[#allocation2 + $0x8c] sm:$0x1] %v687_v27 }
  0x86   : > { %v1219_v56 = vrot.slane %v1217_v7, 5 }
  0x87   : > { %979 = vrot.lane.b32.xlu0 %v3276_v51, %s2964_s16  ;;  %985 = vrot.lane.b32.xlu1 %v3278_v52, %s2964_s16  ;;  %v1439_v51 = vshll.u32 %v1121_v28, 16  ;;  %v1443_v52 = vshrl.u32 %v1121_v28, 16  ;;  %v1096_v28 = vld [vmem:[#allocation2 + $0x30] sm:$0xf] }
  0x88   : > { %v714_v1 = vld [vmem:[#allocation2 + $0xbc] sm:$0x1]  ;;  %v1238_v61 = vshrl.u32 %v1096_v28, 16  ;;  %v1241_v6 = vshll.u32 %v1096_v28, 16 }
  0x89   : > { %v3551_v55 = vrot.slane %v1443_v52, 4  ;;  %v715_v26 = vsel %vm2996_vm2, %v544_v46, %v714_v1  ;;  %v1205_v52 = vrot.slane %v1203_v15, 4  ;;  %v1223_v46 = vshll.u32 %v1094_v17, 16  ;;  %v759_v1 = vld [vmem:[#allocation2 + $0xd0] sm:$0xf] }
  0x8a   : > { %716 = vst [vmem:[#allocation2 + $0xbc] sm:$0x1] %v715_v26  ;;  %v1185_v26 = vshll.u32 %v1089_v8, 16  ;;  %v1240_v59 = vrot.slane %v1238_v61, 4  ;;  %v1102_v8 = vld [vmem:[#allocation2 + $0x48] sm:$0xf] }
  0x8b   : > { %983 = vrot.lane.b32.xlu0 %v3301_v9, %s2964_s16  ;;  %989 = vrot.lane.b32.xlu1 %v3303_v11, %s2964_s16  ;;  %v3549_v9 = vrot.slane %v1439_v51, 5  ;;  %v1085_v11 = vld [vmem:[#allocation2 + $0x4] sm:$0xf]  ;;  %v3602_v51 = vrot.slane %v1199_v39, 5 }
  0x8c   : > { %v1151_v41 = vshll.u32 %v1085_v11, 16 }
  0x8d   : > { %v1206_v40 = vor.u32 %v1205_v52, %v3602_v51 }
  0x8e   : > { %v3572_v24 = vrot.slane %v1151_v41, 5  ;;  %v1227_v41 = vshrl.u32 %v1094_v17, 16 }
  0x8f   : > { %987 = vrot.lane.b32.xlu0 %v3344_v14, %s2964_s16  ;;  %993 = vrot.lane.b32.xlu1 %v3346_v16, %s2964_s16  ;;  %v1446_v14 = vor.u32 %v3551_v55, %v3549_v9  ;;  %v1155_v16 = vshrl.u32 %v1085_v11, 16 }
  0x93   : > { %991 = vrot.lane.b32.xlu0 %v3374_v53, %s2964_s16  ;;  %997 = vrot.lane.b32.xlu1 %v3360_v36, %s2964_s16  ;;  %v254_v53 = vsel %vm3397_vm8, 0, %v253_v37  ;;  %v1157_v36 = vrot.slane %v1155_v16, 4  ;;  %v1216_v16 = vrot.slane %v1214_v35, 4  ;;  %v1103_v35 = vld [vmem:[#allocation2 + $0x4c] sm:$0xf] }
  0x94   : > { %255 = vst [vmem:[#allocation2 + $0xc8] sm:$0x1] %v254_v53  ;;  %v1097_v53 = vld [vmem:[#allocation2 + $0x34] sm:$0xf] }
  0x95   : > { %v1158_v2 = vor.u32 %v1157_v36, %v3572_v24  ;;  %v829_v50 = vpop.permute.xlu1 %828  ;;  %v758_v36 = vld [vmem:[#allocation2 + $0xcc] sm:$0xf]  ;;  %v1220_v39 = vor.u32 %v1219_v56, %v1216_v16  ;;  %v1299_v16 = vshrl.u32 %v1103_v35, 16 }
  0x96   : > { %v825_v19 = vpop.permute.xlu0 %824  ;;  %923 = vst.msk [vmem:[#allocation3 + $0x8] sm:$0xf] %vm920_vm9, %v829_v50  ;;  %v248_v50 = vsel %vm3397_vm8, 0, %v247_v12 }
  0x97   : > { %995 = vrot.lane.b32.xlu0 %v3387_v20, %s2964_s16  ;;  %1001 = vrot.lane.b32.xlu1 %v3382_v49, %s2964_s16  ;;  %v1088_v20 = vld [vmem:[#allocation2 + $0x10] sm:$0xf]  ;;  %v1161_v49 = vshll.u32 %v1086_v63, 16  ;;  %921 = vst.msk [vmem:[#allocation3] sm:$0xf] %vm920_vm9, %v825_v19  ;;  %v3592_v38 = vrot.slane %v1158_v2, 4 }
  0x98   : > { %v1175_v10 = vshll.u32 %v1088_v20, 16  ;;  %v1179_v62 = vshrl.u32 %v1088_v20, 16  ;;  %v510_v63 = vrot.slane %v3295_v4, 4  ;;  %v1251_v2 = vshrl.u32 %v1097_v53, 16  ;;  %249 = vst [vmem:[#allocation2 + $0xb0] sm:$0x1] %v248_v50 }
  0x99   : > { %v831_v11 = vpop.permute.xlu1 %830  ;;  %v1187_v19 = vrot.slane %v1185_v26, 5  ;;  %v1098_v26 = vld [vmem:[#allocation2 + $0x38] sm:$0x1] }
  0x9a   : > { %v3594_v25 = vrot.slane %v1175_v10, 5  ;;  %v1181_v54 = vrot.slane %v1179_v62, 4  ;;  %924 = vst.msk [vmem:[#allocation3 + $0xc] sm:$0xf] %vm920_vm9, %v831_v11  ;;  %v1092_v10 = vld [vmem:[#allocation2 + $0x20] sm:$0x1] }
  0x9b   : > { %999 = vrot.lane.b32.xlu0 %v3416_v43, %s2964_s16  ;;  %v1168_v43 = vrot.slane %v1166_v23, 4  ;;  %1005 = vrot.lane.b32.xlu1 %v3412_v32, %s2964_s16  ;;  %v721_v29 = vld [vmem:[#allocation2 + $0xc8] sm:$0x1]  ;;  %v1148_v32 = vor.u32 %v1147_v57, %v1144_v44  ;;  %v527_v23 = vrot.slane %v3336_v58, 4  ;;  %v1099_v57 = vld [vmem:[#allocation2 + $0x3c] sm:$0xf] }
  0x9c   : > { %v722_v33 = vsel %vm2996_vm2, %v561_v34, %v721_v29  ;;  %v1182_v21 = vor.u32 %v1181_v54, %v3594_v25  ;;  %v1229_v62 = vrot.slane %v1227_v41, 4  ;;  %v1243_v29 = vrot.slane %v1241_v6, 5  ;;  %v1095_v54 = vld [vmem:[#allocation2 + $0x2c] sm:$0x1] }
  0x9d   : > { %723 = vst [vmem:[#allocation2 + $0xc8] sm:$0x1] %v722_v33  ;;  %v1172_v27 = vor.u32 %v1171_v60, %v1168_v43  ;;  %v3604_v37 = vrot.slane %v1148_v32, 4  ;;  %v1247_v43 = vshll.u32 %v1097_v53, 16  ;;  %v1262_v3 = vshrl.u32 %v1099_v57, 16 }
  0x9e   : > { %v1183_v15 = vrot.slane %v1182_v21, 4  ;;  %v1265_v33 = vshll.u32 %v1099_v57, 16  ;;  %v1207_v32 = vrot.slane %v1206_v40, 4  ;;  %v1253_v52 = vrot.slane %v1251_v2, 4  ;;  %v1105_v2 = vld [vmem:[#allocation2 + $0x54] sm:$0xf] }
  0x9f   : > { %1003 = vrot.lane.b32.xlu0 %v3430_v48, %s2964_s16  ;;  %v3586_v48 = vrot.slane %v1161_v49, 5  ;;  %1009 = vrot.lane.b32.xlu1 %v3426_v45, %s2964_s16  ;;  %v1192_v45 = vrot.slane %v1190_v13, 4  ;;  %v1173_v34 = vrot.slane %v1172_v27, 4  ;;  %v1154_v60 = vsel %vm3598_vm12, %v3604_v37, %v3572_v24  ;;  %v1100_v13 = vld [vmem:[#allocation2 + $0x40] sm:$0xf] }
  0xa0   : > { %v3638_v28 = vrot.slane %v1247_v43, 5  ;;  %v1244_v11 = vor.u32 %v1243_v29, %v1240_v59  ;;  %v1275_v37 = vshrl.u32 %v1100_v13, 16  ;;  %v1295_v41 = vshll.u32 %v1103_v35, 16 }
  0xa1   : > { %v1164_v20 = vsel %vm3598_vm12, %v3592_v38, %v3586_v48  ;;  %v1196_v44 = vor.u32 %v1195_v42, %v1192_v45  ;;  %v1209_v48 = vshll.u32 %v1092_v10, 16  ;;  %v3635_v38 = vsel %vm3598_vm12, %v1173_v34, %v3594_v25  ;;  %v244_v45 = vld [vmem:[#allocation2 + $0xa4] sm:$0x1] }
  0xa2   : > { %v1221_v42 = vrot.slane %v1220_v39, 4  ;;  %v1264_v25 = vrot.slane %v1262_v3, 4  ;;  %v3646_v56 = vsel %vm3598_vm12, %v1183_v15, %v1187_v19  ;;  %v1233_v61 = vshll.u32 %v1095_v54, 16  ;;  %v1101_v15 = vld [vmem:[#allocation2 + $0x44] sm:$0x1] }
  0xa3   : > { %1007 = vrot.lane.b32.xlu0 %v3443_v30, %s2964_s16  ;;  %v827_v30 = vpop.permute.xlu0 %826  ;;  %1013 = vrot.lane.b32.xlu1 %v3465_v22, %s2964_s16  ;;  %v835_v22 = vpop.permute.xlu1 %834  ;;  %v1197_v17 = vrot.slane %v1196_v44, 4  ;;  %v1211_v53 = vrot.slane %v1209_v48, 5  ;;  %v245_v6 = vsel %vm3397_vm8, 0, %v244_v45  ;;  %v1286_v34 = vshrl.u32 %v1102_v8, 16  ;;  %v1109_v54 = vld [vmem:[#allocation2 + $0x64] sm:$0xf] }
  0xa4   : > { %922 = vst.msk [vmem:[#allocation3 + $0x4] sm:$0xf] %vm920_vm9, %v827_v30  ;;  %926 = vst.msk [vmem:[#allocation3 + $0x14] sm:$0xf] %vm920_vm9, %v835_v22  ;;  %v1271_v30 = vshll.u32 %v1100_v13, 16  ;;  %v1289_v40 = vshll.u32 %v1102_v8, 16  ;;  %v1254_v44 = vor.u32 %v1253_v52, %v3638_v28 }
  0xa5   : > { %246 = vst [vmem:[#allocation2 + $0xa4] sm:$0x1] %v245_v6  ;;  %v1245_v57 = vrot.slane %v1244_v11, 4  ;;  %v1277_v22 = vrot.slane %v1275_v37, 4  ;;  %v3671_v43 = vrot.slane %v1299_v16, 4  ;;  %v3675_v39 = vsel %vm3598_vm12, %v1207_v32, %v1211_v53 }
  0xa6   : > { %v3658_v12 = vrot.slane %v1271_v30, 5  ;;  %v1235_v59 = vrot.slane %v1233_v61, 5  ;;  %v1257_v29 = vshll.u32 %v1098_v26, 16  ;;  %v1108_v13 = vld [vmem:[#allocation2 + $0x60] sm:$0xf]  ;;  %v1288_v50 = vrot.slane %v1286_v34, 4 }
  0xa7   : > { %1011 = vrot.lane.b32.xlu0 %v3467_v18, %s2964_s16  ;;  %v833_v49 = vpop.permute.xlu0 %832  ;;  %v3620_v18 = vrot.slane %v1223_v46, 5  ;;  %1017 = vrot.lane.b32.xlu1 %v759_v1, %s2964_s16  ;;  %v839_v24 = vpop.permute.xlu1 %838  ;;  %v1267_v46 = vrot.slane %v1265_v33, 5  ;;  %v1291_v19 = vrot.slane %v1289_v40, 5  ;;  %v1255_v32 = vrot.slane %v1254_v44, 4  ;;  %v1111_v53 = vld [vmem:[#allocation2 + $0x6c] sm:$0xf] }
  0xa8   : > { %925 = vst.msk [vmem:[#allocation3 + $0x10] sm:$0xf] %vm920_vm9, %v833_v49  ;;  %928 = vst.msk [vmem:[#allocation3 + $0x1c] sm:$0xf] %vm920_vm9, %v839_v24  ;;  %v1106_v49 = vld [vmem:[#allocation2 + $0x58] sm:$0xf]  ;;  %v1278_v35 = vor.u32 %v1277_v22, %v3658_v12  ;;  %v3691_v58 = vsel %vm3598_vm12, %v1245_v57, %v3638_v28 }
  0xa9   : > { %v1230_v27 = vor.u32 %v1229_v62, %v3620_v18  ;;  %v1268_v10 = vor.u32 %v1267_v46, %v1264_v25  ;;  %v3669_v62 = vrot.slane %v1295_v41, 5  ;;  %v1319_v48 = vshll.u32 %v1106_v49, 16  ;;  %v1104_v46 = vld [vmem:[#allocation2 + $0x50] sm:$0x1] }
  0xaa   : > { %v1310_v24 = vshrl.u32 %v1105_v2, 16  ;;  %v1337_v52 = vshll.u32 %v1108_v13, 16  ;;  %v1292_v41 = vor.u32 %v1291_v19, %v1288_v50  ;;  %v1279_v26 = vrot.slane %v1278_v35, 4  ;;  %v1112_v57 = vld [vmem:[#allocation2 + $0x70] sm:$0xf] }
  0xab   : > { %1015 = vrot.lane.b32.xlu0 %v758_v36, %s2964_s16  ;;  %v837_v7 = vpop.permute.xlu0 %836  ;;  %1527 = vrot.lane.b32.xlu1 %v1164_v20, %s2965_s17  ;;  %v843_v1 = vpop.permute.xlu1 %842  ;;  %v3653_v20 = vsel %vm3598_vm12, %v1197_v17, %v3602_v51  ;;  %v1231_v21 = vrot.slane %v1230_v27, 4  ;;  %v3667_v51 = vsel %vm3598_vm12, %v1221_v42, %v3620_v18  ;;  %v1323_v17 = vshrl.u32 %v1106_v49, 16  ;;  %v1114_v50 = vld [vmem:[#allocation2 + $0x78] sm:$0xf] }
  0xac   : > { %927 = vst.msk [vmem:[#allocation3 + $0x18] sm:$0xf] %vm920_vm9, %v837_v7  ;;  %930 = vst.msk [vmem:[#allocation3 + $0x24] sm:$0xf] %vm920_vm9, %v843_v1  ;;  %v1313_v7 = vshll.u32 %v1105_v2, 16  ;;  %v1334_v27 = vshrl.u32 %v1108_v13, 16  ;;  %v1302_v30 = vor.u32 %v3671_v43, %v3669_v62 }
  0xad   : > { %v3695_v45 = vsel %vm3598_vm12, %v1231_v21, %v1235_v59  ;;  %v1259_v42 = vrot.slane %v1257_v29, 5  ;;  %v1269_v11 = vrot.slane %v1268_v10, 4  ;;  %v700_v37 = vld [vmem:[#allocation2 + $0xa4] sm:$0x1]  ;;  %v3699_v28 = vrot.slane %v1319_v48, 5 }
  0xae   : > { %v1325_v16 = vrot.slane %v1323_v17, 4  ;;  %v701_v61 = vsel %vm2996_vm2, %v510_v63, %v700_v37  ;;  %v1312_v6 = vrot.slane %v1310_v24, 4  ;;  %v1315_v1 = vrot.slane %v1313_v7, 5  ;;  %v1107_v29 = vld [vmem:[#allocation2 + $0x5c] sm:$0x1] }
  0xaf   : > { %1525 = vrot.lane.b32.xlu0 %v1154_v60, %s2965_s17  ;;  %v841_v36 = vpop.permute.xlu0 %840  ;;  %1531 = vrot.lane.b32.xlu1 %v3646_v56, %s2965_s17  ;;  %v707_v60 = vld [vmem:[#allocation2 + $0xb0] sm:$0x1]  ;;  %v847_v3 = vpop.permute.xlu1 %846  ;;  %v1347_v21 = vshrl.u32 %v1109_v54, 16  ;;  %702 = vst [vmem:[#allocation2 + $0xa4] sm:$0x1] %v701_v61  ;;  %v1336_v34 = vrot.slane %v1334_v27, 4  ;;  %v3713_v63 = vsel %vm3598_vm12, %v1255_v32, %v1259_v42  ;;  %v3718_v2 = vsel %vm3598_vm12, %v1269_v11, %v3658_v12 }
  0xb0   : > { %929 = vst.msk [vmem:[#allocation3 + $0x20] sm:$0xf] %vm920_vm9, %v841_v36  ;;  %v708_v18 = vsel %vm2996_vm2, %v527_v23, %v707_v60  ;;  %932 = vst.msk [vmem:[#allocation3 + $0x2c] sm:$0xf] %vm920_vm9, %v847_v3  ;;  %v1281_v23 = vshll.u32 %v1101_v15, 16  ;;  %v1343_v36 = vshll.u32 %v1109_v54, 16  ;;  %v1326_v15 = vor.u32 %v1325_v16, %v3699_v28 }
  0xb1   : > { %709 = vst [vmem:[#allocation2 + $0xb0] sm:$0x1] %v708_v18  ;;  %v1339_v40 = vrot.slane %v1337_v52, 5  ;;  %v1305_v44 = vshll.u32 %v1104_v46, 16  ;;  %v1358_v22 = vshrl.u32 %v1111_v53, 16  ;;  %v1361_v49 = vshll.u32 %v1111_v53, 16 }
  0xb2   : > { %v1283_v4 = vrot.slane %v1281_v23, 5  ;;  %v1303_v60 = vrot.slane %v1302_v30, 4  ;;  %v1293_v59 = vrot.slane %v1292_v41, 4  ;;  %v1316_v13 = vor.u32 %v1315_v1, %v1312_v6  ;;  %v1110_v27 = vld [vmem:[#allocation2 + $0x68] sm:$0x1] }
  0xb3   : > { %1529 = vrot.lane.b32.xlu0 %v3635_v38, %s2965_s17  ;;  %v845_v33 = vpop.permute.xlu0 %844  ;;  %1535 = vrot.lane.b32.xlu1 %v3675_v39, %s2965_s17  ;;  %v851_v8 = vpop.permute.xlu1 %850  ;;  %v3723_v18 = vrot.slane %v1343_v36, 5  ;;  %v1349_v3 = vrot.slane %v1347_v21, 4  ;;  %v1340_v19 = vor.u32 %v1339_v40, %v1336_v34  ;;  %v1367_v48 = vshll.u32 %v1112_v57, 16  ;;  %v1118_v36 = vld [vmem:[#allocation2 + $0x88] sm:$0xf] }
  0xb4   : > { %931 = vst.msk [vmem:[#allocation3 + $0x28] sm:$0xf] %vm920_vm9, %v845_v33  ;;  %934 = vst.msk [vmem:[#allocation3 + $0x34] sm:$0xf] %vm920_vm9, %v851_v8  ;;  %v1115_v33 = vld [vmem:[#allocation2 + $0x7c] sm:$0xf]  ;;  %v3731_v12 = vsel %vm3598_vm12, %v1279_v26, %v1283_v4  ;;  %v3738_v37 = vsel %vm3598_vm12, %v1293_v59, %v3669_v62 }
  0xb5   : > { %v1371_v17 = vshrl.u32 %v1112_v57, 16  ;;  %v1307_v32 = vrot.slane %v1305_v44, 5  ;;  %v1329_v35 = vshll.u32 %v1107_v29, 16  ;;  %v1360_v24 = vrot.slane %v1358_v22, 4  ;;  %v1117_v21 = vld [vmem:[#allocation2 + $0x84] sm:$0xf] }
  0xb6   : > { %v1363_v7 = vrot.slane %v1361_v49, 5  ;;  %v1391_v52 = vshll.u32 %v1115_v33, 16  ;;  %v1395_v42 = vshrl.u32 %v1115_v33, 16  ;;  %v1382_v11 = vshrl.u32 %v1114_v50, 16  ;;  %v1113_v34 = vld [vmem:[#allocation2 + $0x74] sm:$0x1] }
  0xb7   : > { %1533 = vrot.lane.b32.xlu0 %v3653_v20, %s2965_s17  ;;  %v849_v25 = vpop.permute.xlu0 %848  ;;  %1539 = vrot.lane.b32.xlu1 %v3695_v45, %s2965_s17  ;;  %v855_v10 = vpop.permute.xlu1 %854  ;;  %v1385_v30 = vshll.u32 %v1114_v50, 16  ;;  %v1317_v8 = vrot.slane %v1316_v13, 4  ;;  %v1327_v46 = vrot.slane %v1326_v15, 4  ;;  %v1341_v41 = vrot.slane %v1340_v19, 4  ;;  %v1120_v13 = vld [vmem:[#allocation2 + $0x90] sm:$0xf] }
  0xb8   : > { %933 = vst.msk [vmem:[#allocation3 + $0x30] sm:$0xf] %vm920_vm9, %v849_v25  ;;  %936 = vst.msk [vmem:[#allocation3 + $0x3c] sm:$0xf] %vm920_vm9, %v855_v10  ;;  %v1350_v25 = vor.u32 %v1349_v3, %v3723_v18  ;;  %v1369_v16 = vrot.slane %v1367_v48, 5  ;;  %v1373_v53 = vrot.slane %v1371_v17, 4  ;;  %v3747_v61 = vsel %vm3598_vm12, %v1303_v60, %v1307_v32 }
  0xb9   : > { %v1331_v6 = vrot.slane %v1329_v35, 5  ;;  %v1353_v62 = vshll.u32 %v1110_v27, 16  ;;  %v1364_v1 = vor.u32 %v1363_v7, %v1360_v24  ;;  %v3749_v40 = vrot.slane %v1391_v52, 5  ;;  %v1116_v35 = vld [vmem:[#allocation2 + $0x80] sm:$0x1] }
  0xba   : > { %v1397_v44 = vrot.slane %v1395_v42, 4  ;;  %v1384_v57 = vrot.slane %v1382_v11, 4  ;;  %v1387_v22 = vrot.slane %v1385_v30, 5  ;;  %v3756_v49 = vsel %vm3598_vm12, %v1317_v8, %v3699_v28  ;;  %v1130_v8 = vld [vmem:[#allocation2 + $0xb8] sm:$0xf] }
  0xbb   : > { %1537 = vrot.lane.b32.xlu0 %v3667_v51, %s2965_s17  ;;  %v853_v43 = vpop.permute.xlu0 %852  ;;  %1543 = vrot.lane.b32.xlu1 %v3713_v63, %s2965_s17  ;;  %v859_v23 = vpop.permute.xlu1 %858  ;;  %v1351_v10 = vrot.slane %v1350_v25, 4  ;;  %v1415_v60 = vshll.u32 %v1118_v36, 16  ;;  %v1419_v59 = vshrl.u32 %v1118_v36, 16  ;;  %v1406_v29 = vshrl.u32 %v1117_v21, 16 }
  0xbc   : > { %935 = vst.msk [vmem:[#allocation3 + $0x38] sm:$0xf] %vm920_vm9, %v853_v43  ;;  %938 = vst.msk [vmem:[#allocation3 + $0x44] sm:$0xf] %vm920_vm9, %v859_v23  ;;  %v1129_v43 = vld [vmem:[#allocation2 + $0xb4] sm:$0xf]  ;;  %v3764_v3 = vsel %vm3598_vm12, %v1327_v46, %v1331_v6  ;;  %v1374_v28 = vor.u32 %v1373_v53, %v1369_v16  ;;  %v3769_v17 = vsel %vm3598_vm12, %v1341_v41, %v3723_v18 }
  0xbd   : > { %v1409_v15 = vshll.u32 %v1117_v21, 16  ;;  %v1355_v33 = vrot.slane %v1353_v62, 5  ;;  %v1377_v50 = vshll.u32 %v1113_v34, 16  ;;  %v1365_v32 = vrot.slane %v1364_v1, 4  ;;  %v241_v6 = vld [vmem:[#allocation2 + $0x98] sm:$0x1] }
  0xbe   : > { %v1398_v24 = vor.u32 %v1397_v44, %v3749_v40  ;;  %v1388_v7 = vor.u32 %v1387_v22, %v1384_v57  ;;  %v1502_v23 = vshrl.u32 %v1129_v43, 16  ;;  %v1430_v27 = vshrl.u32 %v1120_v13, 16 }
  0xbf   : > { %1541 = vrot.lane.b32.xlu0 %v3691_v58, %s2965_s17  ;;  %v857_v54 = vpop.permute.xlu0 %856  ;;  %1547 = vrot.lane.b32.xlu1 %v3731_v12, %s2965_s17  ;;  %v863_v26 = vpop.permute.xlu1 %862  ;;  %v1433_v52 = vshll.u32 %v1120_v13, 16  ;;  %v3778_v18 = vrot.slane %v1415_v60, 5  ;;  %v1421_v42 = vrot.slane %v1419_v59, 4  ;;  %v1408_v11 = vrot.slane %v1406_v29, 4  ;;  %v1132_v13 = vld [vmem:[#allocation2 + $0xc0] sm:$0xf] }
  0xc0   : > { %937 = vst.msk [vmem:[#allocation3 + $0x40] sm:$0xf] %vm920_vm9, %v857_v54  ;;  %940 = vst.msk [vmem:[#allocation3 + $0x4c] sm:$0xf] %vm920_vm9, %v863_v26  ;;  %v1505_v54 = vshll.u32 %v1129_v43, 16  ;;  %v1411_v30 = vrot.slane %v1409_v15, 5  ;;  %v3782_v25 = vsel %vm3598_vm12, %v1351_v10, %v1355_v33  ;;  %v3786_v36 = vsel %vm3598_vm12, %v1365_v32, %v1369_v16 }
  0xc1   : > { %v1375_v46 = vrot.slane %v1374_v28, 4  ;;  %v1379_v41 = vrot.slane %v1377_v50, 5  ;;  %v1401_v53 = vshll.u32 %v1116_v35, 16  ;;  %v1389_v21 = vrot.slane %v1388_v7, 4  ;;  %v1119_v26 = vld [vmem:[#allocation2 + $0x8c] sm:$0x1] }
  0xc2   : > { %v1504_v34 = vrot.slane %v1502_v23, 4  ;;  %v1507_v44 = vrot.slane %v1505_v54, 5  ;;  %v1432_v57 = vrot.slane %v1430_v27, 4  ;;  %v1435_v22 = vrot.slane %v1433_v52, 5  ;;  %v1133_v52 = vld [vmem:[#allocation2 + $0xc4] sm:$0xf] }
  0xc3   : > { %1545 = vrot.lane.b32.xlu0 %v3718_v2, %s2965_s17  ;;  %1551 = vrot.lane.b32.xlu1 %v3747_v61, %s2965_s17  ;;  %v1399_v16 = vrot.slane %v1398_v24, 4  ;;  %v1422_v10 = vor.u32 %v1421_v42, %v3778_v18  ;;  %v1412_v5 = vor.u32 %v1411_v30, %v1408_v11  ;;  %v1511_v43 = vshll.u32 %v1130_v8, 16  ;;  %v1131_v30 = vld [vmem:[#allocation2 + $0xbc] sm:$0x1] }
  0xc4   : > { %v861_v4 = vpop.permute.xlu0 %860  ;;  %v3799_v60 = vsel %vm3598_vm12, %v1375_v46, %v1379_v41  ;;  %v1403_v59 = vrot.slane %v1401_v53, 5  ;;  %v1425_v29 = vshll.u32 %v1119_v26, 16  ;;  %v1515_v15 = vshrl.u32 %v1130_v8, 16 }
  0xc5   : > { %939 = vst.msk [vmem:[#allocation3 + $0x48] sm:$0xf] %vm920_vm9, %v861_v4  ;;  %v867_v19 = vpop.permute.xlu1 %866  ;;  %v242_v4 = vsel %vm3397_vm8, 0, %v241_v6  ;;  %v493_v50 = vrot.slane %v3270_v47, 4  ;;  %v1436_v32 = vor.u32 %v1435_v22, %v1432_v57  ;;  %v1423_v35 = vrot.slane %v1422_v10, 4 }
  0xc6   : > { %942 = vst.msk [vmem:[#allocation3 + $0x54] sm:$0xf] %vm920_vm9, %v867_v19  ;;  %243 = vst [vmem:[#allocation2 + $0x98] sm:$0x1] %v242_v4  ;;  %v3807_v19 = vsel %vm3598_vm12, %v1389_v21, %v3749_v40  ;;  %v1513_v24 = vrot.slane %v1511_v43, 5  ;;  %v1655_v47 = vshrl.u32 %v1132_v13, 16  ;;  %v3815_v23 = vsel %vm3598_vm12, %v1399_v16, %v1403_v59 }
  0xc7   : > { %1549 = vrot.lane.b32.xlu0 %v3738_v37, %s2965_s17  ;;  %1555 = vrot.lane.b32.xlu1 %v3764_v3, %s2965_s17  ;;  %v1658_v7 = vshll.u32 %v1132_v13, 16  ;;  %v1427_v54 = vrot.slane %v1425_v29, 5  ;;  %v1413_v27 = vrot.slane %v1412_v5, 4  ;;  %v1517_v40 = vrot.slane %v1515_v15, 4  ;;  %v1135_v22 = vld [vmem:[#allocation2 + $0xcc] sm:$0xf] }
  0xc8   : > { %v1437_v41 = vrot.slane %v1436_v32, 4  ;;  %v1657_v6 = vrot.slane %v1655_v47, 4  ;;  %v1668_v21 = vshrl.u32 %v1133_v52, 16  ;;  %v1136_v15 = vld [vmem:[#allocation2 + $0xd0] sm:$0xf]  ;;  %v1808_v13 = vshrl.u32 %v1135_v22, 16 }
  0xc9   : > { %v865_v48 = vpop.permute.xlu0 %864  ;;  %v871_v62 = vpop.permute.xlu1 %870  ;;  %v3827_v26 = vsel %vm3598_vm12, %v1423_v35, %v1427_v54  ;;  %v3832_v0 = vsel %vm3598_vm12, %v1413_v27, %v3778_v18  ;;  %v1518_v4 = vor.u32 %v1517_v40, %v1513_v24  ;;  %v1821_v47 = vshrl.u32 %v1136_v15, 16 }
  0xca   : > { %941 = vst.msk [vmem:[#allocation3 + $0x50] sm:$0xf] %vm920_vm9, %v865_v48  ;;  %944 = vst.msk [vmem:[#allocation3 + $0x5c] sm:$0xf] %vm920_vm9, %v871_v62  ;;  %v1508_v48 = vor.u32 %v1507_v44, %v1504_v34  ;;  %v1660_v62 = vrot.slane %v1658_v7, 5  ;;  %v1521_v34 = vshll.u32 %v1131_v30, 16  ;;  %v3847_v18 = vsel %vm3598_vm12, %v1437_v41, %v3549_v9 }
  0xcb   : > { %1553 = vrot.lane.b32.xlu0 %v3756_v49, %s2965_s17  ;;  %1559 = vrot.lane.b32.xlu1 %v3782_v25, %s2965_s17  ;;  %v1670_v43 = vrot.slane %v1668_v21, 4  ;;  %v1519_v59 = vrot.slane %v1518_v4, 4  ;;  %v1810_v27 = vrot.slane %v1808_v13, 4 }
  0xcc   : > { %v1509_v46 = vrot.slane %v1508_v48, 4  ;;  %v1661_v10 = vor.u32 %v1660_v62, %v1657_v6  ;;  %v1523_v29 = vrot.slane %v1521_v34, 5  ;;  %v1134_v48 = vld [vmem:[#allocation2 + $0xc8] sm:$0x1] }
  0xcd   : > { %v869_v1 = vpop.permute.xlu0 %868  ;;  %v875_v33 = vpop.permute.xlu1 %874  ;;  %v693_v8 = vld [vmem:[#allocation2 + $0x98] sm:$0x1]  ;;  %v1674_v54 = vshll.u32 %v1134_v48, 16 }
  0xce   : > { %943 = vst.msk [vmem:[#allocation3 + $0x58] sm:$0xf] %vm920_vm9, %v869_v1  ;;  %946 = vst.msk [vmem:[#allocation3 + $0x64] sm:$0xf] %vm920_vm9, %v875_v33  ;;  %v694_v53 = vsel %vm2996_vm2, %v493_v50, %v693_v8  ;;  %v1664_v1 = vshll.u32 %v1133_v52, 16  ;;  %v3838_v16 = vsel %vm3598_vm12, %v1509_v46, %v1513_v24  ;;  %v1811_v33 = vshll.u32 %v1135_v22, 16 }
  0xcf   : > { %1557 = vrot.lane.b32.xlu0 %v3769_v17, %s2965_s17  ;;  %1563 = vrot.lane.b32.xlu1 %v3799_v60, %s2965_s17  ;;  %695 = vst [vmem:[#allocation2 + $0x98] sm:$0x1] %v694_v53  ;;  %v1662_v32 = vrot.slane %v1661_v10, 4  ;;  %v1817_v24 = vshll.u32 %v1136_v15, 16  ;;  %v3857_v7 = vsel %vm3598_vm12, %v1519_v59, %v1523_v29  ;;  %v1676_v46 = vrot.slane %v1674_v54, 5 }
  0xd0   : > { %v1666_v5 = vrot.slane %v1664_v1, 5  ;;  %v1813_v40 = vrot.slane %v1811_v33, 5  ;;  %v1823_v53 = vrot.slane %v1821_v47, 4  ;;  %v1137_v1 = vld [vmem:[#allocation2 + $0xd4] sm:$0x1]  ;;  %vm1774_vm2 = vcmask 158848  }
  0xd1   : > { %v873_v28 = vpop.permute.xlu0 %872  ;;  %v879_v42 = vpop.permute.xlu1 %878  ;;  %v1819_v30 = vrot.slane %v1817_v24, 5  ;;  %v2005_v59 = vld [vmem:[#allocation2 + $0xb4] sm:$0xe] }
  0xd2   : > { %945 = vst.msk [vmem:[#allocation3 + $0x60] sm:$0xf] %vm920_vm9, %v873_v28  ;;  %948 = vst.msk [vmem:[#allocation3 + $0x6c] sm:$0xf] %vm920_vm9, %v879_v42  ;;  %v1671_v35 = vor.u32 %v1670_v43, %v1666_v5  ;;  %v1814_v41 = vor.u32 %v1813_v40, %v1810_v27  ;;  %v2871_v24 = vrot.slane %v2005_v59, 9 }
  0xd3   : > { %1561 = vrot.lane.b32.xlu0 %v3786_v36, %s2965_s17  ;;  %1567 = vrot.lane.b32.xlu1 %v3815_v23, %s2965_s17  ;;  %v1824_v34 = vor.u32 %v1823_v53, %v1819_v30 }
  0xd4   : > { %v1672_v8 = vrot.slane %v1671_v35, 4  ;;  %v1815_v4 = vrot.slane %v1814_v41, 4  ;;  %v1983_v35 = vld [vmem:[#allocation2 + $0x5c] sm:$0x1] }
  0xd5   : > { %v877_v11 = vpop.permute.xlu0 %876  ;;  %v883_v44 = vpop.permute.xlu1 %882  ;;  %v1825_v13 = vrot.slane %v1824_v34, 4  ;;  %v2007_v41 = vld [vmem:[#allocation2 + $0xbc] sm:$0x1] }
  0xd6   : > { %947 = vst.msk [vmem:[#allocation3 + $0x68] sm:$0xf] %vm920_vm9, %v877_v11  ;;  %950 = vst.msk [vmem:[#allocation3 + $0x74] sm:$0xf] %vm920_vm9, %v883_v44  ;;  %v3867_v11 = vsel %vm3598_vm12, %v1662_v32, %v1666_v5  ;;  %v3877_v21 = vsel %vm3598_vm12, %v1672_v8, %v1676_v46  ;;  %v1981_v44 = vld [vmem:[#allocation2 + $0x54] sm:$0xe]  ;;  %v1820_v29 = vsel %vm3598_vm12, %v1815_v4, %v1819_v30 }
  0xd7   : > { %1565 = vrot.lane.b32.xlu0 %v3807_v19, %s2965_s17  ;;  %1571 = vrot.lane.b32.xlu1 %v3827_v26, %s2965_s17  ;;  %v1982_v5 = vld [vmem:[#allocation2 + $0x58] sm:$0xf]  ;;  %v2863_v43 = vrot.slane %v1981_v44, 9  ;;  %v1985_v46 = vld [vmem:[#allocation2 + $0x64] sm:$0xf] }
  0xd8   : > { %v2116_v15 = vrot.slane %v1982_v5, 5  ;;  %v2123_v34 = vrot.slane %v1985_v46, 5 }
  0xd9   : > { %v881_v57 = vpop.permute.xlu0 %880  ;;  %v887_v28 = vpop.permute.xlu1 %886 }
  0xda   : > { %949 = vst.msk [vmem:[#allocation3 + $0x70] sm:$0xf] %vm920_vm9, %v881_v57  ;;  %952 = vst.msk [vmem:[#allocation3 + $0x7c] sm:$0xf] %vm920_vm9, %v887_v28  ;;  %v1827_v57 = vshll.u32 %v1137_v1, 16  ;;  %v3898_v54 = vsel %vm3887_vm0, %v2863_v43, %v2116_v15  ;;  %v2118_v40 = vrot.slane %v2116_v15, 4 }
  0xdb   : > { %1569 = vrot.lane.b32.xlu0 %v3832_v0, %s2965_s17  ;;  %1585 = vrot.lane.b32.xlu1 %v3838_v16, %s2965_s17  ;;  %v2006_v28 = vld [vmem:[#allocation2 + $0xb8] sm:$0xf]  ;;  %v2009_v1 = vld [vmem:[#allocation2 + $0xc4] sm:$0xf]  ;;  %v1126_v43 = vld [vmem:[#allocation2 + $0xa8] sm:$0xf] }
  0xdc   : > { %v1829_v33 = vrot.slane %v1827_v57, 5  ;;  %v2172_v47 = vrot.slane %v2006_v28, 5  ;;  %v2175_v57 = vrot.slane %v2007_v41, 5  ;;  %v2125_v15 = vrot.slane %v2123_v34, 4 }
  0xdd   : > { %v885_v50 = vpop.permute.xlu0 %884  ;;  %v958_v52 = vpop.permute.xlu1 %957 }
  0xde   : > { %951 = vst.msk [vmem:[#allocation3 + $0x78] sm:$0xf] %vm920_vm9, %v885_v50  ;;  %v1830_v27 = vsel %vm3598_vm12, %v1825_v13, %v1829_v33  ;;  %v3909_v53 = vsel %vm3887_vm0, %v2871_v24, %v2172_v47  ;;  %v2174_v44 = vrot.slane %v2172_v47, 4  ;;  %v1987_v33 = vld [vmem:[#allocation2 + $0x6c] sm:$0xe]  ;;  %v1478_v24 = vshrl.u32 %v1126_v43, 16 }
  0xdf   : > { %1573 = vrot.lane.b32.xlu0 %v3847_v18, %s2965_s17  ;;  %1053 = vst.msk [vmem:[#allocation3 + $0x4] sm:$0xf] %vm1051_vm13, %v958_v52  ;;  %1706 = vrot.lane.b32.xlu1 %v3769_v17, %s2966_s18  ;;  %v2119_v52 = vrot.slane %v1983_v35, 5  ;;  %v1127_v35 = vld [vmem:[#allocation2 + $0xac] sm:$0xf]  ;;  %v1481_v47 = vshll.u32 %v1126_v43, 16 }
  0xe1   : > { %v956_v42 = vpop.permute.xlu0 %955  ;;  %v962_v6 = vpop.permute.xlu1 %961  ;;  %v3913_v4 = vsel %vm3887_vm0, %v2118_v40, %v2119_v52  ;;  %v2010_v52 = vld [vmem:[#allocation2 + $0xc8] sm:$0x1] }
  0xe2   : > { %1052 = vst.msk [vmem:[#allocation3] sm:$0xf] %vm1051_vm13, %v956_v42  ;;  %1055 = vst.msk [vmem:[#allocation3 + $0xc] sm:$0xf] %vm1051_vm13, %v962_v6  ;;  %v1984_v42 = vld [vmem:[#allocation2 + $0x60] sm:$0xe] }
  0xe3   : > { %1587 = vrot.lane.b32.xlu0 %v3857_v7, %s2965_s17  ;;  %1738 = vrot.lane.b32.xlu1 %v3867_v11, %s2966_s18  ;;  %v2864_v6 = vrot.slane %v1984_v42, 9 }
  0xe5   : > { %v960_v62 = vpop.permute.xlu0 %959  ;;  %v966_v22 = vpop.permute.xlu1 %965  ;;  %v3923_v28 = vsel %vm3887_vm0, %v2864_v6, %v2123_v34  ;;  %v2314_v34 = vrot.slane %v2010_v52, 5  ;;  %v2013_v52 = vld [vmem:[#allocation2 + $0xd4] sm:$0x1] }
  0xe6   : > { %1054 = vst.msk [vmem:[#allocation3 + $0x8] sm:$0xf] %vm1051_vm13, %v960_v62  ;;  %1057 = vst.msk [vmem:[#allocation3 + $0x14] sm:$0xf] %vm1051_vm13, %v966_v22  ;;  %v2008_v62 = vld [vmem:[#allocation2 + $0xc0] sm:$0xe] }
  0xe7   : > { %1708 = vrot.lane.b32.xlu0 %v3782_v25, %s2966_s18  ;;  %1859 = vrot.lane.b32.xlu1 %v3786_v36, %s2967_s19  ;;  %v1986_v22 = vld [vmem:[#allocation2 + $0x68] sm:$0x1]  ;;  %v2872_v59 = vrot.slane %v2008_v62, 9  ;;  %v2012_v62 = vld [vmem:[#allocation2 + $0xd0] sm:$0xf] }
  0xe8   : > { %v2126_v13 = vrot.slane %v1986_v22, 5  ;;  %v1483_v22 = vrot.slane %v1481_v47, 5 }
  0xe9   : > { %v964_v10 = vpop.permute.xlu0 %963  ;;  %v970_v50 = vpop.permute.xlu1 %969 }
  0xea   : > { %1056 = vst.msk [vmem:[#allocation3 + $0x10] sm:$0xf] %vm1051_vm13, %v964_v10  ;;  %1059 = vst.msk [vmem:[#allocation3 + $0x1c] sm:$0xf] %vm1051_vm13, %v970_v50  ;;  %v3927_v50 = vsel %vm3887_vm0, %v2174_v44, %v2175_v57  ;;  %v3941_v46 = vsel %vm3887_vm0, %v2125_v15, %v2126_v13  ;;  %v1989_v44 = vld [vmem:[#allocation2 + $0x74] sm:$0x1] }
  0xeb   : > { %1740 = vrot.lane.b32.xlu0 %v3877_v21, %s2966_s18  ;;  %1891 = vrot.lane.b32.xlu1 %v1820_v29, %s2967_s19  ;;  %v2311_v29 = vrot.slane %v2009_v1, 5  ;;  %v1487_v1 = vshll.u32 %v1127_v35, 16  ;;  %v1480_v57 = vrot.slane %v1478_v24, 4  ;;  %v2450_v15 = vrot.slane %v2012_v62, 5 }
  0xed   : > { %v968_v48 = vpop.permute.xlu0 %967  ;;  %v974_v30 = vpop.permute.xlu1 %973  ;;  %v3933_v42 = vsel %vm3887_vm0, %v2872_v59, %v2311_v29  ;;  %v2313_v6 = vrot.slane %v2311_v29, 4  ;;  %v1489_v24 = vrot.slane %v1487_v1, 5  ;;  %v2453_v1 = vrot.slane %v2013_v52, 5 }
  0xee   : > { %1058 = vst.msk [vmem:[#allocation3 + $0x18] sm:$0xf] %vm1051_vm13, %v968_v48  ;;  %1061 = vst.msk [vmem:[#allocation3 + $0x24] sm:$0xf] %vm1051_vm13, %v974_v30  ;;  %v1988_v48 = vld [vmem:[#allocation2 + $0x70] sm:$0xf] }
  0xef   : > { %1861 = vrot.lane.b32.xlu0 %v3799_v60, %s2967_s19  ;;  %2205 = vrot.lane.b32.xlu1 %v3898_v54, %s2968_s20  ;;  %v2865_v30 = vrot.slane %v1987_v33, 9  ;;  %v2130_v41 = vrot.slane %v1988_v48, 5  ;;  %v2133_v33 = vrot.slane %v1989_v44, 5  ;;  %v3955_v48 = vsel %vm3887_vm0, %v2313_v6, %v2314_v34 }
  0xf0   : > { %v2452_v6 = vrot.slane %v2450_v15, 4 }
  0xf1   : > { %v972_v8 = vpop.permute.xlu0 %971  ;;  %v978_v10 = vpop.permute.xlu1 %977  ;;  %v3951_v29 = vsel %vm3887_vm0, %v2865_v30, %v2130_v41  ;;  %v2132_v13 = vrot.slane %v2130_v41, 4 }
  0xf2   : > { %1060 = vst.msk [vmem:[#allocation3 + $0x20] sm:$0xf] %vm1051_vm13, %v972_v8  ;;  %1063 = vst.msk [vmem:[#allocation3 + $0x2c] sm:$0xf] %vm1051_vm13, %v978_v10  ;;  %v2011_v8 = vld [vmem:[#allocation2 + $0xcc] sm:$0xe] }
  0xf3   : > { %1893 = vrot.lane.b32.xlu0 %v1830_v27, %s2967_s19  ;;  %2237 = vrot.lane.b32.xlu1 %v3909_v53, %s2968_s20  ;;  %v1491_v10 = vshrl.u32 %v1127_v35, 16  ;;  %v2873_v59 = vrot.slane %v2011_v8, 9  ;;  %v1484_v35 = vor.u32 %v1483_v22, %v1480_v57  ;;  %v1128_v8 = vld [vmem:[#allocation2 + $0xb0] sm:$0x1]  ;;  %v3967_v41 = vsel %vm3887_vm0, %v2132_v13, %v2133_v33 }
  0xf4   : > { %v1497_v44 = vshll.u32 %v1128_v8, 16  ;;  %v1978_v8 = vld [vmem:[#allocation2 + $0x48] sm:$0xe] }
  0xf5   : > { %v976_v5 = vpop.permute.xlu0 %975  ;;  %v982_v27 = vpop.permute.xlu1 %981  ;;  %v1493_v47 = vrot.slane %v1491_v10, 4  ;;  %v2451_v30 = vsel %vm3887_vm0, %v2873_v59, %v2450_v15  ;;  %v1485_v62 = vrot.slane %v1484_v35, 4 }
  0xf6   : > { %1062 = vst.msk [vmem:[#allocation3 + $0x28] sm:$0xf] %vm1051_vm13, %v976_v5  ;;  %1065 = vst.msk [vmem:[#allocation3 + $0x34] sm:$0xf] %vm1051_vm13, %v982_v27  ;;  %v1499_v59 = vrot.slane %v1497_v44, 5 }
  0xf7   : > { %2207 = vrot.lane.b32.xlu0 %v3913_v4, %s2968_s20  ;;  %2344 = vrot.lane.b32.xlu1 %v3923_v28, %s2969_s21  ;;  %v1494_v34 = vor.u32 %v1493_v47, %v1489_v24  ;;  %v3976_v10 = vsel %vm3598_vm12, %v1485_v62, %v1489_v24 }
  0xf9   : > { %v980_v40 = vpop.permute.xlu0 %979  ;;  %v986_v5 = vpop.permute.xlu1 %985 }
  0xfa   : > { %1064 = vst.msk [vmem:[#allocation3 + $0x30] sm:$0xf] %vm1051_vm13, %v980_v40  ;;  %1067 = vst.msk [vmem:[#allocation3 + $0x3c] sm:$0xf] %vm1051_vm13, %v986_v5  ;;  %v2454_v5 = vsel %vm3887_vm0, %v2452_v6, %v2453_v1  ;;  %v2862_v6 = vrot.slane %v1978_v8, 9 }
  0xfb   : > { %2239 = vrot.lane.b32.xlu0 %v3927_v50, %s2968_s20  ;;  %2376 = vrot.lane.b32.xlu1 %v3933_v42, %s2969_s21  ;;  %v2002_v1 = vld [vmem:[#allocation2 + $0xa8] sm:$0xe]  ;;  %v1123_v8 = vld [vmem:[#allocation2 + $0x9c] sm:$0xf] }
  0xfd   : > { %v984_v43 = vpop.permute.xlu0 %983  ;;  %v990_v27 = vpop.permute.xlu1 %989 }
  0xfe   : > { %1066 = vst.msk [vmem:[#allocation3 + $0x38] sm:$0xf] %vm1051_vm13, %v984_v43  ;;  %1069 = vst.msk [vmem:[#allocation3 + $0x44] sm:$0xf] %vm1051_vm13, %v990_v27  ;;  %v1495_v43 = vrot.slane %v1494_v34, 4 }
  0xff   : > { %2346 = vrot.lane.b32.xlu0 %v3941_v46, %s2969_s21  ;;  %2483 = vrot.lane.b32.xlu1 %v3951_v29, %s2970_s22 }
 0x100   : > { %v3987_v33 = vsel %vm3598_vm12, %v1495_v43, %v1499_v59 }
 0x101   : > { %v988_v40 = vpop.permute.xlu0 %987  ;;  %v994_v57 = vpop.permute.xlu1 %993 }
 0x102   : > { %1068 = vst.msk [vmem:[#allocation3 + $0x40] sm:$0xf] %vm1051_vm13, %v988_v40  ;;  %1071 = vst.msk [vmem:[#allocation3 + $0x4c] sm:$0xf] %vm1051_vm13, %v994_v57  ;;  %v2003_v57 = vld [vmem:[#allocation2 + $0xac] sm:$0xf] }
 0x103   : > { %2378 = vrot.lane.b32.xlu0 %v3955_v48, %s2969_s21  ;;  %2515 = vrot.lane.b32.xlu1 %v2451_v30, %s2970_s22  ;;  %v1979_v30 = vld [vmem:[#allocation2 + $0x4c] sm:$0xf]  ;;  %v2165_v43 = vrot.slane %v2003_v57, 5 }
 0x104   : > { %v2109_v62 = vrot.slane %v1979_v30, 5  ;;  %v1454_v30 = vshrl.u32 %v1123_v8, 16 }
 0x105   : > { %v992_v22 = vpop.permute.xlu0 %991  ;;  %v998_v15 = vpop.permute.xlu1 %997 }
 0x106   : > { %1070 = vst.msk [vmem:[#allocation3 + $0x48] sm:$0xf] %vm1051_vm13, %v992_v22  ;;  %1073 = vst.msk [vmem:[#allocation3 + $0x54] sm:$0xf] %vm1051_vm13, %v998_v15  ;;  %v1980_v22 = vld [vmem:[#allocation2 + $0x50] sm:$0x1] }
 0x107   : > { %2485 = vrot.lane.b32.xlu0 %v3967_v41, %s2970_s22  ;;  %1581 = vrot.lane.b32.xlu1 %v3976_v10, %s2965_s17  ;;  %v2111_v59 = vrot.slane %v2109_v62, 4  ;;  %v2112_v15 = vrot.slane %v1980_v22, 5 }
 0x109   : > { %v996_v13 = vpop.permute.xlu0 %995  ;;  %v1002_v35 = vpop.permute.xlu1 %1001 }
 0x10a   : > { %1072 = vst.msk [vmem:[#allocation3 + $0x50] sm:$0xf] %vm1051_vm13, %v996_v13  ;;  %1075 = vst.msk [vmem:[#allocation3 + $0x5c] sm:$0xf] %vm1051_vm13, %v1002_v35 }
 0x10b   : > { %2517 = vrot.lane.b32.xlu0 %v2454_v5, %s2970_s22  ;;  %1702 = vrot.lane.b32.xlu1 %v3756_v49, %s2966_s18  ;;  %v4015_v5 = vsel %vm3887_vm0, %v2862_v6, %v2109_v62  ;;  %v1457_v6 = vshll.u32 %v1123_v8, 16 }
 0x10d   : > { %v1000_v24 = vpop.permute.xlu0 %999  ;;  %v1006_v47 = vpop.permute.xlu1 %1005  ;;  %v1459_v57 = vrot.slane %v1457_v6, 5 }
 0x10e   : > { %1074 = vst.msk [vmem:[#allocation3 + $0x58] sm:$0xf] %vm1051_vm13, %v1000_v24  ;;  %1077 = vst.msk [vmem:[#allocation3 + $0x64] sm:$0xf] %vm1051_vm13, %v1006_v47  ;;  %v2004_v24 = vld [vmem:[#allocation2 + $0xb0] sm:$0x1] }
 0x10f   : > { %1583 = vrot.lane.b32.xlu0 %v3987_v33, %s2965_s17  ;;  %1734 = vrot.lane.b32.xlu1 %v3838_v16, %s2966_s18  ;;  %v2167_v47 = vrot.slane %v2165_v43, 4 }
 0x111   : > { %v1004_v27 = vpop.permute.xlu0 %1003  ;;  %v1010_v40 = vpop.permute.xlu1 %1009 }
 0x112   : > { %1076 = vst.msk [vmem:[#allocation3 + $0x60] sm:$0xf] %vm1051_vm13, %v1004_v27  ;;  %1079 = vst.msk [vmem:[#allocation3 + $0x6c] sm:$0xf] %vm1051_vm13, %v1010_v40  ;;  %v2168_v27 = vrot.slane %v2004_v24, 5 }
 0x113   : > { %1704 = vrot.lane.b32.xlu0 %v3764_v3, %s2966_s18  ;;  %1855 = vrot.lane.b32.xlu1 %v3769_v17, %s2967_s19  ;;  %v2870_v17 = vrot.slane %v2002_v1, 9 }
 0x115   : > { %v1008_v52 = vpop.permute.xlu0 %1007  ;;  %v1014_v34 = vpop.permute.xlu1 %1013 }
 0x116   : > { %1078 = vst.msk [vmem:[#allocation3 + $0x68] sm:$0xf] %vm1051_vm13, %v1008_v52  ;;  %1081 = vst.msk [vmem:[#allocation3 + $0x74] sm:$0xf] %vm1051_vm13, %v1014_v34  ;;  %v1124_v34 = vld [vmem:[#allocation2 + $0xa0] sm:$0xf] }
 0x117   : > { %1736 = vrot.lane.b32.xlu0 %v3857_v7, %s2966_s18  ;;  %1887 = vrot.lane.b32.xlu1 %v3867_v11, %s2967_s19  ;;  %v4029_v11 = vsel %vm3887_vm0, %v2111_v59, %v2112_v15  ;;  %v1463_v22 = vshll.u32 %v1124_v34, 16 }
 0x119   : > { %v1012_v44 = vpop.permute.xlu0 %1011  ;;  %v1018_v13 = vpop.permute.xlu1 %1017 }
 0x11a   : > { %1080 = vst.msk [vmem:[#allocation3 + $0x70] sm:$0xf] %vm1051_vm13, %v1012_v44  ;;  %1083 = vst.msk [vmem:[#allocation3 + $0x7c] sm:$0xf] %vm1051_vm13, %v1018_v13  ;;  %v1456_v44 = vrot.slane %v1454_v30, 4  ;;  %v1465_v13 = vrot.slane %v1463_v22, 5 }
 0x11b   : > { %1857 = vrot.lane.b32.xlu0 %v3782_v25, %s2967_s19  ;;  %2201 = vrot.lane.b32.xlu1 %v4015_v5, %s2968_s20  ;;  %v4025_v25 = vsel %vm3887_vm0, %v2870_v17, %v2165_v43  ;;  %v1467_v17 = vshrl.u32 %v1124_v34, 16 }
 0x11c   : > { %v1460_v15 = vor.u32 %v1459_v57, %v1456_v44 }
 0x11d   : > { %v1016_v35 = vpop.permute.xlu0 %1015  ;;  %v1528_v40 = vpop.permute.xlu1 %1527 }
 0x11e   : > { %1082 = vst.msk [vmem:[#allocation3 + $0x78] sm:$0xf] %vm1051_vm13, %v1016_v35  ;;  %v1469_v35 = vrot.slane %v1467_v17, 4 }
 0x11f   : > { %1889 = vrot.lane.b32.xlu0 %v3877_v21, %s2967_s19  ;;  %1623 = vst.msk [vmem:[#allocation3 + $0x4] sm:$0xf] %vm1621_vm1, %v1528_v40  ;;  %2233 = vrot.lane.b32.xlu1 %v4025_v25, %s2968_s20  ;;  %v4039_v21 = vsel %vm3887_vm0, %v2167_v47, %v2168_v27  ;;  %v1125_v27 = vld [vmem:[#allocation2 + $0xa4] sm:$0x1]  ;;  %v1461_v40 = vrot.slane %v1460_v15, 4 }
 0x120   : > { %v1473_v8 = vshll.u32 %v1125_v27, 16  ;;  %v1976_v15 = vld [vmem:[#allocation2 + $0x40] sm:$0xf] }
 0x121   : > { %v1526_v52 = vpop.permute.xlu0 %1525  ;;  %v1532_v62 = vpop.permute.xlu1 %1531 }
 0x122   : > { %1622 = vst.msk [vmem:[#allocation3] sm:$0xf] %vm1621_vm1, %v1526_v52  ;;  %1625 = vst.msk [vmem:[#allocation3 + $0xc] sm:$0xf] %vm1621_vm1, %v1532_v62  ;;  %v1470_v52 = vor.u32 %v1469_v35, %v1465_v13  ;;  %v4067_v62 = vsel %vm3598_vm12, %v1461_v40, %v1465_v13  ;;  %v1475_v34 = vrot.slane %v1473_v8, 5 }
 0x123   : > { %2203 = vrot.lane.b32.xlu0 %v4029_v11, %s2968_s20  ;;  %2340 = vrot.lane.b32.xlu1 %v3898_v54, %s2969_s21  ;;  %v2000_v8 = vld [vmem:[#allocation2 + $0xa0] sm:$0xf] }
 0x125   : > { %v1530_v1 = vpop.permute.xlu0 %1529  ;;  %v1536_v43 = vpop.permute.xlu1 %1535 }
 0x126   : > { %1624 = vst.msk [vmem:[#allocation3 + $0x8] sm:$0xf] %vm1621_vm1, %v1530_v1  ;;  %1627 = vst.msk [vmem:[#allocation3 + $0x14] sm:$0xf] %vm1621_vm1, %v1536_v43  ;;  %v1471_v1 = vrot.slane %v1470_v52, 4 }
 0x127   : > { %2235 = vrot.lane.b32.xlu0 %v4039_v21, %s2968_s20  ;;  %2372 = vrot.lane.b32.xlu1 %v3909_v53, %s2969_s21  ;;  %v1999_v52 = vld [vmem:[#allocation2 + $0x9c] sm:$0xe] }
 0x129   : > { %v1534_v59 = vpop.permute.xlu0 %1533  ;;  %v1540_v24 = vpop.permute.xlu1 %1539 }
 0x12a   : > { %1626 = vst.msk [vmem:[#allocation3 + $0x10] sm:$0xf] %vm1621_vm1, %v1534_v59  ;;  %1629 = vst.msk [vmem:[#allocation3 + $0x1c] sm:$0xf] %vm1621_vm1, %v1540_v24 }
 0x12b   : > { %2342 = vrot.lane.b32.xlu0 %v3913_v4, %s2969_s21  ;;  %2479 = vrot.lane.b32.xlu1 %v3923_v28, %s2970_s22 }
 0x12d   : > { %v1538_v47 = vpop.permute.xlu0 %1537  ;;  %v1544_v30 = vpop.permute.xlu1 %1543 }
 0x12e   : > { %1628 = vst.msk [vmem:[#allocation3 + $0x18] sm:$0xf] %vm1621_vm1, %v1538_v47  ;;  %1631 = vst.msk [vmem:[#allocation3 + $0x24] sm:$0xf] %vm1621_vm1, %v1544_v30  ;;  %v2102_v47 = vrot.slane %v1976_v15, 5 }
 0x12f   : > { %2374 = vrot.lane.b32.xlu0 %v3927_v50, %s2969_s21  ;;  %2511 = vrot.lane.b32.xlu1 %v3933_v42, %s2970_s22  ;;  %v4077_v42 = vsel %vm3598_vm12, %v1471_v1, %v1475_v34  ;;  %v1977_v30 = vld [vmem:[#allocation2 + $0x44] sm:$0x1]  ;;  %v2158_v1 = vrot.slane %v2000_v8, 5 }
 0x130   : > { %v2104_v34 = vrot.slane %v2102_v47, 4 }
 0x131   : > { %v1542_v6 = vpop.permute.xlu0 %1541  ;;  %v1548_v44 = vpop.permute.xlu1 %1547 }
 0x132   : > { %1630 = vst.msk [vmem:[#allocation3 + $0x20] sm:$0xf] %vm1621_vm1, %v1542_v6  ;;  %1633 = vst.msk [vmem:[#allocation3 + $0x2c] sm:$0xf] %vm1621_vm1, %v1548_v44  ;;  %v2869_v6 = vrot.slane %v1999_v52, 9  ;;  %v2105_v44 = vrot.slane %v1977_v30, 5 }
 0x133   : > { %2481 = vrot.lane.b32.xlu0 %v3941_v46, %s2970_s22  ;;  %1577 = vrot.lane.b32.xlu1 %v4067_v62, %s2965_s17  ;;  %v1447_v30 = vrot.slane %v1446_v14, 4 }
 0x135   : > { %v1546_v57 = vpop.permute.xlu0 %1545  ;;  %v1552_v22 = vpop.permute.xlu1 %1551 }
 0x136   : > { %1632 = vst.msk [vmem:[#allocation3 + $0x28] sm:$0xf] %vm1621_vm1, %v1546_v57  ;;  %1635 = vst.msk [vmem:[#allocation3 + $0x34] sm:$0xf] %vm1621_vm1, %v1552_v22 }
 0x137   : > { %2513 = vrot.lane.b32.xlu0 %v3955_v48, %s2970_s22  ;;  %1698 = vrot.lane.b32.xlu1 %v3738_v37, %s2966_s18  ;;  %v1975_v48 = vld [vmem:[#allocation2 + $0x3c] sm:$0xe] }
 0x138   : > { %v2861_v24 = vrot.slane %v1975_v48, 9 }
 0x139   : > { %v1550_v17 = vpop.permute.xlu0 %1549  ;;  %v1556_v43 = vpop.permute.xlu1 %1555 }
 0x13a   : > { %1634 = vst.msk [vmem:[#allocation3 + $0x30] sm:$0xf] %vm1621_vm1, %v1550_v17  ;;  %1637 = vst.msk [vmem:[#allocation3 + $0x3c] sm:$0xf] %vm1621_vm1, %v1556_v43  ;;  %v2001_v17 = vld [vmem:[#allocation2 + $0xa4] sm:$0x1] }
 0x13b   : > { %1579 = vrot.lane.b32.xlu0 %v4077_v42, %s2965_s17  ;;  %1730 = vrot.lane.b32.xlu1 %v3976_v10, %s2966_s18  ;;  %v2160_v43 = vrot.slane %v2158_v1, 4 }
 0x13d   : > { %v1554_v59 = vpop.permute.xlu0 %1553  ;;  %v1560_v13 = vpop.permute.xlu1 %1559 }
 0x13e   : > { %1636 = vst.msk [vmem:[#allocation3 + $0x38] sm:$0xf] %vm1621_vm1, %v1554_v59  ;;  %1639 = vst.msk [vmem:[#allocation3 + $0x44] sm:$0xf] %vm1621_vm1, %v1560_v13  ;;  %v2161_v59 = vrot.slane %v2001_v17, 5 }
 0x13f   : > { %1700 = vrot.lane.b32.xlu0 %v3747_v61, %s2966_s18  ;;  %1851 = vrot.lane.b32.xlu1 %v3756_v49, %s2967_s19  ;;  %v4105_v49 = vsel %vm3887_vm0, %v2861_v24, %v2102_v47 }
 0x141   : > { %v1558_v35 = vpop.permute.xlu0 %1557  ;;  %v1564_v27 = vpop.permute.xlu1 %1563 }
 0x142   : > { %1638 = vst.msk [vmem:[#allocation3 + $0x40] sm:$0xf] %vm1621_vm1, %v1558_v35  ;;  %1641 = vst.msk [vmem:[#allocation3 + $0x4c] sm:$0xf] %vm1621_vm1, %v1564_v27  ;;  %v1122_v27 = vld [vmem:[#allocation2 + $0x98] sm:$0x1] }
 0x143   : > { %1732 = vrot.lane.b32.xlu0 %v3987_v33, %s2966_s18  ;;  %1883 = vrot.lane.b32.xlu1 %v3838_v16, %s2967_s19  ;;  %v4119_v16 = vsel %vm3887_vm0, %v2104_v34, %v2105_v44 }
 0x145   : > { %v1562_v40 = vpop.permute.xlu0 %1561  ;;  %v1568_v57 = vpop.permute.xlu1 %1567 }
 0x146   : > { %1640 = vst.msk [vmem:[#allocation3 + $0x48] sm:$0xf] %vm1621_vm1, %v1562_v40  ;;  %1643 = vst.msk [vmem:[#allocation3 + $0x54] sm:$0xf] %vm1621_vm1, %v1568_v57  ;;  %v1449_v40 = vshll.u32 %v1122_v27, 16 }
 0x147   : > { %1853 = vrot.lane.b32.xlu0 %v3764_v3, %s2967_s19  ;;  %2197 = vrot.lane.b32.xlu1 %v4105_v49, %s2968_s20  ;;  %v4115_v3 = vsel %vm3887_vm0, %v2869_v6, %v2158_v1  ;;  %v1974_v57 = vld [vmem:[#allocation2 + $0x38] sm:$0x1] }
 0x148   : > { %v1451_v6 = vrot.slane %v1449_v40, 5  ;;  %v1998_v27 = vld [vmem:[#allocation2 + $0x98] sm:$0x1]  ;;  %v1996_v40 = vld [vmem:[#allocation2 + $0x90] sm:$0xe] }
 0x149   : > { %v1566_v22 = vpop.permute.xlu0 %1565  ;;  %v1572_v48 = vpop.permute.xlu1 %1571 }
 0x14a   : > { %1642 = vst.msk [vmem:[#allocation3 + $0x50] sm:$0xf] %vm1621_vm1, %v1566_v22  ;;  %1645 = vst.msk [vmem:[#allocation3 + $0x5c] sm:$0xf] %vm1621_vm1, %v1572_v48 }
 0x14b   : > { %1885 = vrot.lane.b32.xlu0 %v3857_v7, %s2967_s19  ;;  %2229 = vrot.lane.b32.xlu1 %v4115_v3, %s2968_s20  ;;  %v4129_v7 = vsel %vm3887_vm0, %v2160_v43, %v2161_v59  ;;  %v1972_v43 = vld [vmem:[#allocation2 + $0x30] sm:$0xe]  ;;  %v1997_v59 = vld [vmem:[#allocation2 + $0x94] sm:$0xf] }
 0x14d   : > { %v1570_v15 = vpop.permute.xlu0 %1569  ;;  %v1586_v13 = vpop.permute.xlu1 %1585 }
 0x14e   : > { %1644 = vst.msk [vmem:[#allocation3 + $0x58] sm:$0xf] %vm1621_vm1, %v1570_v15  ;;  %1652 = vst.msk [vmem:[#allocation3 + $0x78] sm:$0xf] %vm1621_vm1, %v1586_v13  ;;  %v2098_v15 = vrot.slane %v1974_v57, 5  ;;  %v2860_v13 = vrot.slane %v1972_v43, 9 }
 0x14f   : > { %2199 = vrot.lane.b32.xlu0 %v4119_v16, %s2968_s20  ;;  %2336 = vrot.lane.b32.xlu1 %v4015_v5, %s2969_s21 }
 0x151   : > { %v1574_v35 = vpop.permute.xlu0 %1573  ;;  %v1707_v24 = vpop.permute.xlu1 %1706 }
 0x152   : > { %1646 = vst.msk [vmem:[#allocation3 + $0x60] sm:$0xf] %vm1621_vm1, %v1574_v35  ;;  %v2151_v35 = vrot.slane %v1997_v59, 5 }
 0x153   : > { %2231 = vrot.lane.b32.xlu0 %v4129_v7, %s2968_s20  ;;  %1789 = vst.msk [vmem:[#allocation3 + $0x38] sm:$0xf] %vm1774_vm2, %v1707_v24  ;;  %2368 = vrot.lane.b32.xlu1 %v4025_v25, %s2969_s21 }
 0x155   : > { %v1588_v47 = vpop.permute.xlu0 %1587  ;;  %v1739_v52 = vpop.permute.xlu1 %1738 }
 0x156   : > { %1653 = vst.msk [vmem:[#allocation3 + $0x7c] sm:$0xf] %vm1621_vm1, %v1588_v47 }
 0x157   : > { %2338 = vrot.lane.b32.xlu0 %v4029_v11, %s2969_s21  ;;  %1805 = vst.msk [vmem:[#allocation3 + $0x78] sm:$0xf] %vm1774_vm2, %v1739_v52  ;;  %2475 = vrot.lane.b32.xlu1 %v3898_v54, %s2970_s22  ;;  %v4160_v54 = vsel %vm3598_vm12, %v1447_v30, %v1451_v6  ;;  %v2153_v52 = vrot.slane %v2151_v35, 4  ;;  %v2868_v30 = vrot.slane %v1996_v40, 9 }
 0x159   : > { %v1709_v8 = vpop.permute.xlu0 %1708  ;;  %v1860_v1 = vpop.permute.xlu1 %1859 }
 0x15a   : > { %1790 = vst.msk [vmem:[#allocation3 + $0x3c] sm:$0xf] %vm1774_vm2, %v1709_v8  ;;  %v2154_v8 = vrot.slane %v1998_v27, 5 }
 0x15b   : > { %2370 = vrot.lane.b32.xlu0 %v4039_v21, %s2969_s21  ;;  %1942 = vst.msk [vmem:[#allocation3 + $0x38] sm:$0xf] %vm1927_vm3, %v1860_v1  ;;  %2507 = vrot.lane.b32.xlu1 %v3909_v53, %s2970_s22 }
 0x15d   : > { %v1741_v34 = vpop.permute.xlu0 %1740  ;;  %v1892_v44 = vpop.permute.xlu1 %1891 }
 0x15e   : > { %1806 = vst.msk [vmem:[#allocation3 + $0x7c] sm:$0xf] %vm1774_vm2, %v1741_v34 }
 0x15f   : > { %2477 = vrot.lane.b32.xlu0 %v3913_v4, %s2970_s22  ;;  %1958 = vst.msk [vmem:[#allocation3 + $0x78] sm:$0xf] %vm1927_vm3, %v1892_v44  ;;  %1575 = vrot.lane.b32.xlu1 %v4160_v54, %s2965_s17 }
 0x161   : > { %v1862_v9 = vpop.permute.xlu0 %1861  ;;  %v2206_v55 = vpop.permute.xlu1 %2205 }
 0x162   : > { %1943 = vst.msk [vmem:[#allocation3 + $0x3c] sm:$0xf] %vm1927_vm3, %v1862_v9 }
 0x163   : > { %2509 = vrot.lane.b32.xlu0 %v3927_v50, %s2970_s22  ;;  %2288 = vst.msk [vmem:[#allocation3 + $0x38] sm:$0xf] %vm2273_vm4, %v2206_v55  ;;  %1696 = vrot.lane.b32.xlu1 %v3731_v12, %s2966_s18  ;;  %v2095_v50 = vrot.slane %v1973_v31, 5 }
 0x165   : > { %v1894_v14 = vpop.permute.xlu0 %1893  ;;  %v2238_v53 = vpop.permute.xlu1 %2237  ;;  %v2097_v48 = vrot.slane %v2095_v50, 4 }
 0x166   : > { %1959 = vst.msk [vmem:[#allocation3 + $0x7c] sm:$0xf] %vm1927_vm3, %v1894_v14 }
 0x167   : > { %1694 = vrot.lane.b32.xlu0 %v3718_v2, %s2966_s18  ;;  %2304 = vst.msk [vmem:[#allocation3 + $0x78] sm:$0xf] %vm2273_vm4, %v2238_v53  ;;  %1728 = vrot.lane.b32.xlu1 %v4077_v42, %s2966_s18 }
 0x169   : > { %v2208_v4 = vpop.permute.xlu0 %2207  ;;  %v2345_v22 = vpop.permute.xlu1 %2344 }
 0x16a   : > { %2289 = vst.msk [vmem:[#allocation3 + $0x3c] sm:$0xf] %vm2273_vm4, %v2208_v4 }
 0x16b   : > { %1726 = vrot.lane.b32.xlu0 %v4067_v62, %s2966_s18  ;;  %2427 = vst.msk [vmem:[#allocation3 + $0x38] sm:$0xf] %vm2412_vm5, %v2345_v22  ;;  %1849 = vrot.lane.b32.xlu1 %v3747_v61, %s2967_s19  ;;  %v4198_v61 = vsel %vm3887_vm0, %v2860_v13, %v2095_v50 }
 0x16d   : > { %v2240_v17 = vpop.permute.xlu0 %2239  ;;  %v2377_v24 = vpop.permute.xlu1 %2376 }
 0x16e   : > { %2305 = vst.msk [vmem:[#allocation3 + $0x7c] sm:$0xf] %vm2273_vm4, %v2240_v17 }
 0x16f   : > { %1847 = vrot.lane.b32.xlu0 %v3738_v37, %s2967_s19  ;;  %2443 = vst.msk [vmem:[#allocation3 + $0x78] sm:$0xf] %vm2412_vm5, %v2377_v24  ;;  %1881 = vrot.lane.b32.xlu1 %v3987_v33, %s2967_s19  ;;  %v4194_v37 = vsel %vm3887_vm0, %v2097_v48, %v2098_v15  ;;  %v4212_v33 = vsel %vm3887_vm0, %v2868_v30, %v2151_v35  ;;  %v1969_v24 = vld [vmem:[#allocation2 + $0x24] sm:$0xe] }
 0x171   : > { %v2347_v47 = vpop.permute.xlu0 %2346  ;;  %v2484_v6 = vpop.permute.xlu1 %2483 }
 0x172   : > { %2428 = vst.msk [vmem:[#allocation3 + $0x3c] sm:$0xf] %vm2412_vm5, %v2347_v47  ;;  %v1994_v47 = vld [vmem:[#allocation2 + $0x88] sm:$0xf] }
 0x173   : > { %1879 = vrot.lane.b32.xlu0 %v3976_v10, %s2967_s19  ;;  %2566 = vst.msk [vmem:[#allocation3 + $0x38] sm:$0xf] %vm2551_vm6, %v2484_v6  ;;  %2195 = vrot.lane.b32.xlu1 %v4194_v37, %s2968_s20  ;;  %v4208_v10 = vsel %vm3887_vm0, %v2153_v52, %v2154_v8  ;;  %v2859_v52 = vrot.slane %v1969_v24, 9  ;;  %v2144_v8 = vrot.slane %v1994_v47, 5 }
 0x175   : > { %v2379_v1 = vpop.permute.xlu0 %2378  ;;  %v2516_v34 = vpop.permute.xlu1 %2515 }
 0x176   : > { %2444 = vst.msk [vmem:[#allocation3 + $0x7c] sm:$0xf] %vm2412_vm5, %v2379_v1  ;;  %v1995_v1 = vld [vmem:[#allocation2 + $0x8c] sm:$0x1] }
 0x177   : > { %2193 = vrot.lane.b32.xlu0 %v4198_v61, %s2968_s20  ;;  %2582 = vst.msk [vmem:[#allocation3 + $0x78] sm:$0xf] %vm2551_vm6, %v2516_v34  ;;  %2227 = vrot.lane.b32.xlu1 %v4208_v10, %s2968_s20  ;;  %v1993_v34 = vld [vmem:[#allocation2 + $0x84] sm:$0xe] }
 0x179   : > { %v2486_v44 = vpop.permute.xlu0 %2485  ;;  %v1582_v9 = vpop.permute.xlu1 %1581 }
 0x17a   : > { %2567 = vst.msk [vmem:[#allocation3 + $0x3c] sm:$0xf] %vm2551_vm6, %v2486_v44  ;;  %v2146_v44 = vrot.slane %v2144_v8, 4 }
 0x17b   : > { %2225 = vrot.lane.b32.xlu0 %v4212_v33, %s2968_s20  ;;  %1650 = vst.msk [vmem:[#allocation3 + $0x70] sm:$0xf] %vm1621_vm1, %v1582_v9  ;;  %2334 = vrot.lane.b32.xlu1 %v4119_v16, %s2969_s21  ;;  %v2147_v9 = vrot.slane %v1995_v1, 5 }
 0x17d   : > { %v2518_v55 = vpop.permute.xlu0 %2517  ;;  %v1703_v14 = vpop.permute.xlu1 %1702 }
 0x17e   : > { %2583 = vst.msk [vmem:[#allocation3 + $0x7c] sm:$0xf] %vm2551_vm6, %v2518_v55  ;;  %v2867_v55 = vrot.slane %v1993_v34, 9 }
 0x17f   : > { %2332 = vrot.lane.b32.xlu0 %v4105_v49, %s2969_s21  ;;  %1787 = vst.msk [vmem:[#allocation3 + $0x30] sm:$0xf] %vm1774_vm2, %v1703_v14  ;;  %2366 = vrot.lane.b32.xlu1 %v4129_v7, %s2969_s21 }
 0x181   : > { %v1584_v31 = vpop.permute.xlu0 %1583  ;;  %v2939_v53 = vld [vmem:[#allocation3 + $0x38] sm:$0xff]   ;;  %v1735_v4 = vpop.permute.xlu1 %1734 }
 0x182   : > { %1651 = vst.msk [vmem:[#allocation3 + $0x74] sm:$0xf] %vm1621_vm1, %v1584_v31  ;;  %v2723_v22 = vsel %vm2697_vm7, %v2939_v53, 0 }
 0x183   : > { %2364 = vrot.lane.b32.xlu0 %v4115_v3, %s2969_s21  ;;  %1803 = vst.msk [vmem:[#allocation3 + $0x70] sm:$0xf] %vm1774_vm2, %v1735_v4  ;;  %2473 = vrot.lane.b32.xlu1 %v4029_v11, %s2970_s22 }
 0x185   : > { %v1705_v50 = vpop.permute.xlu0 %1704  ;;  %v2938_v57 = vld [vmem:[#allocation3 + $0x78] sm:$0xff]   ;;  %v1856_v17 = vpop.permute.xlu1 %1855 }
 0x186   : > { %1788 = vst.msk [vmem:[#allocation3 + $0x34] sm:$0xf] %vm1774_vm2, %v1705_v50  ;;  %2913 = vmatprep.subr.msk.bf16.mxu0 %vm2697_vm7, %v2938_v57 }
 0x187   : > { %2471 = vrot.lane.b32.xlu0 %v4015_v5, %s2970_s22  ;;  %2896 = vmatpush3.bf16.xpose.msra.mxu0 %v2723_v22  ;;  %1940 = vst.msk [vmem:[#allocation3 + $0x30] sm:$0xf] %vm1927_vm3, %v1856_v17  ;;  %v1970_v5 = vld [vmem:[#allocation2 + $0x28] sm:$0xf] }
 0x188   : > { %2505 = vrot.lane.b32.xlu1 %v4039_v21, %s2970_s22  ;;  %v1971_v21 = vld [vmem:[#allocation2 + $0x2c] sm:$0x1] }
 0x189   : > { %v1737_v43 = vpop.permute.xlu0 %1736  ;;  %v1888_v11 = vpop.permute.xlu1 %1887  ;;  %v2091_v40 = vrot.slane %v1971_v21, 5 }
 0x18a   : > { %1804 = vst.msk [vmem:[#allocation3 + $0x74] sm:$0xf] %vm1774_vm2, %v1737_v43 }
 0x18b   : > { %2503 = vrot.lane.b32.xlu0 %v4025_v25, %s2970_s22  ;;  %1956 = vst.msk [vmem:[#allocation3 + $0x70] sm:$0xf] %vm1927_vm3, %v1888_v11  ;;  %v2088_v25 = vrot.slane %v1970_v5, 5 }
 0x18c   : > { %1692 = vrot.lane.b32.xlu1 %v3713_v63, %s2966_s18 }
 0x18d   : > { %v1858_v59 = vpop.permute.xlu0 %1857  ;;  %v2202_v48 = vpop.permute.xlu1 %2201  ;;  %v2090_v27 = vrot.slane %v2088_v25, 4 }
 0x18e   : > { %1941 = vst.msk [vmem:[#allocation3 + $0x34] sm:$0xf] %vm1927_vm3, %v1858_v59 }
 0x18f   : > { %1690 = vrot.lane.b32.xlu0 %v3691_v58, %s2966_s18  ;;  %2286 = vst.msk [vmem:[#allocation3 + $0x30] sm:$0xf] %vm2273_vm4, %v2202_v48 }
 0x190   : > { %1724 = vrot.lane.b32.xlu1 %v4160_v54, %s2966_s18 }
 0x191   : > { %v1890_v15 = vpop.permute.xlu0 %1889  ;;  %v2234_v13 = vpop.permute.xlu1 %2233 }
 0x192   : > { %1957 = vst.msk [vmem:[#allocation3 + $0x74] sm:$0xf] %vm1927_vm3, %v1890_v15 }
 0x193   : > { %1722 = vrot.lane.b32.xlu0 %v3847_v18, %s2966_s18  ;;  %2302 = vst.msk [vmem:[#allocation3 + $0x70] sm:$0xf] %vm2273_vm4, %v2234_v13 }
 0x194   : > { %1845 = vrot.lane.b32.xlu1 %v3731_v12, %s2967_s19  ;;  %v4276_v12 = vsel %vm3887_vm0, %v2859_v52, %v2088_v25 }
 0x195   : > { %v2204_v35 = vpop.permute.xlu0 %2203  ;;  %v2341_v30 = vpop.permute.xlu1 %2340 }
 0x196   : > { %2287 = vst.msk [vmem:[#allocation3 + $0x34] sm:$0xf] %vm2273_vm4, %v2204_v35  ;;  %v1968_v35 = vld [vmem:[#allocation2 + $0x20] sm:$0x1] }
 0x197   : > { %1843 = vrot.lane.b32.xlu0 %v3718_v2, %s2967_s19  ;;  %2425 = vst.msk [vmem:[#allocation3 + $0x30] sm:$0xf] %vm2412_vm5, %v2341_v30  ;;  %v4272_v2 = vsel %vm3887_vm0, %v2090_v27, %v2091_v40  ;;  %v1966_v27 = vld [vmem:[#allocation2 + $0x18] sm:$0xe]  ;;  %v1991_v40 = vld [vmem:[#allocation2 + $0x7c] sm:$0xf] }
 0x198   : > { %1877 = vrot.lane.b32.xlu1 %v4077_v42, %s2967_s19  ;;  %v4290_v42 = vsel %vm3887_vm0, %v2867_v55, %v2144_v8  ;;  %v2084_v8 = vrot.slane %v1968_v35, 5  ;;  %v2858_v30 = vrot.slane %v1966_v27, 9  ;;  %v1965_v35 = vld [vmem:[#allocation2 + $0x14] sm:$0x1] }
 0x199   : > { %v2236_v6 = vpop.permute.xlu0 %2235  ;;  %v2373_v14 = vpop.permute.xlu1 %2372  ;;  %v2077_v27 = vrot.slane %v1965_v35, 5 }
 0x19a   : > { %2303 = vst.msk [vmem:[#allocation3 + $0x74] sm:$0xf] %vm2273_vm4, %v2236_v6  ;;  %v2137_v6 = vrot.slane %v1991_v40, 5 }
 0x19b   : > { %1875 = vrot.lane.b32.xlu0 %v4067_v62, %s2967_s19  ;;  %2441 = vst.msk [vmem:[#allocation3 + $0x70] sm:$0xf] %vm2412_vm5, %v2373_v14  ;;  %v4286_v62 = vsel %vm3887_vm0, %v2146_v44, %v2147_v9  ;;  %v1992_v44 = vld [vmem:[#allocation2 + $0x80] sm:$0x1]  ;;  %v1990_v9 = vld [vmem:[#allocation2 + $0x78] sm:$0xe] }
 0x19c   : > { %2191 = vrot.lane.b32.xlu1 %v4272_v2, %s2968_s20  ;;  %v2139_v55 = vrot.slane %v2137_v6, 4  ;;  %v2140_v14 = vrot.slane %v1992_v44, 5 }
 0x19d   : > { %v2343_v31 = vpop.permute.xlu0 %2342  ;;  %v2480_v53 = vpop.permute.xlu1 %2479 }
 0x19e   : > { %2426 = vst.msk [vmem:[#allocation3 + $0x34] sm:$0xf] %vm2412_vm5, %v2343_v31  ;;  %v2866_v31 = vrot.slane %v1990_v9, 9 }
 0x19f   : > { %2189 = vrot.lane.b32.xlu0 %v4276_v12, %s2968_s20  ;;  %2564 = vst.msk [vmem:[#allocation3 + $0x30] sm:$0xf] %vm2551_vm6, %v2480_v53 }
 0x1a0   : > { %2223 = vrot.lane.b32.xlu1 %v4286_v62, %s2968_s20 }
 0x1a1   : > { %v2375_v4 = vpop.permute.xlu0 %2374  ;;  %v2512_v50 = vpop.permute.xlu1 %2511 }
 0x1a2   : > { %2442 = vst.msk [vmem:[#allocation3 + $0x74] sm:$0xf] %vm2412_vm5, %v2375_v4 }
 0x1a3   : > { %2221 = vrot.lane.b32.xlu0 %v4290_v42, %s2968_s20  ;;  %2580 = vst.msk [vmem:[#allocation3 + $0x70] sm:$0xf] %vm2551_vm6, %v2512_v50 }
 0x1a4   : > { %2330 = vrot.lane.b32.xlu1 %v4194_v37, %s2969_s21 }
 0x1a5   : > { %v2482_v57 = vpop.permute.xlu0 %2481  ;;  %v1578_v22 = vpop.permute.xlu1 %1577 }
 0x1a6   : > { %2565 = vst.msk [vmem:[#allocation3 + $0x34] sm:$0xf] %vm2551_vm6, %v2482_v57 }
 0x1a7   : > { %2328 = vrot.lane.b32.xlu0 %v4198_v61, %s2969_s21  ;;  %1648 = vst.msk [vmem:[#allocation3 + $0x68] sm:$0xf] %vm1621_vm1, %v1578_v22 }
 0x1a8   : > { %2362 = vrot.lane.b32.xlu1 %v4208_v10, %s2969_s21 }
 0x1a9   : > { %v2514_v17 = vpop.permute.xlu0 %2513  ;;  %v1699_v43 = vpop.permute.xlu1 %1698 }
 0x1aa   : > { %2581 = vst.msk [vmem:[#allocation3 + $0x74] sm:$0xf] %vm2551_vm6, %v2514_v17 }
 0x1ab   : > { %2360 = vrot.lane.b32.xlu0 %v4212_v33, %s2969_s21  ;;  %1785 = vst.msk [vmem:[#allocation3 + $0x28] sm:$0xf] %vm1774_vm2, %v1699_v43 }
 0x1ac   : > { %2469 = vrot.lane.b32.xlu1 %v4119_v16, %s2970_s22 }
 0x1ad   : > { %v1580_v11 = vpop.permute.xlu0 %1579  ;;  %v2941_v59 = vld [vmem:[#allocation3 + $0x30] sm:$0xff]   ;;  %v1731_v5 = vpop.permute.xlu1 %1730 }
 0x1ae   : > { %1649 = vst.msk [vmem:[#allocation3 + $0x6c] sm:$0xf] %vm1621_vm1, %v1580_v11  ;;  %v2720_v16 = vsel %vm2697_vm7, %v2941_v59, 0 }
 0x1af   : > { %2467 = vrot.lane.b32.xlu0 %v4105_v49, %s2970_s22  ;;  %1801 = vst.msk [vmem:[#allocation3 + $0x68] sm:$0xf] %vm1774_vm2, %v1731_v5 }
 0x1b0   : > { %2501 = vrot.lane.b32.xlu1 %v4129_v7, %s2970_s22  ;;  %v1967_v7 = vld [vmem:[#allocation2 + $0x1c] sm:$0xf] }
 0x1b1   : > { %v1701_v48 = vpop.permute.xlu0 %1700  ;;  %v2940_v15 = vld [vmem:[#allocation3 + $0x70] sm:$0xff]   ;;  %v1852_v25 = vpop.permute.xlu1 %1851  ;;  %v2081_v13 = vrot.slane %v1967_v7, 5 }
 0x1b2   : > { %1786 = vst.msk [vmem:[#allocation3 + $0x2c] sm:$0xf] %vm1774_vm2, %v1701_v48  ;;  %2914 = vmatprep.subr.msk.bf16.mxu0 %vm2697_vm7, %v2940_v15 }
 0x1b3   : > { %2499 = vrot.lane.b32.xlu0 %v4115_v3, %s2970_s22  ;;  %2898 = vmatpush3.bf16.xpose.msra.mxu0 %v2720_v16  ;;  %1938 = vst.msk [vmem:[#allocation3 + $0x28] sm:$0xf] %vm1927_vm3, %v1852_v25  ;;  %v2083_v52 = vrot.slane %v2081_v13, 4 }
 0x1b4   : > { %1688 = vrot.lane.b32.xlu1 %v3695_v45, %s2966_s18 }
 0x1b5   : > { %v1733_v49 = vpop.permute.xlu0 %1732  ;;  %v1884_v21 = vpop.permute.xlu1 %1883 }
 0x1b6   : > { %1802 = vst.msk [vmem:[#allocation3 + $0x6c] sm:$0xf] %vm1774_vm2, %v1733_v49 }
 0x1b7   : > { %1686 = vrot.lane.b32.xlu0 %v3667_v51, %s2966_s18  ;;  %1954 = vst.msk [vmem:[#allocation3 + $0x68] sm:$0xf] %vm1927_vm3, %v1884_v21 }
 0x1b8   : > { %1720 = vrot.lane.b32.xlu1 %v3827_v26, %s2966_s18 }
 0x1b9   : > { %v1854_v3 = vpop.permute.xlu0 %1853  ;;  %v2198_v24 = vpop.permute.xlu1 %2197 }
 0x1ba   : > { %1939 = vst.msk [vmem:[#allocation3 + $0x2c] sm:$0xf] %vm1927_vm3, %v1854_v3 }
 0x1bb   : > { %1718 = vrot.lane.b32.xlu0 %v3832_v0, %s2966_s18  ;;  %2284 = vst.msk [vmem:[#allocation3 + $0x28] sm:$0xf] %vm2273_vm4, %v2198_v24  ;;  %v1963_v24 = vld [vmem:[#allocation2 + $0xc] sm:$0xe] }
 0x1bc   : > { %1841 = vrot.lane.b32.xlu1 %v3713_v63, %s2967_s19  ;;  %v4354_v63 = vsel %vm3887_vm0, %v2858_v30, %v2081_v13  ;;  %v2857_v40 = vrot.slane %v1963_v24, 9 }
 0x1bd   : > { %v1886_v47 = vpop.permute.xlu0 %1885  ;;  %v2230_v1 = vpop.permute.xlu1 %2229 }
 0x1be   : > { %1955 = vst.msk [vmem:[#allocation3 + $0x6c] sm:$0xf] %vm1927_vm3, %v1886_v47 }
 0x1bf   : > { %1839 = vrot.lane.b32.xlu0 %v3691_v58, %s2967_s19  ;;  %2300 = vst.msk [vmem:[#allocation3 + $0x68] sm:$0xf] %vm2273_vm4, %v2230_v1  ;;  %v4350_v58 = vsel %vm3887_vm0, %v2083_v52, %v2084_v8 }
 0x1c0   : > { %1873 = vrot.lane.b32.xlu1 %v4160_v54, %s2967_s19  ;;  %v4368_v54 = vsel %vm3887_vm0, %v2866_v31, %v2137_v6 }
 0x1c1   : > { %v2200_v34 = vpop.permute.xlu0 %2199  ;;  %v2337_v53 = vpop.permute.xlu1 %2336 }
 0x1c2   : > { %2285 = vst.msk [vmem:[#allocation3 + $0x2c] sm:$0xf] %vm2273_vm4, %v2200_v34 }
 0x1c3   : > { %1871 = vrot.lane.b32.xlu0 %v3847_v18, %s2967_s19  ;;  %2423 = vst.msk [vmem:[#allocation3 + $0x28] sm:$0xf] %vm2412_vm5, %v2337_v53  ;;  %v4364_v18 = vsel %vm3887_vm0, %v2139_v55, %v2140_v14 }
 0x1c4   : > { %2187 = vrot.lane.b32.xlu1 %v4350_v58, %s2968_s20 }
 0x1c5   : > { %v2232_v4 = vpop.permute.xlu0 %2231  ;;  %v2369_v50 = vpop.permute.xlu1 %2368 }
 0x1c6   : > { %2301 = vst.msk [vmem:[#allocation3 + $0x6c] sm:$0xf] %vm2273_vm4, %v2232_v4 }
 0x1c7   : > { %2185 = vrot.lane.b32.xlu0 %v4354_v63, %s2968_s20  ;;  %2439 = vst.msk [vmem:[#allocation3 + $0x68] sm:$0xf] %vm2412_vm5, %v2369_v50 }
 0x1c8   : > { %2219 = vrot.lane.b32.xlu1 %v4364_v18, %s2968_s20 }
 0x1c9   : > { %v2339_v57 = vpop.permute.xlu0 %2338  ;;  %v2476_v22 = vpop.permute.xlu1 %2475 }
 0x1ca   : > { %2424 = vst.msk [vmem:[#allocation3 + $0x2c] sm:$0xf] %vm2412_vm5, %v2339_v57 }
 0x1cb   : > { %2217 = vrot.lane.b32.xlu0 %v4368_v54, %s2968_s20  ;;  %2562 = vst.msk [vmem:[#allocation3 + $0x28] sm:$0xf] %vm2551_vm6, %v2476_v22 }
 0x1cc   : > { %2326 = vrot.lane.b32.xlu1 %v4272_v2, %s2969_s21 }
 0x1cd   : > { %v2371_v17 = vpop.permute.xlu0 %2370  ;;  %v2508_v43 = vpop.permute.xlu1 %2507 }
 0x1ce   : > { %2440 = vst.msk [vmem:[#allocation3 + $0x6c] sm:$0xf] %vm2412_vm5, %v2371_v17 }
 0x1cf   : > { %2324 = vrot.lane.b32.xlu0 %v4276_v12, %s2969_s21  ;;  %2578 = vst.msk [vmem:[#allocation3 + $0x68] sm:$0xf] %vm2551_vm6, %v2508_v43  ;;  %v1962_v43 = vld [vmem:[#allocation2 + $0x8] sm:$0x1] }
 0x1d0   : > { %2358 = vrot.lane.b32.xlu1 %v4286_v62, %s2969_s21 }
 0x1d1   : > { %v2478_v11 = vpop.permute.xlu0 %2477  ;;  %v1576_v59 = vpop.permute.xlu1 %1575 }
 0x1d2   : > { %2563 = vst.msk [vmem:[#allocation3 + $0x2c] sm:$0xf] %vm2551_vm6, %v2478_v11  ;;  %v1960_v11 = vld [vmem:[#allocation2] sm:$0xe] }
 0x1d3   : > { %2356 = vrot.lane.b32.xlu0 %v4290_v42, %s2969_s21  ;;  %1647 = vst.msk [vmem:[#allocation3 + $0x64] sm:$0xf] %vm1621_vm1, %v1576_v59 }
 0x1d4   : > { %2465 = vrot.lane.b32.xlu1 %v4194_v37, %s2970_s22 }
 0x1d5   : > { %v2510_v5 = vpop.permute.xlu0 %2509  ;;  %v1697_v48 = vpop.permute.xlu1 %1696 }
 0x1d6   : > { %2579 = vst.msk [vmem:[#allocation3 + $0x6c] sm:$0xf] %vm2551_vm6, %v2510_v5  ;;  %v2856_v5 = vrot.slane %v1960_v11, 9 }
 0x1d7   : > { %2463 = vrot.lane.b32.xlu0 %v4198_v61, %s2970_s22  ;;  %1784 = vst.msk [vmem:[#allocation3 + $0x24] sm:$0xf] %vm1774_vm2, %v1697_v48 }
 0x1d8   : > { %2497 = vrot.lane.b32.xlu1 %v4208_v10, %s2970_s22 }
 0x1d9   : > { %v1695_v15 = vpop.permute.xlu0 %1694  ;;  %v2943_v16 = vld [vmem:[#allocation3 + $0x28] sm:$0xff]   ;;  %v1729_v25 = vpop.permute.xlu1 %1728 }
 0x1da   : > { %1783 = vst.msk [vmem:[#allocation3 + $0x20] sm:$0xf] %vm1774_vm2, %v1695_v15  ;;  %1800 = vst.msk [vmem:[#allocation3 + $0x64] sm:$0xf] %vm1774_vm2, %v1729_v25  ;;  %v2717_v37 = vsel %vm2697_vm7, %v2943_v16, 0 }
 0x1db   : > { %2495 = vrot.lane.b32.xlu0 %v4212_v33, %s2970_s22  ;;  %v1964_v33 = vld [vmem:[#allocation2 + $0x10] sm:$0xf] }
 0x1dc   : > { %1684 = vrot.lane.b32.xlu1 %v3675_v39, %s2966_s18  ;;  %v2074_v21 = vrot.slane %v1964_v33, 5 }
 0x1dd   : > { %v1727_v49 = vpop.permute.xlu0 %1726  ;;  %v2942_v7 = vld [vmem:[#allocation3 + $0x68] sm:$0xff]   ;;  %v1850_v61 = vpop.permute.xlu1 %1849 }
 0x1de   : > { %1799 = vst.msk [vmem:[#allocation3 + $0x60] sm:$0xf] %vm1774_vm2, %v1727_v49  ;;  %2915 = vmatprep.subr.msk.bf16.mxu0 %vm2697_vm7, %v2942_v7  ;;  %v2076_v47 = vrot.slane %v2074_v21, 4 }
 0x1df   : > { %1682 = vrot.lane.b32.xlu0 %v3653_v20, %s2966_s18  ;;  %2900 = vmatpush3.bf16.xpose.msra.mxu0 %v2717_v37  ;;  %1937 = vst.msk [vmem:[#allocation3 + $0x24] sm:$0xf] %vm1927_vm3, %v1850_v61  ;;  %v4531_v37 = vld [vmem:[%s4617_s1] sm:$0xf] }
 0x1e0   : > { %1716 = vrot.lane.b32.xlu1 %v3815_v23, %s2966_s18  ;;  %2911 = vmatprep.mubr.msk.bf16.mxu0 %vm2697_vm7, %v4531_v37 }
 0x1e1   : > { %v1848_v10 = vpop.permute.xlu0 %1847  ;;  %v1882_v3 = vpop.permute.xlu1 %1881 }
 0x1e2   : > { %1936 = vst.msk [vmem:[#allocation3 + $0x20] sm:$0xf] %vm1927_vm3, %v1848_v10  ;;  %1953 = vst.msk [vmem:[#allocation3 + $0x64] sm:$0xf] %vm1927_vm3, %v1882_v3 }
 0x1e3   : > { %1714 = vrot.lane.b32.xlu0 %v3807_v19, %s2966_s18 }
 0x1e4   : > { %1837 = vrot.lane.b32.xlu1 %v3695_v45, %s2967_s19  ;;  %v4428_v45 = vsel %vm3887_vm0, %v2076_v47, %v2077_v27 }
 0x1e5   : > { %v1880_v13 = vpop.permute.xlu0 %1879  ;;  %v2196_v52 = vpop.permute.xlu1 %2195 }
 0x1e6   : > { %1952 = vst.msk [vmem:[#allocation3 + $0x60] sm:$0xf] %vm1927_vm3, %v1880_v13 }
 0x1e7   : > { %1835 = vrot.lane.b32.xlu0 %v3667_v51, %s2967_s19  ;;  %2283 = vst.msk [vmem:[#allocation3 + $0x24] sm:$0xf] %vm2273_vm4, %v2196_v52  ;;  %v4432_v51 = vsel %vm3887_vm0, %v2857_v40, %v2074_v21 }
 0x1e8   : > { %1869 = vrot.lane.b32.xlu1 %v3827_v26, %s2967_s19 }
 0x1e9   : > { %v2194_v8 = vpop.permute.xlu0 %2193  ;;  %v2228_v30 = vpop.permute.xlu1 %2227 }
 0x1ea   : > { %2282 = vst.msk [vmem:[#allocation3 + $0x20] sm:$0xf] %vm2273_vm4, %v2194_v8  ;;  %2299 = vst.msk [vmem:[#allocation3 + $0x64] sm:$0xf] %vm2273_vm4, %v2228_v30 }
 0x1eb   : > { %1867 = vrot.lane.b32.xlu0 %v3832_v0, %s2967_s19 }
 0x1ec   : > { %2183 = vrot.lane.b32.xlu1 %v4428_v45, %s2968_s20 }
 0x1ed   : > { %v2226_v6 = vpop.permute.xlu0 %2225  ;;  %v2335_v26 = vpop.permute.xlu1 %2334 }
 0x1ee   : > { %2298 = vst.msk [vmem:[#allocation3 + $0x60] sm:$0xf] %vm2273_vm4, %v2226_v6 }
 0x1ef   : > { %2181 = vrot.lane.b32.xlu0 %v4432_v51, %s2968_s20  ;;  %2422 = vst.msk [vmem:[#allocation3 + $0x24] sm:$0xf] %vm2412_vm5, %v2335_v26 }
 0x1f0   : > { %2215 = vrot.lane.b32.xlu1 %v3967_v41, %s2968_s20 }
 0x1f1   : > { %v2333_v0 = vpop.permute.xlu0 %2332  ;;  %v2367_v1 = vpop.permute.xlu1 %2366 }
 0x1f2   : > { %2421 = vst.msk [vmem:[#allocation3 + $0x20] sm:$0xf] %vm2412_vm5, %v2333_v0  ;;  %2438 = vst.msk [vmem:[#allocation3 + $0x64] sm:$0xf] %vm2412_vm5, %v2367_v1 }
 0x1f3   : > { %2213 = vrot.lane.b32.xlu0 %v3951_v29, %s2968_s20 }
 0x1f4   : > { %2322 = vrot.lane.b32.xlu1 %v4350_v58, %s2969_s21 }
 0x1f5   : > { %v2365_v34 = vpop.permute.xlu0 %2364  ;;  %v2474_v44 = vpop.permute.xlu1 %2473 }
 0x1f6   : > { %2437 = vst.msk [vmem:[#allocation3 + $0x60] sm:$0xf] %vm2412_vm5, %v2365_v34 }
 0x1f7   : > { %2320 = vrot.lane.b32.xlu0 %v4354_v63, %s2969_s21  ;;  %2561 = vst.msk [vmem:[#allocation3 + $0x24] sm:$0xf] %vm2551_vm6, %v2474_v44 }
 0x1f8   : > { %2354 = vrot.lane.b32.xlu1 %v4364_v18, %s2969_s21 }
 0x1f9   : > { %v2472_v9 = vpop.permute.xlu0 %2471 }
 0x1fa   : > { %2560 = vst.msk [vmem:[#allocation3 + $0x20] sm:$0xf] %vm2551_vm6, %v2472_v9  ;;  %v2506_v55 = vpop.permute.xlu1 %2505 }
 0x1fb   : > { %2352 = vrot.lane.b32.xlu0 %v4368_v54, %s2969_s21  ;;  %2577 = vst.msk [vmem:[#allocation3 + $0x64] sm:$0xf] %vm2551_vm6, %v2506_v55 }
 0x1fc   : > { %2461 = vrot.lane.b32.xlu1 %v4272_v2, %s2970_s22 }
 0x1fd   : > { %v2504_v14 = vpop.permute.xlu0 %2503 }
 0x1fe   : > { %2576 = vst.msk [vmem:[#allocation3 + $0x60] sm:$0xf] %vm2551_vm6, %v2504_v14  ;;  %v1693_v31 = vpop.permute.xlu1 %1692 }
 0x1ff   : > { %2459 = vrot.lane.b32.xlu0 %v4276_v12, %s2970_s22  ;;  %1782 = vst.msk [vmem:[#allocation3 + $0x1c] sm:$0xf] %vm1774_vm2, %v1693_v31 }
 0x200   : > { %2493 = vrot.lane.b32.xlu1 %v4286_v62, %s2970_s22 }
 0x201   : > { %v1691_v53 = vpop.permute.xlu0 %1690  ;;  %v2945_v4 = vld [vmem:[#allocation3 + $0x20] sm:$0xff]  }
 0x202   : > { %1781 = vst.msk [vmem:[#allocation3 + $0x18] sm:$0xf] %vm1774_vm2, %v1691_v53  ;;  %v1725_v50 = vpop.permute.xlu1 %1724  ;;  %v2714_v2 = vsel %vm2697_vm7, %v2945_v4, 0 }
 0x203   : > { %2491 = vrot.lane.b32.xlu0 %v4290_v42, %s2970_s22  ;;  %1798 = vst.msk [vmem:[#allocation3 + $0x5c] sm:$0xf] %vm1774_vm2, %v1725_v50  ;;  %v1961_v42 = vld [vmem:[#allocation2 + $0x4] sm:$0xf] }
 0x204   : > { %1680 = vrot.lane.b32.xlu1 %v3646_v56, %s2966_s18  ;;  %v2067_v56 = vrot.slane %v1961_v42, 5 }
 0x205   : > { %v1723_v57 = vpop.permute.xlu0 %1722  ;;  %v2944_v22 = vld [vmem:[#allocation3 + $0x60] sm:$0xff]  }
 0x206   : > { %1797 = vst.msk [vmem:[#allocation3 + $0x58] sm:$0xf] %vm1774_vm2, %v1723_v57  ;;  %2916 = vmatprep.subr.msk.bf16.mxu0 %vm2697_vm7, %v2944_v22  ;;  %v1846_v12 = vpop.permute.xlu1 %1845  ;;  %v2069_v59 = vrot.slane %v2067_v56, 4 }
 0x207   : > { %1678 = vrot.lane.b32.xlu0 %v3635_v38, %s2966_s18  ;;  %2902 = vmatpush3.bf16.xpose.msra.mxu0 %v2714_v2  ;;  %1935 = vst.msk [vmem:[#allocation3 + $0x1c] sm:$0xf] %vm1927_vm3, %v1846_v12 }
 0x208   : > { %1712 = vrot.lane.b32.xlu1 %v3799_v60, %s2966_s18  ;;  %v2070_v60 = vrot.slane %v1962_v43, 5 }
 0x209   : > { %v1844_v62 = vpop.permute.xlu0 %1843 }
 0x20a   : > { %1934 = vst.msk [vmem:[#allocation3 + $0x18] sm:$0xf] %vm1927_vm3, %v1844_v62  ;;  %v1878_v38 = vpop.permute.xlu1 %1877 }
 0x20b   : > { %1710 = vrot.lane.b32.xlu0 %v3786_v36, %s2966_s18  ;;  %1951 = vst.msk [vmem:[#allocation3 + $0x5c] sm:$0xf] %vm1927_vm3, %v1878_v38 }
 0x20c   : > { %1833 = vrot.lane.b32.xlu1 %v3675_v39, %s2967_s19  ;;  %v2071_v39 = vsel %vm3887_vm0, %v2069_v59, %v2070_v60 }
 0x20d   : > { %v1876_v17 = vpop.permute.xlu0 %1875 }
 0x20e   : > { %1950 = vst.msk [vmem:[#allocation3 + $0x58] sm:$0xf] %vm1927_vm3, %v1876_v17  ;;  %v2192_v48 = vpop.permute.xlu1 %2191 }
 0x20f   : > { %1831 = vrot.lane.b32.xlu0 %v3653_v20, %s2967_s19  ;;  %2281 = vst.msk [vmem:[#allocation3 + $0x1c] sm:$0xf] %vm2273_vm4, %v2192_v48  ;;  %v2068_v20 = vsel %vm3887_vm0, %v2856_v5, %v2067_v56 }
 0x210   : > { %1865 = vrot.lane.b32.xlu1 %v3815_v23, %s2967_s19 }
 0x211   : > { %v2190_v36 = vpop.permute.xlu0 %2189 }
 0x212   : > { %2280 = vst.msk [vmem:[#allocation3 + $0x18] sm:$0xf] %vm2273_vm4, %v2190_v36  ;;  %v2224_v15 = vpop.permute.xlu1 %2223 }
 0x213   : > { %1863 = vrot.lane.b32.xlu0 %v3807_v19, %s2967_s19  ;;  %2297 = vst.msk [vmem:[#allocation3 + $0x5c] sm:$0xf] %vm2273_vm4, %v2224_v15 }
 0x214   : > { %2179 = vrot.lane.b32.xlu1 %v2071_v39, %s2968_s20 }
 0x215   : > { %v2222_v16 = vpop.permute.xlu0 %2221 }
 0x216   : > { %2296 = vst.msk [vmem:[#allocation3 + $0x58] sm:$0xf] %vm2273_vm4, %v2222_v16  ;;  %v2331_v23 = vpop.permute.xlu1 %2330 }
 0x217   : > { %2177 = vrot.lane.b32.xlu0 %v2068_v20, %s2968_s20  ;;  %2420 = vst.msk [vmem:[#allocation3 + $0x1c] sm:$0xf] %vm2412_vm5, %v2331_v23 }
 0x218   : > { %2211 = vrot.lane.b32.xlu1 %v3941_v46, %s2968_s20 }
 0x219   : > { %v2329_v25 = vpop.permute.xlu0 %2328 }
 0x21a   : > { %2419 = vst.msk [vmem:[#allocation3 + $0x18] sm:$0xf] %vm2412_vm5, %v2329_v25  ;;  %v2363_v19 = vpop.permute.xlu1 %2362 }
 0x21b   : > { %2209 = vrot.lane.b32.xlu0 %v3923_v28, %s2968_s20  ;;  %2436 = vst.msk [vmem:[#allocation3 + $0x5c] sm:$0xf] %vm2412_vm5, %v2363_v19 }
 0x21c   : > { %2318 = vrot.lane.b32.xlu1 %v4428_v45, %s2969_s21 }
 0x21d   : > { %v2361_v32 = vpop.permute.xlu0 %2360 }
 0x21e   : > { %2435 = vst.msk [vmem:[#allocation3 + $0x58] sm:$0xf] %vm2412_vm5, %v2361_v32  ;;  %v2470_v49 = vpop.permute.xlu1 %2469 }
 0x21f   : > { %2316 = vrot.lane.b32.xlu0 %v4432_v51, %s2969_s21  ;;  %2559 = vst.msk [vmem:[#allocation3 + $0x1c] sm:$0xf] %vm2551_vm6, %v2470_v49 }
 0x220   : > { %2350 = vrot.lane.b32.xlu1 %v3967_v41, %s2969_s21 }
 0x221   : > { %v2468_v7 = vpop.permute.xlu0 %2467 }
 0x222   : > { %2558 = vst.msk [vmem:[#allocation3 + $0x18] sm:$0xf] %vm2551_vm6, %v2468_v7  ;;  %v2502_v28 = vpop.permute.xlu1 %2501 }
 0x223   : > { %2348 = vrot.lane.b32.xlu0 %v3951_v29, %s2969_s21  ;;  %2575 = vst.msk [vmem:[#allocation3 + $0x5c] sm:$0xf] %vm2551_vm6, %v2502_v28 }
 0x224   : > { %2457 = vrot.lane.b32.xlu1 %v4350_v58, %s2970_s22 }
 0x225   : > { %v2500_v46 = vpop.permute.xlu0 %2499 }
 0x226   : > { %2574 = vst.msk [vmem:[#allocation3 + $0x58] sm:$0xf] %vm2551_vm6, %v2500_v46  ;;  %v1689_v41 = vpop.permute.xlu1 %1688 }
 0x227   : > { %2455 = vrot.lane.b32.xlu0 %v4354_v63, %s2970_s22  ;;  %1780 = vst.msk [vmem:[#allocation3 + $0x14] sm:$0xf] %vm1774_vm2, %v1689_v41 }
 0x228   : > { %2489 = vrot.lane.b32.xlu1 %v4364_v18, %s2970_s22 }
 0x229   : > { %v1687_v61 = vpop.permute.xlu0 %1686  ;;  %v2947_v29 = vld [vmem:[#allocation3 + $0x18] sm:$0xff]  }
 0x22a   : > { %1779 = vst.msk [vmem:[#allocation3 + $0x10] sm:$0xf] %vm1774_vm2, %v1687_v61  ;;  %v1721_v58 = vpop.permute.xlu1 %1720  ;;  %v2711_v33 = vsel %vm2697_vm7, %v2947_v29, 0 }
 0x22b   : > { %2487 = vrot.lane.b32.xlu0 %v4368_v54, %s2970_s22  ;;  %1796 = vst.msk [vmem:[#allocation3 + $0x54] sm:$0xf] %vm1774_vm2, %v1721_v58 }
 0x22d   : > { %v1719_v63 = vpop.permute.xlu0 %1718  ;;  %v2946_v10 = vld [vmem:[#allocation3 + $0x58] sm:$0xff]  }
 0x22e   : > { %1795 = vst.msk [vmem:[#allocation3 + $0x50] sm:$0xf] %vm1774_vm2, %v1719_v63  ;;  %2917 = vmatprep.subr.msk.bf16.mxu0 %vm2697_vm7, %v2946_v10  ;;  %v1842_v21 = vpop.permute.xlu1 %1841 }
 0x22f   : > { %2904 = vmatpush3.bf16.xpose.msra.mxu0 %v2711_v33  ;;  %1933 = vst.msk [vmem:[#allocation3 + $0x14] sm:$0xf] %vm1927_vm3, %v1842_v21 }
 0x231   : > { %v1840_v3 = vpop.permute.xlu0 %1839 }
 0x232   : > { %1932 = vst.msk [vmem:[#allocation3 + $0x10] sm:$0xf] %vm1927_vm3, %v1840_v3  ;;  %v1874_v18 = vpop.permute.xlu1 %1873 }
 0x233   : > { %1949 = vst.msk [vmem:[#allocation3 + $0x54] sm:$0xf] %vm1927_vm3, %v1874_v18 }
 0x235   : > { %v1872_v54 = vpop.permute.xlu0 %1871 }
 0x236   : > { %1948 = vst.msk [vmem:[#allocation3 + $0x50] sm:$0xf] %vm1927_vm3, %v1872_v54  ;;  %v2188_v13 = vpop.permute.xlu1 %2187 }
 0x237   : > { %2279 = vst.msk [vmem:[#allocation3 + $0x14] sm:$0xf] %vm2273_vm4, %v2188_v13 }
 0x239   : > { %v2186_v35 = vpop.permute.xlu0 %2185 }
 0x23a   : > { %2278 = vst.msk [vmem:[#allocation3 + $0x10] sm:$0xf] %vm2273_vm4, %v2186_v35  ;;  %v2220_v24 = vpop.permute.xlu1 %2219 }
 0x23b   : > { %2295 = vst.msk [vmem:[#allocation3 + $0x54] sm:$0xf] %vm2273_vm4, %v2220_v24 }
 0x23d   : > { %v2218_v47 = vpop.permute.xlu0 %2217 }
 0x23e   : > { %2294 = vst.msk [vmem:[#allocation3 + $0x50] sm:$0xf] %vm2273_vm4, %v2218_v47  ;;  %v2327_v27 = vpop.permute.xlu1 %2326 }
 0x23f   : > { %2418 = vst.msk [vmem:[#allocation3 + $0x14] sm:$0xf] %vm2412_vm5, %v2327_v27 }
 0x241   : > { %v2325_v40 = vpop.permute.xlu0 %2324 }
 0x242   : > { %2417 = vst.msk [vmem:[#allocation3 + $0x10] sm:$0xf] %vm2412_vm5, %v2325_v40  ;;  %v2359_v52 = vpop.permute.xlu1 %2358 }
 0x243   : > { %2434 = vst.msk [vmem:[#allocation3 + $0x54] sm:$0xf] %vm2412_vm5, %v2359_v52 }
 0x245   : > { %v2357_v8 = vpop.permute.xlu0 %2356 }
 0x246   : > { %2433 = vst.msk [vmem:[#allocation3 + $0x50] sm:$0xf] %vm2412_vm5, %v2357_v8  ;;  %v2466_v45 = vpop.permute.xlu1 %2465 }
 0x247   : > { %2557 = vst.msk [vmem:[#allocation3 + $0x14] sm:$0xf] %vm2551_vm6, %v2466_v45 }
 0x249   : > { %v2464_v51 = vpop.permute.xlu0 %2463 }
 0x24a   : > { %2556 = vst.msk [vmem:[#allocation3 + $0x10] sm:$0xf] %vm2551_vm6, %v2464_v51  ;;  %v2498_v30 = vpop.permute.xlu1 %2497 }
 0x24b   : > { %2573 = vst.msk [vmem:[#allocation3 + $0x54] sm:$0xf] %vm2551_vm6, %v2498_v30 }
 0x24d   : > { %v2496_v6 = vpop.permute.xlu0 %2495 }
 0x24e   : > { %2572 = vst.msk [vmem:[#allocation3 + $0x50] sm:$0xf] %vm2551_vm6, %v2496_v6  ;;  %v1685_v26 = vpop.permute.xlu1 %1684 }
 0x24f   : > { %1778 = vst.msk [vmem:[#allocation3 + $0xc] sm:$0xf] %vm1774_vm2, %v1685_v26 }
 0x251   : > { %v1683_v0 = vpop.permute.xlu0 %1682  ;;  %v2949_v1 = vld [vmem:[#allocation3 + $0x10] sm:$0xff]  }
 0x252   : > { %1777 = vst.msk [vmem:[#allocation3 + $0x8] sm:$0xf] %vm1774_vm2, %v1683_v0  ;;  %v1717_v34 = vpop.permute.xlu1 %1716  ;;  %v2708_v55 = vsel %vm2697_vm7, %v2949_v1, 0 }
 0x253   : > { %1794 = vst.msk [vmem:[#allocation3 + $0x4c] sm:$0xf] %vm1774_vm2, %v1717_v34 }
 0x255   : > { %v1715_v44 = vpop.permute.xlu0 %1714  ;;  %v2948_v9 = vld [vmem:[#allocation3 + $0x50] sm:$0xff]  }
 0x256   : > { %1793 = vst.msk [vmem:[#allocation3 + $0x48] sm:$0xf] %vm1774_vm2, %v1715_v44  ;;  %2918 = vmatprep.subr.msk.bf16.mxu0 %vm2697_vm7, %v2948_v9  ;;  %v1838_v14 = vpop.permute.xlu1 %1837 }
 0x257   : > { %2906 = vmatpush3.bf16.xpose.msra.mxu0 %v2708_v55  ;;  %1931 = vst.msk [vmem:[#allocation3 + $0xc] sm:$0xf] %vm1927_vm3, %v1838_v14 }
 0x259   : > { %v1836_v31 = vpop.permute.xlu0 %1835 }
 0x25a   : > { %1930 = vst.msk [vmem:[#allocation3 + $0x8] sm:$0xf] %vm1927_vm3, %v1836_v31  ;;  %v1870_v53 = vpop.permute.xlu1 %1869 }
 0x25b   : > { %1947 = vst.msk [vmem:[#allocation3 + $0x4c] sm:$0xf] %vm1927_vm3, %v1870_v53 }
 0x25d   : > { %v1868_v4 = vpop.permute.xlu0 %1867 }
 0x25e   : > { %1946 = vst.msk [vmem:[#allocation3 + $0x48] sm:$0xf] %vm1927_vm3, %v1868_v4  ;;  %v2184_v50 = vpop.permute.xlu1 %2183 }
 0x25f   : > { %2277 = vst.msk [vmem:[#allocation3 + $0xc] sm:$0xf] %vm2273_vm4, %v2184_v50 }
 0x261   : > { %v2182_v57 = vpop.permute.xlu0 %2181 }
 0x262   : > { %2276 = vst.msk [vmem:[#allocation3 + $0x8] sm:$0xf] %vm2273_vm4, %v2182_v57  ;;  %v2216_v22 = vpop.permute.xlu1 %2215 }
 0x263   : > { %2293 = vst.msk [vmem:[#allocation3 + $0x4c] sm:$0xf] %vm2273_vm4, %v2216_v22 }
 0x265   : > { %v2214_v2 = vpop.permute.xlu0 %2213 }
 0x266   : > { %2292 = vst.msk [vmem:[#allocation3 + $0x48] sm:$0xf] %vm2273_vm4, %v2214_v2  ;;  %v2323_v12 = vpop.permute.xlu1 %2322 }
 0x267   : > { %2416 = vst.msk [vmem:[#allocation3 + $0xc] sm:$0xf] %vm2412_vm5, %v2323_v12 }
 0x269   : > { %v2321_v62 = vpop.permute.xlu0 %2320 }
 0x26a   : > { %2415 = vst.msk [vmem:[#allocation3 + $0x8] sm:$0xf] %vm2412_vm5, %v2321_v62  ;;  %v2355_v42 = vpop.permute.xlu1 %2354 }
 0x26b   : > { %2432 = vst.msk [vmem:[#allocation3 + $0x4c] sm:$0xf] %vm2412_vm5, %v2355_v42 }
 0x26d   : > { %v2353_v56 = vpop.permute.xlu0 %2352 }
 0x26e   : > { %2431 = vst.msk [vmem:[#allocation3 + $0x48] sm:$0xf] %vm2412_vm5, %v2353_v56  ;;  %v2462_v38 = vpop.permute.xlu1 %2461 }
 0x26f   : > { %2555 = vst.msk [vmem:[#allocation3 + $0xc] sm:$0xf] %vm2551_vm6, %v2462_v38 }
 0x271   : > { %v2460_v17 = vpop.permute.xlu0 %2459 }
 0x272   : > { %2554 = vst.msk [vmem:[#allocation3 + $0x8] sm:$0xf] %vm2551_vm6, %v2460_v17  ;;  %v2494_v43 = vpop.permute.xlu1 %2493 }
 0x273   : > { %2571 = vst.msk [vmem:[#allocation3 + $0x4c] sm:$0xf] %vm2551_vm6, %v2494_v43 }
 0x275   : > { %v2492_v11 = vpop.permute.xlu0 %2491 }
 0x276   : > { %2570 = vst.msk [vmem:[#allocation3 + $0x48] sm:$0xf] %vm2551_vm6, %v2492_v11  ;;  %v1681_v59 = vpop.permute.xlu1 %1680 }
 0x277   : > { %1776 = vst.msk [vmem:[#allocation3 + $0x4] sm:$0xf] %vm1774_vm2, %v1681_v59 }
 0x279   : > { %v1679_v60 = vpop.permute.xlu0 %1678  ;;  %v2951_v5 = vld [vmem:[#allocation3 + $0x8] sm:$0xff]  }
 0x27a   : > { %1775 = vst.msk [vmem:[#allocation3] sm:$0xf] %vm1774_vm2, %v1679_v60  ;;  %v1713_v48 = vpop.permute.xlu1 %1712  ;;  %v2705_v20 = vsel %vm2697_vm7, %v2951_v5, 0 }
 0x27b   : > { %1792 = vst.msk [vmem:[#allocation3 + $0x44] sm:$0xf] %vm1774_vm2, %v1713_v48 }
 0x27d   : > { %v1711_v36 = vpop.permute.xlu0 %1710  ;;  %v2950_v39 = vld [vmem:[#allocation3 + $0x48] sm:$0xff]  }
 0x27e   : > { %1791 = vst.msk [vmem:[#allocation3 + $0x40] sm:$0xf] %vm1774_vm2, %v1711_v36  ;;  %2919 = vmatprep.subr.msk.bf16.mxu0 %vm2697_vm7, %v2950_v39  ;;  %v1834_v15 = vpop.permute.xlu1 %1833 }
 0x27f   : > { %2908 = vmatpush3.bf16.xpose.msra.mxu0 %v2705_v20  ;;  %1929 = vst.msk [vmem:[#allocation3 + $0x4] sm:$0xf] %vm1927_vm3, %v1834_v15 }
 0x281   : > { %v1832_v16 = vpop.permute.xlu0 %1831 }
 0x282   : > { %1928 = vst.msk [vmem:[#allocation3] sm:$0xf] %vm1927_vm3, %v1832_v16  ;;  %v1866_v23 = vpop.permute.xlu1 %1865 }
 0x283   : > { %1945 = vst.msk [vmem:[#allocation3 + $0x44] sm:$0xf] %vm1927_vm3, %v1866_v23 }
 0x285   : > { %v1864_v25 = vpop.permute.xlu0 %1863 }
 0x286   : > { %1944 = vst.msk [vmem:[#allocation3 + $0x40] sm:$0xf] %vm1927_vm3, %v1864_v25  ;;  %v2180_v19 = vpop.permute.xlu1 %2179 }
 0x287   : > { %2275 = vst.msk [vmem:[#allocation3 + $0x4] sm:$0xf] %vm2273_vm4, %v2180_v19 }
 0x289   : > { %v2178_v32 = vpop.permute.xlu0 %2177 }
 0x28a   : > { %2274 = vst.msk [vmem:[#allocation3] sm:$0xf] %vm2273_vm4, %v2178_v32  ;;  %v2212_v49 = vpop.permute.xlu1 %2211 }
 0x28b   : > { %2291 = vst.msk [vmem:[#allocation3 + $0x44] sm:$0xf] %vm2273_vm4, %v2212_v49 }
 0x28d   : > { %v2210_v7 = vpop.permute.xlu0 %2209 }
 0x28e   : > { %2290 = vst.msk [vmem:[#allocation3 + $0x40] sm:$0xf] %vm2273_vm4, %v2210_v7  ;;  %v2319_v28 = vpop.permute.xlu1 %2318 }
 0x28f   : > { %2414 = vst.msk [vmem:[#allocation3 + $0x4] sm:$0xf] %vm2412_vm5, %v2319_v28 }
 0x291   : > { %v2317_v46 = vpop.permute.xlu0 %2316 }
 0x292   : > { %2413 = vst.msk [vmem:[#allocation3] sm:$0xf] %vm2412_vm5, %v2317_v46  ;;  %v2351_v41 = vpop.permute.xlu1 %2350 }
 0x293   : > { %2430 = vst.msk [vmem:[#allocation3 + $0x44] sm:$0xf] %vm2412_vm5, %v2351_v41 }
 0x295   : > { %v2349_v61 = vpop.permute.xlu0 %2348 }
 0x296   : > { %2429 = vst.msk [vmem:[#allocation3 + $0x40] sm:$0xf] %vm2412_vm5, %v2349_v61  ;;  %v2458_v29 = vpop.permute.xlu1 %2457 }
 0x297   : > { %2553 = vst.msk [vmem:[#allocation3 + $0x4] sm:$0xf] %vm2551_vm6, %v2458_v29 }
 0x299   : > { %v2456_v58 = vpop.permute.xlu0 %2455 }
 0x29a   : > { %2552 = vst.msk [vmem:[#allocation3] sm:$0xf] %vm2551_vm6, %v2456_v58  ;;  %v2490_v63 = vpop.permute.xlu1 %2489 }
 0x29b   : > { %2569 = vst.msk [vmem:[#allocation3 + $0x44] sm:$0xf] %vm2551_vm6, %v2490_v63 }
 0x29d   : > { %v2488_v10 = vpop.permute.xlu0 %2487 }
 0x29e   : > { %2568 = vst.msk [vmem:[#allocation3 + $0x40] sm:$0xf] %vm2551_vm6, %v2488_v10 }
 0x2a1   : > { %v2953_v33 = vld [vmem:[#allocation3] sm:$0xff]  }
 0x2a2   : > { %v2702_v3 = vsel %vm2697_vm7, %v2953_v33, 0 }
 0x2a5   : > { %v2952_v21 = vld [vmem:[#allocation3 + $0x40] sm:$0xff]  }
 0x2a6   : > { %2920 = vmatprep.subr.msk.bf16.mxu0 %vm2697_vm7, %v2952_v21 }
 0x2a7   : > { %2910 = vmatpush3.bf16.xpose.msra.mxu0 %v2702_v3 }
 0x2ae   : > { %2912 = vmatmul.mubr.msk.bf16.vlgmr.msra.gmra.mxu0 %vm2697_vm7, %v4531_v37 }
 0x36e   : > { %v2783_v18 = vpop.f32.mrf.mxu0 }
 0x36f   : > { %2790 = vst [vmem:[%s143_s28] sm:$0xff] %v2783_v18 }
 0x370   : > { %v2785_v54 = vpop.f32.mrf.mxu0 }
 0x371   : > { %2791 = vst [vmem:[%s143_s28 + $0x8] sm:$0xff] %v2785_v54 }
 0x372   : > { %v2787_v13 = vpop.f32.mrf.mxu0 }
 0x374   : > { %v2788_v35 = vpop.f32.mrf.mxu0 }
 0x375 PF: > { %s12_s9 = sadd.s32 1, %s2960_s9  }
 0x376   : > { %p9_p4 = scmp.ge.s32.totalorder %s12_s9, 4  }
 0x378   :  { %11 = sbr.rel (!%p9_p4) target bundleno = 1 (0x1), region = 60 }

</bundles_post_ra>
